<compile_context>
chip_gen: v7x
topology: tpu7x:2x2x1
jax: 0.10.0
libtpu: 0.0.40
codegen_flags: <defaults>
</compile_context>

<pallas_src>
import numpy as np
import jax
import jax.numpy as jnp
from jax import lax
from jax.experimental import pallas as pl
from jax.experimental.pallas import tpu as pltpu

# ----------------------------- geometry (LeNet, 28x28 input) -----------------
B = 2                      # batch (constants below are built for this batch)
K = 3                      # conv kernel size
H0 = 28                    # input spatial
C1 = 6                     # conv1 out channels
H1 = H0 - K + 1            # 26
P1 = H1 // 2               # 13
C2 = 16                    # conv2 out channels
H2 = P1 - K + 1            # 11
P2 = H2 // 2               # 5
F_IN = C2 * P2 * P2        # 400
F1, F2, F3 = 120, 84, 10

VMEM_SPEC = pl.BlockSpec(memory_space=pltpu.MemorySpace.VMEM)


# ----------------------------- fused kernel ----------------------------------
def _lenet_kernel(x_ref, a1_ref, a2_ref, ss1_ref, ss2_ref,
                  w1_ref, w2_ref, w3_ref, fcb_ref, o_ref):
    f32 = jnp.float32

    def dot32(a, b):
        return jnp.dot(a, b, preferred_element_type=f32)

    # ---- conv1 (+bias) as ONE MXU matmul over stacked column-shifted slabs.
    x = x_ref[...]                                               # (56, 28) f32
    rhs1 = jnp.concatenate(
        [x[:, 0:H1], x[:, 1:1 + H1], x[:, 2:2 + H1],
         jnp.ones((1, H1), f32)], axis=0)                        # (169, 26)
    a1 = dot32(a1_ref[...].astype(f32), rhs1)                    # (312, 26)

    # ---- pool1: row pairs = parity halves (free), col pairs = packed 0/1 matmul.
    half1 = B * C1 * P1                                          # 156
    rm1 = jnp.maximum(a1[0:half1, :], a1[half1:2 * half1, :])    # (156, 26)
    mc1 = dot32(rm1, ss1_ref[...])                               # (156, 26) [even|odd]
    h1 = jnp.maximum(jnp.maximum(mc1[:, 0:P1], mc1[:, P1:2 * P1]), 0.0)   # (156, 13)

    # ---- conv2 (+bias), same scheme (rows (b, ci, row) match A2's columns).
    rhs2 = jnp.concatenate(
        [h1[:, 0:H2], h1[:, 1:1 + H2], h1[:, 2:2 + H2],
         jnp.ones((1, H2), f32)], axis=0)                        # (469, 11)
    a2 = dot32(a2_ref[...].astype(f32), rhs2)                    # (320, 11)

    half2 = B * C2 * P2                                          # 160
    rm2 = jnp.maximum(a2[0:half2, :], a2[half2:2 * half2, :])    # (160, 11)
    mc2 = dot32(rm2, ss2_ref[...])                               # (160, 10)
    h2 = jnp.maximum(jnp.maximum(mc2[:, 0:P2], mc2[:, P2:2 * P2]), 0.0)   # (160, 5)

    # ---- flatten to (F_IN, B), rows ordered (j, c, i); W1 rows were permuted
    #      in the wrapper to match, so this reproduces x.view(B, -1) @ W1.
    cols = []
    for b in range(B):
        blk = h2[b * C2 * P2:(b + 1) * C2 * P2, :]               # (80, 5)
        cols.append(jnp.concatenate([blk[:, j:j + 1] for j in range(P2)],
                                    axis=0))                     # (400, 1)
    flat_t = jnp.concatenate(cols, axis=1)                       # (400, B)

    # ---- MLP head (features x batch), biases from the packed (120, 3) buffer.
    b1 = fcb_ref[0:F1, 0:1]
    b2 = fcb_ref[0:F2, 1:2]
    b3 = fcb_ref[0:F3, 2:3]
    z = jnp.maximum(dot32(w1_ref[...].astype(f32), flat_t) + b1, 0.0)    # (120, B)
    z = jnp.maximum(dot32(w2_ref[...], z) + b2, 0.0)                     # (84, B)
    z = dot32(w3_ref[...], z) + b3                                       # (10, B)
    o_ref[...] = z.T                                                     # (B, 10)


# ----------------------------- one-time host-side constant folding -----------
def _conv_cat_matrix(w, bias, cin, cout, hin, batch):
    """Fold conv weights + bias into one left-multiply matrix.

    Output rows are parity-split: row = par*(batch*cout*pout) + (b*cout+c)*pout + i
    represents conv output at (b, c, spatial_row=2*i+par); pairing the two halves
    is exactly the 2x2 row pooling (the last odd conv row of conv2 is never built).
    Columns index the kernel's stacked RHS: dj*(batch*cin*hin) + b*(cin*hin)
    + ci*hin + (2*i+par+di), plus a final bias column that hits the ones row.
    """
    hout = hin - K + 1
    pout = hout // 2
    rows_n = 2 * batch * cout * pout
    cols_n = K * batch * cin * hin + 1
    a = np.zeros((rows_n, cols_n), np.float32)
    for par in range(2):
        for dj in range(K):
            for di in range(K):
                b, c, i, ci = np.meshgrid(np.arange(batch), np.arange(cout),
                                          np.arange(pout), np.arange(cin),
                                          indexing="ij")
                r = par * (batch * cout * pout) + (b * cout + c) * pout + i
                col = (dj * (batch * cin * hin) + b * (cin * hin)
                       + ci * hin + (2 * i + par + di))
                a[r.ravel(), col.ravel()] = w[c.ravel(), ci.ravel(), di, dj]
    for par in range(2):
        b, c, i = np.meshgrid(np.arange(batch), np.arange(cout), np.arange(pout),
                              indexing="ij")
        r = par * (batch * cout * pout) + (b * cout + c) * pout + i
        a[r.ravel(), cols_n - 1] = bias[c.ravel()]
    return a


def _colpool_packed(h):
    """Packed [even | odd] column selectors for 2x2 stride-2 column pooling."""
    hp = h // 2
    m = np.zeros((h, 2 * hp), np.float32)
    m[2 * np.arange(hp), np.arange(hp)] = 1.0
    m[2 * np.arange(hp) + 1, hp + np.arange(hp)] = 1.0
    return m


def prepare_lenet_constants(params, batch=B):
    """Build all kernel constants ONCE (numpy, host-side).

    NOTE: the conv matrices are batch-shape specific; rebuild if batch changes.
    """
    wc1, bc1, wc2, bc2, wf1, bf1, wf2, bf2, wf3, bf3 = [
        np.asarray(p, np.float32) for p in params]

    a1 = _conv_cat_matrix(wc1, bc1, 1, C1, H0, batch)       # (312, 169)
    a2 = _conv_cat_matrix(wc2, bc2, C1, C2, P1, batch)      # (320, 469)
    ss1 = _colpool_packed(H1)                                # (26, 26)
    ss2 = _colpool_packed(H2)                                # (11, 10)

    # fc1 rows permuted from PyTorch flatten order (c, i, j) to the kernel's
    # flatten order (j, c, i), then transposed for the feature-major head.
    c, i, j = np.meshgrid(np.arange(C2), np.arange(P2), np.arange(P2),
                          indexing="ij")
    src = ((c * P2 + i) * P2 + j).ravel()
    dst = ((j * C2 + c) * P2 + i).ravel()
    w1p = np.zeros((F_IN, F1), np.float32)
    w1p[dst, :] = wf1[src, :]

    fcb = np.zeros((F1, 3), np.float32)                      # packed fc biases
    fcb[:F1, 0] = bf1
    fcb[:F2, 1] = bf2
    fcb[:F3, 2] = bf3

    # Large constants stored bf16 (halves HBM->VMEM DMA); f32 accumulation in-kernel.
    return (jnp.asarray(a1, jnp.bfloat16),
            jnp.asarray(a2, jnp.bfloat16),
            jnp.asarray(ss1, jnp.float32),
            jnp.asarray(ss2, jnp.float32),
            jnp.asarray(w1p.T, jnp.bfloat16),                # (120, 400)
            jnp.asarray(wf2.T, jnp.float32),                 # (84, 120)
            jnp.asarray(wf3.T, jnp.float32),                 # (10, 84)
            jnp.asarray(fcb, jnp.float32))


# ----------------------------- forward ---------------------------------------
@jax.jit
def lenet_forward(x_nchw, consts):
    batch = x_nchw.shape[0]
    assert batch == B, "constants were prepared for batch = B"
    x2d = x_nchw[:, 0, :, :].reshape(batch * H0, H0)         # (56, 28)
    return pl.pallas_call(
        _lenet_kernel,
        out_shape=jax.ShapeDtypeStruct((batch, F3), jnp.float32),
        in_specs=[VMEM_SPEC] * 9,
        out_specs=VMEM_SPEC,
    )(x2d, *consts)


# ----------------------------- pure-JAX reference ----------------------------
def lenet_reference(x_nchw, params):
    (wc1, bc1, wc2, bc2, wf1, bf1, wf2, bf2, wf3, bf3) = params
    dn = ('NCHW', 'OIHW', 'NCHW')
    hp = lax.Precision.HIGHEST

    y = lax.conv_general_dilated(x_nchw, wc1, (1, 1), 'VALID',
                                 dimension_numbers=dn, precision=hp)
    y = jax.nn.relu(y + bc1[None, :, None, None])
    y = lax.reduce_window(y, -jnp.inf, lax.max, (1, 1, 2, 2), (1, 1, 2, 2),
                          'VALID')
    y = lax.conv_general_dilated(y, wc2, (1, 1), 'VALID',
                                 dimension_numbers=dn, precision=hp)
    y = jax.nn.relu(y + bc2[None, :, None, None])
    y = lax.reduce_window(y, -jnp.inf, lax.max, (1, 1, 2, 2), (1, 1, 2, 2),
                          'VALID')
    y = y.reshape(y.shape[0], -1)                            # (B, 400), NCHW flatten
    y = jax.nn.relu(jnp.dot(y, wf1, precision=hp) + bf1)
    y = jax.nn.relu(jnp.dot(y, wf2, precision=hp) + bf2)
    return jnp.dot(y, wf3, precision=hp) + bf3


# ----------------------------- main -------------------------------------------
if __name__ == "__main__":
    key = jax.random.PRNGKey(0)
    ks = jax.random.split(key, 11)

    # Deterministic synthetic parameters (shapes from LeNet.__init__).
    # Linear weights are stored (in, out) so the math is x @ W + b.
    params = (
        0.20 * jax.random.normal(ks[0], (C1, 1, K, K), jnp.float32),   # conv1.w
        0.05 * jax.random.normal(ks[1], (C1,), jnp.float32),           # conv1.b
        0.08 * jax.random.normal(ks[2], (C2, C1, K, K), jnp.float32),  # conv2.w
        0.05 * jax.random.normal(ks[3], (C2,), jnp.float32),           # conv2.b
        0.05 * jax.random.normal(ks[4], (F_IN, F1), jnp.float32),      # fc1.w
        0.05 * jax.random.normal(ks[5], (F1,), jnp.float32),           # fc1.b
        0.09 * jax.random.normal(ks[6], (F1, F2), jnp.float32),        # fc2.w
        0.05 * jax.random.normal(ks[7], (F2,), jnp.float32),           # fc2.b
        0.11 * jax.random.normal(ks[8], (F2, F3), jnp.float32),        # fc3.w
        0.05 * jax.random.normal(ks[9], (F3,), jnp.float32),           # fc3.b
    )

    x = jax.random.normal(ks[10], (B, 1, H0, H0), jnp.float32)

    # One-time constant folding (hoisted out of the forward pass).
    consts = jax.block_until_ready(prepare_lenet_constants(params, B))

    out = jax.block_until_ready(lenet_forward(x, consts))
    ref = jax.block_until_ready(lenet_reference(x, params))

    assert out.shape == (B, F3), out.shape
    err = float(jnp.max(jnp.abs(out - ref)))
    # bf16 weight storage costs ~4e-3 max abs error vs the f32 HIGHEST reference.
    if not err < 2e-2:
        raise SystemExit(f"mismatch vs reference: max abs err = {err}")

    print("KERNEL_OK")
</pallas_src>

<mosaic_0001>
module attributes {stable_mosaic.version = 11 : i64} {
  func.func @_lenet_kernel(%arg0: memref<56x28xf32, #tpu.memory_space<vmem>>, %arg1: memref<312x169xbf16, #tpu.memory_space<vmem>>, %arg2: memref<320x469xbf16, #tpu.memory_space<vmem>>, %arg3: memref<26x26xf32, #tpu.memory_space<vmem>>, %arg4: memref<11x10xf32, #tpu.memory_space<vmem>>, %arg5: memref<120x400xbf16, #tpu.memory_space<vmem>>, %arg6: memref<84x120xf32, #tpu.memory_space<vmem>>, %arg7: memref<10x84xf32, #tpu.memory_space<vmem>>, %arg8: memref<120x3xf32, #tpu.memory_space<vmem>>, %arg9: memref<2x10xf32, #tpu.memory_space<vmem>>) attributes {dimension_semantics = [], scalar_prefetch = 0 : i64, scratch_operands = 0 : i64, tpu.core_type = #tpu.core_type<tc>} {
    %c0 = arith.constant 0 : index
    %c0_0 = arith.constant 0 : index
    %0 = vector.load %arg0[%c0, %c0_0] : memref<56x28xf32, #tpu.memory_space<vmem>>, vector<56x28xf32>
    %1 = vector.extract_strided_slice %0 {offsets = [0, 0], sizes = [56, 26], strides = [1, 1]} : vector<56x28xf32> to vector<56x26xf32>
    %2 = vector.extract_strided_slice %0 {offsets = [0, 1], sizes = [56, 26], strides = [1, 1]} : vector<56x28xf32> to vector<56x26xf32>
    %3 = vector.extract_strided_slice %0 {offsets = [0, 2], sizes = [56, 26], strides = [1, 1]} : vector<56x28xf32> to vector<56x26xf32>
    %cst = arith.constant 1.000000e+00 : f32
    %4 = vector.broadcast %cst : f32 to vector<1x26xf32>
    %5 = tpu.concatenate %1, %2, %3, %4 in 0 : vector<56x26xf32>, vector<56x26xf32>, vector<56x26xf32>, vector<1x26xf32> -> vector<169x26xf32>
    %c0_1 = arith.constant 0 : index
    %c0_2 = arith.constant 0 : index
    %6 = vector.load %arg1[%c0_1, %c0_2] : memref<312x169xbf16, #tpu.memory_space<vmem>>, vector<312x169xbf16>
    %7 = arith.extf %6 : vector<312x169xbf16> to vector<312x169xf32>
    %cst_3 = arith.constant dense<0.000000e+00> : vector<312x26xf32>
    %8 = tpu.matmul %7, %5, %cst_3 {dimension_numbers = #tpu.dot_dimension_numbers<[1], [0], [0], [1], [0, 0, 1, 1], [], []>} : vector<312x169xf32>, vector<169x26xf32>, vector<312x26xf32> -> vector<312x26xf32>
    %9 = vector.extract_strided_slice %8 {offsets = [0, 0], sizes = [156, 26], strides = [1, 1]} : vector<312x26xf32> to vector<156x26xf32>
    %10 = vector.extract_strided_slice %8 {offsets = [156, 0], sizes = [156, 26], strides = [1, 1]} : vector<312x26xf32> to vector<156x26xf32>
    %11 = arith.maximumf %9, %10 : vector<156x26xf32>
    %c0_4 = arith.constant 0 : index
    %c0_5 = arith.constant 0 : index
    %12 = vector.load %arg3[%c0_4, %c0_5] : memref<26x26xf32, #tpu.memory_space<vmem>>, vector<26x26xf32>
    %cst_6 = arith.constant dense<0.000000e+00> : vector<156x26xf32>
    %13 = tpu.matmul %11, %12, %cst_6 {dimension_numbers = #tpu.dot_dimension_numbers<[1], [0], [0], [1], [0, 0, 1, 1], [], []>} : vector<156x26xf32>, vector<26x26xf32>, vector<156x26xf32> -> vector<156x26xf32>
    %14 = vector.extract_strided_slice %13 {offsets = [0, 0], sizes = [156, 13], strides = [1, 1]} : vector<156x26xf32> to vector<156x13xf32>
    %15 = vector.extract_strided_slice %13 {offsets = [0, 13], sizes = [156, 13], strides = [1, 1]} : vector<156x26xf32> to vector<156x13xf32>
    %16 = arith.maximumf %14, %15 : vector<156x13xf32>
    %cst_7 = arith.constant 0.000000e+00 : f32
    %17 = vector.broadcast %cst_7 : f32 to vector<156x13xf32>
    %18 = arith.maximumf %16, %17 : vector<156x13xf32>
    %19 = vector.extract_strided_slice %18 {offsets = [0, 0], sizes = [156, 11], strides = [1, 1]} : vector<156x13xf32> to vector<156x11xf32>
    %20 = vector.extract_strided_slice %18 {offsets = [0, 1], sizes = [156, 11], strides = [1, 1]} : vector<156x13xf32> to vector<156x11xf32>
    %21 = vector.extract_strided_slice %18 {offsets = [0, 2], sizes = [156, 11], strides = [1, 1]} : vector<156x13xf32> to vector<156x11xf32>
    %cst_8 = arith.constant 1.000000e+00 : f32
    %22 = vector.broadcast %cst_8 : f32 to vector<1x11xf32>
    %23 = tpu.concatenate %19, %20, %21, %22 in 0 : vector<156x11xf32>, vector<156x11xf32>, vector<156x11xf32>, vector<1x11xf32> -> vector<469x11xf32>
    %c0_9 = arith.constant 0 : index
    %c0_10 = arith.constant 0 : index
    %24 = vector.load %arg2[%c0_9, %c0_10] : memref<320x469xbf16, #tpu.memory_space<vmem>>, vector<320x469xbf16>
    %25 = arith.extf %24 : vector<320x469xbf16> to vector<320x469xf32>
    %cst_11 = arith.constant dense<0.000000e+00> : vector<320x11xf32>
    %26 = tpu.matmul %25, %23, %cst_11 {dimension_numbers = #tpu.dot_dimension_numbers<[1], [0], [0], [1], [0, 0, 1, 1], [], []>} : vector<320x469xf32>, vector<469x11xf32>, vector<320x11xf32> -> vector<320x11xf32>
    %27 = vector.extract_strided_slice %26 {offsets = [0, 0], sizes = [160, 11], strides = [1, 1]} : vector<320x11xf32> to vector<160x11xf32>
    %28 = vector.extract_strided_slice %26 {offsets = [160, 0], sizes = [160, 11], strides = [1, 1]} : vector<320x11xf32> to vector<160x11xf32>
    %29 = arith.maximumf %27, %28 : vector<160x11xf32>
    %c0_12 = arith.constant 0 : index
    %c0_13 = arith.constant 0 : index
    %30 = vector.load %arg4[%c0_12, %c0_13] : memref<11x10xf32, #tpu.memory_space<vmem>>, vector<11x10xf32>
    %cst_14 = arith.constant dense<0.000000e+00> : vector<160x10xf32>
    %31 = tpu.matmul %29, %30, %cst_14 {dimension_numbers = #tpu.dot_dimension_numbers<[1], [0], [0], [1], [0, 0, 1, 1], [], []>} : vector<160x11xf32>, vector<11x10xf32>, vector<160x10xf32> -> vector<160x10xf32>
    %32 = vector.extract_strided_slice %31 {offsets = [0, 0], sizes = [160, 5], strides = [1, 1]} : vector<160x10xf32> to vector<160x5xf32>
    %33 = vector.extract_strided_slice %31 {offsets = [0, 5], sizes = [160, 5], strides = [1, 1]} : vector<160x10xf32> to vector<160x5xf32>
    %34 = arith.maximumf %32, %33 : vector<160x5xf32>
    %cst_15 = arith.constant 0.000000e+00 : f32
    %35 = vector.broadcast %cst_15 : f32 to vector<160x5xf32>
    %36 = arith.maximumf %34, %35 : vector<160x5xf32>
    %37 = vector.extract_strided_slice %36 {offsets = [0, 0], sizes = [80, 5], strides = [1, 1]} : vector<160x5xf32> to vector<80x5xf32>
    %38 = vector.extract_strided_slice %37 {offsets = [0, 0], sizes = [80, 1], strides = [1, 1]} : vector<80x5xf32> to vector<80x1xf32>
    %39 = vector.extract_strided_slice %37 {offsets = [0, 1], sizes = [80, 1], strides = [1, 1]} : vector<80x5xf32> to vector<80x1xf32>
    %40 = vector.extract_strided_slice %37 {offsets = [0, 2], sizes = [80, 1], strides = [1, 1]} : vector<80x5xf32> to vector<80x1xf32>
    %41 = vector.extract_strided_slice %37 {offsets = [0, 3], sizes = [80, 1], strides = [1, 1]} : vector<80x5xf32> to vector<80x1xf32>
    %42 = vector.extract_strided_slice %37 {offsets = [0, 4], sizes = [80, 1], strides = [1, 1]} : vector<80x5xf32> to vector<80x1xf32>
    %43 = tpu.concatenate %38, %39, %40, %41, %42 in 0 : vector<80x1xf32>, vector<80x1xf32>, vector<80x1xf32>, vector<80x1xf32>, vector<80x1xf32> -> vector<400x1xf32>
    %44 = vector.extract_strided_slice %36 {offsets = [80, 0], sizes = [80, 5], strides = [1, 1]} : vector<160x5xf32> to vector<80x5xf32>
    %45 = vector.extract_strided_slice %44 {offsets = [0, 0], sizes = [80, 1], strides = [1, 1]} : vector<80x5xf32> to vector<80x1xf32>
    %46 = vector.extract_strided_slice %44 {offsets = [0, 1], sizes = [80, 1], strides = [1, 1]} : vector<80x5xf32> to vector<80x1xf32>
    %47 = vector.extract_strided_slice %44 {offsets = [0, 2], sizes = [80, 1], strides = [1, 1]} : vector<80x5xf32> to vector<80x1xf32>
    %48 = vector.extract_strided_slice %44 {offsets = [0, 3], sizes = [80, 1], strides = [1, 1]} : vector<80x5xf32> to vector<80x1xf32>
    %49 = vector.extract_strided_slice %44 {offsets = [0, 4], sizes = [80, 1], strides = [1, 1]} : vector<80x5xf32> to vector<80x1xf32>
    %50 = tpu.concatenate %45, %46, %47, %48, %49 in 0 : vector<80x1xf32>, vector<80x1xf32>, vector<80x1xf32>, vector<80x1xf32>, vector<80x1xf32> -> vector<400x1xf32>
    %51 = tpu.concatenate %43, %50 in 1 : vector<400x1xf32>, vector<400x1xf32> -> vector<400x2xf32>
    %c0_16 = arith.constant 0 : index
    %c0_17 = arith.constant 0 : index
    %52 = vector.load %arg8[%c0_16, %c0_17] : memref<120x3xf32, #tpu.memory_space<vmem>>, vector<120x1xf32>
    %c0_18 = arith.constant 0 : index
    %c1 = arith.constant 1 : index
    %53 = vector.load %arg8[%c0_18, %c1] : memref<120x3xf32, #tpu.memory_space<vmem>>, vector<84x1xf32>
    %c0_19 = arith.constant 0 : index
    %c2 = arith.constant 2 : index
    %54 = vector.load %arg8[%c0_19, %c2] : memref<120x3xf32, #tpu.memory_space<vmem>>, vector<10x1xf32>
    %c0_20 = arith.constant 0 : index
    %c0_21 = arith.constant 0 : index
    %55 = vector.load %arg5[%c0_20, %c0_21] : memref<120x400xbf16, #tpu.memory_space<vmem>>, vector<120x400xbf16>
    %56 = arith.extf %55 : vector<120x400xbf16> to vector<120x400xf32>
    %cst_22 = arith.constant dense<0.000000e+00> : vector<120x2xf32>
    %57 = tpu.matmul %56, %51, %cst_22 {dimension_numbers = #tpu.dot_dimension_numbers<[1], [0], [0], [1], [0, 0, 1, 1], [], []>} : vector<120x400xf32>, vector<400x2xf32>, vector<120x2xf32> -> vector<120x2xf32>
    %58 = vector.broadcast %52 : vector<120x1xf32> to vector<120x2xf32>
    %59 = arith.addf %57, %58 : vector<120x2xf32>
    %cst_23 = arith.constant 0.000000e+00 : f32
    %60 = vector.broadcast %cst_23 : f32 to vector<120x2xf32>
    %61 = arith.maximumf %59, %60 : vector<120x2xf32>
    %c0_24 = arith.constant 0 : index
    %c0_25 = arith.constant 0 : index
    %62 = vector.load %arg6[%c0_24, %c0_25] : memref<84x120xf32, #tpu.memory_space<vmem>>, vector<84x120xf32>
    %cst_26 = arith.constant dense<0.000000e+00> : vector<84x2xf32>
    %63 = tpu.matmul %62, %61, %cst_26 {dimension_numbers = #tpu.dot_dimension_numbers<[1], [0], [0], [1], [0, 0, 1, 1], [], []>} : vector<84x120xf32>, vector<120x2xf32>, vector<84x2xf32> -> vector<84x2xf32>
    %64 = vector.broadcast %53 : vector<84x1xf32> to vector<84x2xf32>
    %65 = arith.addf %63, %64 : vector<84x2xf32>
    %cst_27 = arith.constant 0.000000e+00 : f32
    %66 = vector.broadcast %cst_27 : f32 to vector<84x2xf32>
    %67 = arith.maximumf %65, %66 : vector<84x2xf32>
    %c0_28 = arith.constant 0 : index
    %c0_29 = arith.constant 0 : index
    %68 = vector.load %arg7[%c0_28, %c0_29] : memref<10x84xf32, #tpu.memory_space<vmem>>, vector<10x84xf32>
    %cst_30 = arith.constant dense<0.000000e+00> : vector<10x2xf32>
    %69 = tpu.matmul %68, %67, %cst_30 {dimension_numbers = #tpu.dot_dimension_numbers<[1], [0], [0], [1], [0, 0, 1, 1], [], []>} : vector<10x84xf32>, vector<84x2xf32>, vector<10x2xf32> -> vector<10x2xf32>
    %70 = vector.broadcast %54 : vector<10x1xf32> to vector<10x2xf32>
    %71 = arith.addf %69, %70 : vector<10x2xf32>
    %72 = tpu.transpose %71, [1, 0] : vector<10x2xf32> -> vector<2x10xf32>
    %c0_31 = arith.constant 0 : index
    %c0_32 = arith.constant 0 : index
    %73 = vector.load %arg9[%c0_31, %c0_32] : memref<2x10xf32, #tpu.memory_space<vmem>>, vector<2x10xf32>
    tpu.vector_store %arg9[%c0_31, %c0_32], %72 {strides = array<i32>} : memref<2x10xf32, #tpu.memory_space<vmem>>, vector<2x10xf32>,
    return
  }
}

</mosaic_0001>

<bundles_post_ra>
// kernel: lenet_forward.1
= control target key start
LH: loop header
LB: loop body
LE: loop exit
PB: predicated region body
PF: predicated region fallthrough
CT: control target
= control target key end

     0   :  { %s5171_s15 = smov 127   ;;  %v5172_v7 = vmov 0.0|0.0   ;;  %s6795_s0 = inlined_call_operand.vmem [shape: f32[56,28], index: 0, kind: input, shape index: {}]   ;;  %s6796_s1 = inlined_call_operand.vmem [shape: bf16[312,169], index: 1, kind: input, shape index: {}]   ;;  %s6797_s2 = inlined_call_operand.vmem [shape: bf16[320,469], index: 2, kind: input, shape index: {}]   ;;  %s6798_s3 = inlined_call_operand.vmem [shape: f32[26,26], index: 3, kind: input, shape index: {}]   ;;  %s6799_s4 = inlined_call_operand.vmem [shape: f32[11,10], index: 4, kind: input, shape index: {}]   ;;  %s6800_s5 = inlined_call_operand.vmem [shape: bf16[120,400], index: 5, kind: input, shape index: {}]   ;;  %s6801_s6 = inlined_call_operand.vmem [shape: f32[84,120], index: 6, kind: input, shape index: {}]   ;;  %s6802_s7 = inlined_call_operand.vmem [shape: f32[10,84], index: 7, kind: input, shape index: {}]   ;;  %s6803_s8 = inlined_call_operand.vmem [shape: f32[120,3], index: 8, kind: input, shape index: {}]   ;;  %s6804_s9 = inlined_call_operand.hbm [shape: f32[2,10], index: 9, kind: output, shape index: {}]  }
   0x1   :  { %v33_v0 = vld [vmem:[%s6795_s0] sm:$0xff]  ;;  %v34_v1 = vld [vmem:[%s6795_s0 + $0x8] sm:$0xff]  ;;  %v35_v2 = vld [vmem:[%s6795_s0 + $0x10] sm:$0xff]  ;;  %4273 = vmatprep.subr.bf16.mxu0 %v5172_v7 }
   0x2   :  { %47 = vrot.lane.b32.xlu0 %v33_v0, %s5171_s15  ;;  %v4606_v3 = vpack.i.bf16 %v35_v2, %v34_v1  ;;  %v36_v4 = vld [vmem:[%s6795_s0 + $0x18] sm:$0xff]  ;;  %v37_v5 = vld [vmem:[%s6795_s0 + $0x20] sm:$0xff]  ;;  %v38_v6 = vld [vmem:[%s6795_s0 + $0x28] sm:$0xff]  ;;  %v4274_v8 = vpack.c.bf16 %v34_v1, %v33_v0 }
   0x3   :  { %v4611_v9 = vpack.i.bf16 %v37_v5, %v36_v4  ;;  %v39_v10 = vld [vmem:[%s6795_s0 + $0x30] sm:$0xff] }
   0x4   :  { %14 = vsyncpa [#allocation3], 0  ;;  %4275 = vmatpush1.bf16.msra.mxu0 %v4274_v8  ;;  %v4277_v11 = vpack.c.bf16 %v36_v4, %v35_v2  ;;  %v4616_v12 = vpack.i.bf16 %v39_v10, %v38_v6  ;;  %v4621_v13 = vpack.i.bf16 %v34_v1, %v33_v0  ;;  %v4280_v14 = vpack.c.bf16 %v38_v6, %v37_v5  ;;  %s5173_s24 = smov 126   ;;  %v89_v17 = vld [vmem:[%s6796_s1] sm:$0xff]  ;;  %v90_v48 = vld [vmem:[%s6796_s1 + $0x8] sm:$0xff]  ;;  %s5180_s19 = smov 125  }
   0x5   :  { %4612 = vrot.lane.b32.xlu1 %v4611_v9, %s5171_s15  ;;  %4276 = vmatprep.subr.bf16.mxu0 %v5172_v7  ;;  %v4626_v15 = vpack.i.bf16 %v36_v4, %v35_v2  ;;  %v4631_v16 = vpack.i.bf16 %v38_v6, %v37_v5  ;;  %v129_v18 = vunpack.c.h.bf16 %v89_v17  ;;  %vm206_vm0 = vcmask 334848   ;;  %v91_v51 = vld [vmem:[%s6796_s1 + $0x10] sm:$0xff]  ;;  %v92_v54 = vld [vmem:[%s6796_s1 + $0x18] sm:$0xff]  ;;  %v93_v57 = vld [vmem:[%s6796_s1 + $0x20] sm:$0xff]  ;;  %s5181_s20 = smov 124   ;;  %s5186_s29 = smov [#allocation2]  }
   0x6   :  { %4607 = vrot.lane.b32.xlu0 %v4606_v3, %s5171_s15  ;;  %vm324_vm1 = vcmask 1040384   ;;  %v5174_v46 = vmov 1.0   ;;  %vm5175_vm2 = vmmov 1   ;;  %v128_v49 = vunpack.c.l.bf16 %v89_v17  ;;  %v94_v60 = vld [vmem:[%s6796_s1 + $0x28] sm:$0xff]  ;;  %v95_v63 = vld [vmem:[%s6796_s1 + $0x30] sm:$0xff]  ;;  %v96_v2 = vld [vmem:[%s6796_s1 + $0x38] sm:$0xff] }
   0x7   :  { %3800 = vmatprep.mubr.msk.f32.mxu0 %vm206_vm0, %v129_v18  ;;  %vm4305_vm3 = vmpackc.low %vm324_vm1, %vm5175_vm2  ;;  %v131_v50 = vunpack.c.h.bf16 %v90_v48  ;;  %v130_v52 = vunpack.c.l.bf16 %v90_v48  ;;  %v133_v53 = vunpack.c.h.bf16 %v91_v51  ;;  %v132_v55 = vunpack.c.l.bf16 %v91_v51  ;;  %v97_v5 = vld [vmem:[%s6796_s1 + $0x40] sm:$0xff]  ;;  %v98_v9 = vld [vmem:[%s6796_s1 + $0x48] sm:$0xff]  ;;  %s3791_s30 = sshll.u32 %s5186_s29, 4  ;;  %s3792_s30 = int_to_ptr.vmem [resolvable:$true] %s3791_s30 }
   0x8   :  { %4278 = vmatpush1.bf16.msra.mxu0 %v4277_v11  ;;  %v135_v56 = vunpack.c.h.bf16 %v92_v54  ;;  %v134_v58 = vunpack.c.l.bf16 %v92_v54  ;;  %v137_v59 = vunpack.c.h.bf16 %v93_v57  ;;  %v136_v61 = vunpack.c.l.bf16 %v93_v57  ;;  %v101_v18 = vld [vmem:[%s6796_s1 + $0x60] sm:$0xff]  ;;  %v111_v48 = vld [vmem:[%s6796_s1 + $0xb0] sm:$0xff]  ;;  %v112_v51 = vld [vmem:[%s6796_s1 + $0xb8] sm:$0xff]  ;;  %s5147_s10 = scalar_lea.vmem %s3792_s30, 32  ;;  %p5152_p1 = scmp.lt.s32.totalorder %s3792_s30, %s3792_s30 }
   0x9   :  { %4617 = vrot.lane.b32.xlu1 %v4616_v12, %s5171_s15  ;;  %4279 = vmatprep.subr.bf16.mxu0 %v5172_v7  ;;  %v139_v62 = vunpack.c.h.bf16 %v94_v60  ;;  %v138_v0 = vunpack.c.l.bf16 %v94_v60  ;;  %v141_v1 = vunpack.c.h.bf16 %v95_v63  ;;  %v140_v3 = vunpack.c.l.bf16 %v95_v63  ;;  %v99_v12 = vld [vmem:[%s6796_s1 + $0x50] sm:$0xff]  ;;  %v113_v54 = vld [vmem:[%s6796_s1 + $0xc0] sm:$0xff]  ;;  %v114_v57 = vld [vmem:[%s6796_s1 + $0xc8] sm:$0xff]  ;;  %p5148_p0 = scmp.ne.s32.totalorder %s3792_s30, %s5147_s10  ;;  %p5153_p2 = scmp.lt.s32.totalorder %s5147_s10, %s5147_s10 }
   0xa   :  { %4622 = vrot.lane.b32.xlu0 %v4621_v13, %s5173_s24  ;;  %v143_v4 = vunpack.c.h.bf16 %v96_v2  ;;  %v142_v6 = vunpack.c.l.bf16 %v96_v2  ;;  %v145_v8 = vunpack.c.h.bf16 %v97_v5  ;;  %v147_v11 = vunpack.c.h.bf16 %v98_v9  ;;  %v115_v60 = vld [vmem:[%s6796_s1 + $0xd0] sm:$0xff]  ;;  %v116_v63 = vld [vmem:[%s6796_s1 + $0xd8] sm:$0xff]  ;;  %v117_v2 = vld [vmem:[%s6796_s1 + $0xe0] sm:$0xff] }
   0xb   :  { %v146_v13 = vunpack.c.l.bf16 %v98_v9  ;;  %v119_v9 = vld [vmem:[%s6796_s1 + $0xf0] sm:$0xff]  ;;  %vm753_vm4 = vcmask 1041408   ;;  %vm608_vm6 = vcmask 1043456   ;;  %vm692_vm7 = vcmask 211968   ;;  %p5154_p3 = por %p5153_p2, %p5152_p1 }
   0xc   :  { %4281 = vmatpush1.bf16.msra.mxu0 %v4280_v14  ;;  %v149_v14 = vunpack.c.h.bf16 %v99_v12  ;;  %vm4312_vm5 = vmpackc.low %vm753_vm4, %vm5175_vm2  ;;  %vm1584_vm8 = vcmask 1044480   ;;  %vm1463_vm9 = vcmask 695296   ;;  %vm2201_vm10 = vcmask 1042432  }
   0xd   :  { %4627 = vrot.lane.b32.xlu1 %v4626_v15, %s5173_s24  ;;  %4282 = vmatprep.subr.bf16.mxu0 %v5172_v7  ;;  %v100_v15 = vld [vmem:[%s6796_s1 + $0x58] sm:$0xff]  ;;  %vm4405_vm11 = vmpackc.low %vm2201_vm10, %vm5175_vm2  ;;  %vm2140_vm12 = vcmask 89088   ;;  %vm2860_vm13 = vcmask 7168   ;;  %vm3093_vm14 = vcmask 130048   ;;  %vm5183_vm15 = vmmov 0   ;;  %p5155_p4 = pnand %p5154_p3, %p5148_p0 }
   0xe   :  { %4632 = vrot.lane.b32.xlu0 %v4631_v16, %s5173_s24  ;;  %v148_v16 = vunpack.c.l.bf16 %v99_v12  ;;  %v151_v17 = vunpack.c.h.bf16 %v100_v15  ;;  %v120_v12 = vld [vmem:[%s6796_s1 + $0xf8] sm:$0xff]  ;;  %vm3666_vm1 = vcmask 687104   ;;  %vm3783_vm2 = vcmask 74752  }
  0x11   :  { %80 = vrot.lane.b32.xlu1 %v39_v10, %s5173_s24 }
  0x74   :  { %v48_v19 = vpop.permute.xlu0 %47 }
  0x75   :  { %v4283_v20 = vpack.c.bf16 %v48_v19, %v39_v10  ;;  %v144_v10 = vunpack.c.l.bf16 %v97_v5  ;;  %v150_v19 = vunpack.c.l.bf16 %v100_v15  ;;  %v118_v5 = vld [vmem:[%s6796_s1 + $0xe8] sm:$0xff]  ;;  %v121_v15 = vld [vmem:[%s6796_s1 + $0x100] sm:$0xff] }
  0x77   :  { %4284 = vmatpush1.bf16.msra.mxu0 %v4283_v20  ;;  %v4613_v21 = vpop.permute.xlu1 %4612  ;;  %v153_v20 = vunpack.c.h.bf16 %v101_v18 }
  0x78   :  { %v4608_v22 = vpop.permute.xlu0 %4607  ;;  %4285 = vmatprep.subr.bf16.mxu0 %v5172_v7  ;;  %v4615_v25 = vunpack.i.h.bf16 %v4613_v21  ;;  %v4614_v26 = vunpack.i.l.bf16 %v4613_v21  ;;  %v102_v21 = vld [vmem:[%s6796_s1 + $0x68] sm:$0xff] }
  0x79   :  { %v4610_v23 = vunpack.i.h.bf16 %v4608_v22  ;;  %v4609_v24 = vunpack.i.l.bf16 %v4608_v22  ;;  %v152_v22 = vunpack.c.l.bf16 %v101_v18  ;;  %v122_v18 = vld [vmem:[%s6796_s1 + $0x108] sm:$0xff] }
  0x7a   :  { %v4289_v31 = vpack.c.bf16 %v4615_v25, %v4614_v26  ;;  %v154_v25 = vunpack.c.l.bf16 %v102_v21 }
  0x7b   :  { %v4286_v27 = vpack.c.bf16 %v4610_v23, %v4609_v24  ;;  %v4618_v28 = vpop.permute.xlu1 %4617  ;;  %v155_v23 = vunpack.c.h.bf16 %v102_v21  ;;  %v103_v24 = vld [vmem:[%s6796_s1 + $0x70] sm:$0xff] }
  0x7c   :  { %v4620_v29 = vunpack.i.h.bf16 %v4618_v28  ;;  %v4619_v30 = vunpack.i.l.bf16 %v4618_v28  ;;  %v4623_v32 = vpop.permute.xlu0 %4622  ;;  %v157_v26 = vunpack.c.h.bf16 %v103_v24  ;;  %v156_v28 = vunpack.c.l.bf16 %v103_v24  ;;  %v123_v21 = vld [vmem:[%s6796_s1 + $0x110] sm:$0xff]  ;;  %v124_v24 = vld [vmem:[%s6796_s1 + $0x118] sm:$0xff] }
  0x7d   :  { %4287 = vmatpush1.bf16.msra.mxu0 %v4286_v27  ;;  %v4625_v33 = vunpack.i.h.bf16 %v4623_v32  ;;  %v4624_v34 = vunpack.i.l.bf16 %v4623_v32  ;;  %v104_v27 = vld [vmem:[%s6796_s1 + $0x78] sm:$0xff] }
  0x7e   :  { %4288 = vmatprep.subr.bf16.mxu0 %v5172_v7  ;;  %v4292_v35 = vpack.c.bf16 %v4620_v29, %v4619_v30  ;;  %v159_v29 = vunpack.c.h.bf16 %v104_v27  ;;  %v105_v30 = vld [vmem:[%s6796_s1 + $0x80] sm:$0xff] }
  0x7f   :  { %v4628_v36 = vpop.permute.xlu1 %4627  ;;  %v4295_v39 = vpack.c.bf16 %v4625_v33, %v4624_v34  ;;  %v161_v32 = vunpack.c.h.bf16 %v105_v30  ;;  %v106_v33 = vld [vmem:[%s6796_s1 + $0x88] sm:$0xff]  ;;  %v160_v34 = vunpack.c.l.bf16 %v105_v30 }
  0x80   :  { %v4630_v37 = vunpack.i.h.bf16 %v4628_v36  ;;  %v4629_v38 = vunpack.i.l.bf16 %v4628_v36  ;;  %v4633_v40 = vpop.permute.xlu0 %4632  ;;  %v107_v36 = vld [vmem:[%s6796_s1 + $0x90] sm:$0xff]  ;;  %v126_v30 = vld [vmem:[%s6796_s1 + $0x128] sm:$0xff] }
  0x81   :  { %4290 = vmatpush1.bf16.msra.mxu0 %v4289_v31  ;;  %v4635_v41 = vunpack.i.h.bf16 %v4633_v40  ;;  %v4634_v42 = vunpack.i.l.bf16 %v4633_v40  ;;  %v158_v31 = vunpack.c.l.bf16 %v104_v27  ;;  %v164_v40 = vunpack.c.l.bf16 %v107_v36  ;;  %v125_v27 = vld [vmem:[%s6796_s1 + $0x120] sm:$0xff] }
  0x82   :  { %4291 = vmatprep.subr.bf16.mxu0 %v5172_v7  ;;  %v4298_v43 = vpack.c.bf16 %v4630_v37, %v4629_v38  ;;  %v162_v37 = vunpack.c.l.bf16 %v106_v33  ;;  %v165_v38 = vunpack.c.h.bf16 %v107_v36 }
  0x83   :  { %v4301_v44 = vpack.c.bf16 %v4635_v41, %v4634_v42  ;;  %v81_v45 = vpop.permute.xlu1 %80  ;;  %v109_v42 = vld [vmem:[%s6796_s1 + $0xa0] sm:$0xff] }
  0x84   :  { %v4304_v47 = vpack.c.bf16 %v5174_v46, %v81_v45  ;;  %v110_v45 = vld [vmem:[%s6796_s1 + $0xa8] sm:$0xff]  ;;  %v168_v46 = vunpack.c.l.bf16 %v109_v42 }
  0x85   :  { %4293 = vmatpush1.bf16.msra.mxu0 %v4292_v35  ;;  %v163_v35 = vunpack.c.h.bf16 %v106_v33  ;;  %v127_v33 = vld [vmem:[%s6796_s1 + $0x130] sm:$0xff] }
  0x86   :  { %4294 = vmatprep.subr.bf16.mxu0 %v5172_v7  ;;  %v204_v36 = vunpack.c.l.bf16 %v127_v33 }
  0x89   :  { %4296 = vmatpush1.bf16.msra.mxu0 %v4295_v39  ;;  %v108_v39 = vld [vmem:[%s6796_s1 + $0x98] sm:$0xff] }
  0x8a   :  { %4297 = vmatprep.subr.bf16.mxu0 %v5172_v7  ;;  %v167_v41 = vunpack.c.h.bf16 %v108_v39 }
  0x8d   :  { %4299 = vmatpush1.bf16.msra.mxu0 %v4298_v43  ;;  %v166_v43 = vunpack.c.l.bf16 %v108_v39 }
  0x8e   :  { %4300 = vmatprep.subr.bf16.mxu0 %v5172_v7 }
  0x91   :  { %4302 = vmatpush1.bf16.msra.mxu0 %v4301_v44  ;;  %v169_v44 = vunpack.c.h.bf16 %v109_v42 }
  0x92   :  { %4303 = vmatprep.subr.bf16.mxu0 %v5172_v7 }
  0x95   :  { %4306 = vmatpush1.bf16.msk.msra.mxu0 %vm4305_vm3, %v4304_v47  ;;  %v171_v47 = vunpack.c.h.bf16 %v110_v45 }
  0x98   :  { %393 = vmatmul.mubr.f32.vlgmr.msra.gmra.mrb[0].mxu0 %v128_v49  ;;  %v170_v49 = vunpack.c.l.bf16 %v110_v45 }
  0x99   :  { %3801 = vmatprep.mubr.msk.f32.mxu0 %vm206_vm0, %v131_v50  ;;  %v173_v50 = vunpack.c.h.bf16 %v111_v48 }
  0x9c   :  { %398 = vmatmul.mubr.f32.gmra.mrb[2].mxu0 %v130_v52  ;;  %v172_v52 = vunpack.c.l.bf16 %v111_v48 }
  0x9d   :  { %3802 = vmatprep.mubr.msk.f32.mxu0 %vm206_vm0, %v133_v53  ;;  %v175_v53 = vunpack.c.h.bf16 %v112_v51 }
  0xa0   :  { %403 = vmatmul.mubr.f32.gmra.mrb[4].mxu0 %v132_v55  ;;  %v174_v55 = vunpack.c.l.bf16 %v112_v51 }
  0xa1   :  { %3803 = vmatprep.mubr.msk.f32.mxu0 %vm206_vm0, %v135_v56  ;;  %v177_v56 = vunpack.c.h.bf16 %v113_v54 }
  0xa4   :  { %408 = vmatmul.mubr.f32.gmra.mrb[6].mxu0 %v134_v58  ;;  %v176_v58 = vunpack.c.l.bf16 %v113_v54 }
  0xa5   :  { %3804 = vmatprep.mubr.msk.f32.mxu0 %vm206_vm0, %v137_v59  ;;  %v179_v59 = vunpack.c.h.bf16 %v114_v57 }
  0xa8   :  { %413 = vmatmul.mubr.f32.gmra.mrb[8].mxu0 %v136_v61  ;;  %v178_v61 = vunpack.c.l.bf16 %v114_v57 }
  0xa9   :  { %3805 = vmatprep.mubr.msk.f32.mxu0 %vm206_vm0, %v139_v62  ;;  %v181_v62 = vunpack.c.h.bf16 %v115_v60 }
  0xac   :  { %418 = vmatmul.mubr.f32.gmra.mrb[10].mxu0 %v138_v0  ;;  %v180_v0 = vunpack.c.l.bf16 %v115_v60 }
  0xad   :  { %3806 = vmatprep.mubr.msk.f32.mxu0 %vm206_vm0, %v141_v1  ;;  %v183_v1 = vunpack.c.h.bf16 %v116_v63 }
  0xb0   :  { %423 = vmatmul.mubr.f32.gmra.mrb[12].mxu0 %v140_v3  ;;  %v182_v3 = vunpack.c.l.bf16 %v116_v63 }
  0xb1   :  { %3807 = vmatprep.mubr.msk.f32.mxu0 %vm206_vm0, %v143_v4  ;;  %v185_v4 = vunpack.c.h.bf16 %v117_v2 }
  0xb4   :  { %428 = vmatmul.mubr.f32.gmra.mrb[14].mxu0 %v142_v6  ;;  %v184_v6 = vunpack.c.l.bf16 %v117_v2 }
  0xb5   :  { %3808 = vmatprep.mubr.msk.f32.mxu0 %vm206_vm0, %v145_v8  ;;  %v187_v8 = vunpack.c.h.bf16 %v118_v5 }
  0xb8   :  { %433 = vmatmul.mubr.f32.gmra.mrb[16].mxu0 %v144_v10  ;;  %v186_v10 = vunpack.c.l.bf16 %v118_v5 }
  0xb9   :  { %3809 = vmatprep.mubr.msk.f32.mxu0 %vm206_vm0, %v147_v11  ;;  %v189_v11 = vunpack.c.h.bf16 %v119_v9 }
  0xbc   :  { %438 = vmatmul.mubr.f32.gmra.mrb[18].mxu0 %v146_v13  ;;  %v188_v13 = vunpack.c.l.bf16 %v119_v9 }
  0xbd   :  { %3810 = vmatprep.mubr.msk.f32.mxu0 %vm206_vm0, %v149_v14  ;;  %v191_v14 = vunpack.c.h.bf16 %v120_v12 }
  0xc0   :  { %443 = vmatmul.mubr.f32.gmra.mrb[20].mxu0 %v148_v16  ;;  %v190_v16 = vunpack.c.l.bf16 %v120_v12 }
  0xc1   :  { %3811 = vmatprep.mubr.msk.f32.mxu0 %vm206_vm0, %v151_v17  ;;  %v193_v17 = vunpack.c.h.bf16 %v121_v15 }
  0xc4   :  { %448 = vmatmul.mubr.f32.gmra.mrb[22].mxu0 %v150_v19  ;;  %v192_v19 = vunpack.c.l.bf16 %v121_v15 }
  0xc5   :  { %3812 = vmatprep.mubr.msk.f32.mxu0 %vm206_vm0, %v153_v20  ;;  %v195_v20 = vunpack.c.h.bf16 %v122_v18 }
  0xc8   :  { %453 = vmatmul.mubr.f32.gmra.mrb[24].mxu0 %v152_v22  ;;  %v194_v22 = vunpack.c.l.bf16 %v122_v18 }
  0xc9   :  { %3813 = vmatprep.mubr.msk.f32.mxu0 %vm206_vm0, %v155_v23  ;;  %v197_v23 = vunpack.c.h.bf16 %v123_v21 }
  0xcc   :  { %458 = vmatmul.mubr.f32.gmra.mrb[26].mxu0 %v154_v25  ;;  %v196_v25 = vunpack.c.l.bf16 %v123_v21 }
  0xcd   :  { %3814 = vmatprep.mubr.msk.f32.mxu0 %vm206_vm0, %v157_v26  ;;  %v199_v26 = vunpack.c.h.bf16 %v124_v24 }
  0xd0   :  { %463 = vmatmul.mubr.f32.gmra.mrb[28].mxu0 %v156_v28  ;;  %v198_v28 = vunpack.c.l.bf16 %v124_v24 }
  0xd1   :  { %3815 = vmatprep.mubr.msk.f32.mxu0 %vm206_vm0, %v159_v29  ;;  %v201_v29 = vunpack.c.h.bf16 %v125_v27 }
  0xd4   :  { %468 = vmatmul.mubr.f32.gmra.mrb[30].mxu0 %v158_v31  ;;  %v200_v31 = vunpack.c.l.bf16 %v125_v27 }
  0xd5   :  { %3816 = vmatprep.mubr.msk.f32.mxu0 %vm206_vm0, %v161_v32  ;;  %v203_v32 = vunpack.c.h.bf16 %v126_v30 }
  0xd8   :  { %473 = vmatmul.mubr.f32.gmra.mrb[32].mxu0 %v160_v34  ;;  %v202_v34 = vunpack.c.l.bf16 %v126_v30 }
  0xd9   :  { %3817 = vmatprep.mubr.msk.f32.mxu0 %vm206_vm0, %v163_v35  ;;  %v205_v35 = vunpack.c.h.bf16 %v127_v33 }
  0xdc   :  { %478 = vmatmul.mubr.f32.gmra.mrb[34].mxu0 %v162_v37  ;;  %v688_v37 = vld [vmem:[%s6798_s3] sm:$0xff] }
  0xdd   :  { %3818 = vmatprep.mubr.msk.f32.mxu0 %vm206_vm0, %v165_v38  ;;  %v689_v38 = vld [vmem:[%s6798_s3 + $0x8] sm:$0xff] }
  0xde   :  { %v4307_v39 = vpack.c.bf16 %v689_v38, %v688_v37 }
  0xe0   :  { %483 = vmatmul.mubr.f32.gmra.mrb[36].mxu0 %v164_v40  ;;  %4308 = vmatprep.subr.bf16.mxu1 %v4307_v39  ;;  %v690_v40 = vld [vmem:[%s6798_s3 + $0x10] sm:$0xff] }
  0xe1   :  { %3819 = vmatprep.mubr.msk.f32.mxu0 %vm206_vm0, %v167_v41  ;;  %4310 = vmatpush3.bf16.msra.mxu1 %v4307_v39  ;;  %v691_v41 = vld [vmem:[%s6798_s3 + $0x18] sm:$0x3]  ;;  %s5176_s3 = smov 115  }
  0xe2   :  { %v4311_v42 = vpack.c.bf16 %v691_v41, %v690_v40 }
  0xe4   :  { %488 = vmatmul.mubr.f32.gmra.mrb[38].mxu0 %v166_v43  ;;  %4313 = vmatprep.subr.msk.bf16.mxu1 %vm4312_vm5, %v4311_v42 }
  0xe5   :  { %3820 = vmatprep.mubr.msk.f32.mxu0 %vm206_vm0, %v169_v44  ;;  %4316 = vmatpush3.bf16.msk.msra.mxu1 %vm4312_vm5, %v4311_v42 }
  0xe6   :  { %4317 = vmatprep.subr.bf16.mxu1 %v5172_v7 }
  0xe8   :  { %493 = vmatmul.mubr.f32.gmra.mrb[40].mxu0 %v168_v46 }
  0xe9   :  { %3821 = vmatprep.mubr.msk.f32.mxu0 %vm206_vm0, %v171_v47 }
  0xec   :  { %498 = vmatmul.mubr.f32.gmra.mrb[42].mxu0 %v170_v49 }
  0xed   :  { %3822 = vmatprep.mubr.msk.f32.mxu0 %vm206_vm0, %v173_v50 }
  0xf0   :  { %503 = vmatmul.mubr.f32.gmra.mrb[44].mxu0 %v172_v52 }
  0xf1   :  { %3823 = vmatprep.mubr.msk.f32.mxu0 %vm206_vm0, %v175_v53 }
  0xf4   :  { %508 = vmatmul.mubr.f32.gmra.mrb[46].mxu0 %v174_v55 }
  0xf5   :  { %3824 = vmatprep.mubr.msk.f32.mxu0 %vm206_vm0, %v177_v56 }
  0xf8   :  { %513 = vmatmul.mubr.f32.gmra.mrb[48].mxu0 %v176_v58 }
  0xf9   :  { %3825 = vmatprep.mubr.msk.f32.mxu0 %vm206_vm0, %v179_v59 }
  0xfc   :  { %518 = vmatmul.mubr.f32.gmra.mrb[50].mxu0 %v178_v61 }
  0xfd   :  { %3826 = vmatprep.mubr.msk.f32.mxu0 %vm206_vm0, %v181_v62 }
 0x100   :  { %523 = vmatmul.mubr.f32.gmra.mrb[52].mxu0 %v180_v0 }
 0x101   :  { %3827 = vmatprep.mubr.msk.f32.mxu0 %vm206_vm0, %v183_v1 }
 0x104   :  { %528 = vmatmul.mubr.f32.gmra.mrb[54].mxu0 %v182_v3 }
 0x105   :  { %3828 = vmatprep.mubr.msk.f32.mxu0 %vm206_vm0, %v185_v4 }
 0x108   :  { %533 = vmatmul.mubr.f32.gmra.mrb[56].mxu0 %v184_v6 }
 0x109   :  { %3829 = vmatprep.mubr.msk.f32.mxu0 %vm206_vm0, %v187_v8 }
 0x10c   :  { %538 = vmatmul.mubr.f32.gmra.mrb[58].mxu0 %v186_v10 }
 0x10d   :  { %3830 = vmatprep.mubr.msk.f32.mxu0 %vm206_vm0, %v189_v11 }
 0x110   :  { %543 = vmatmul.mubr.f32.gmra.mrb[60].mxu0 %v188_v13 }
 0x111   :  { %3831 = vmatprep.mubr.msk.f32.mxu0 %vm206_vm0, %v191_v14 }
 0x114   :  { %548 = vmatmul.mubr.f32.gmra.mrb[62].mxu0 %v190_v16 }
 0x115   :  { %3832 = vmatprep.mubr.msk.f32.mxu0 %vm206_vm0, %v193_v17 }
 0x118   :  { %553 = vmatmul.mubr.f32.gmra.mrb[64].mxu0 %v192_v19 }
 0x119   :  { %3833 = vmatprep.mubr.msk.f32.mxu0 %vm206_vm0, %v195_v20 }
 0x11c   :  { %558 = vmatmul.mubr.f32.gmra.mrb[66].mxu0 %v194_v22 }
 0x11d   :  { %3834 = vmatprep.mubr.msk.f32.mxu0 %vm206_vm0, %v197_v23 }
 0x120   :  { %563 = vmatmul.mubr.f32.gmra.mrb[68].mxu0 %v196_v25 }
 0x121   :  { %3835 = vmatprep.mubr.msk.f32.mxu0 %vm206_vm0, %v199_v26 }
 0x124   :  { %568 = vmatmul.mubr.f32.gmra.mrb[70].mxu0 %v198_v28 }
 0x125   :  { %3836 = vmatprep.mubr.msk.f32.mxu0 %vm206_vm0, %v201_v29 }
 0x128   :  { %573 = vmatmul.mubr.f32.gmra.mrb[72].mxu0 %v200_v31 }
 0x129   :  { %3837 = vmatprep.mubr.msk.f32.mxu0 %vm206_vm0, %v203_v32 }
 0x12c   :  { %578 = vmatmul.mubr.f32.gmra.mrb[74].mxu0 %v202_v34 }
 0x12d   :  { %3838 = vmatprep.mubr.msk.f32.mxu0 %vm206_vm0, %v205_v35  ;;  %vm3490_vm0 = vcmask 982016  }
 0x130   :  { %583 = vmatmul.mubr.f32.gmra.mrb[76].mxu0 %v204_v36 }
 0x16b   :  { %v394_v43 = vpop.f32.mrb[0].mxu0 }
 0x16c   :  { %v396_v44 = vpop.f32.mrb[1].mxu0 }
 0x16f   :  { %v399_v45 = vpop.f32.mrb[2].mxu0 }
 0x170   :  { %v401_v46 = vpop.f32.mrb[3].mxu0 }
 0x173   :  { %v404_v47 = vpop.f32.mrb[4].mxu0 }
 0x174   :  { %v406_v48 = vpop.f32.mrb[5].mxu0 }
 0x177   :  { %v5448_v49 = vpop.f32.mrb[6].mxu0 }
 0x178   :  { %v411_v50 = vpop.f32.mrb[7].mxu0 }
 0x17b   :  { %v5450_v51 = vpop.f32.mrb[8].mxu0 }
 0x17c   :  { %v416_v52 = vpop.f32.mrb[9].mxu0 }
 0x17f   :  { %v5452_v53 = vpop.f32.mrb[10].mxu0 }
 0x180   :  { %v421_v54 = vpop.f32.mrb[11].mxu0 }
 0x183   :  { %v5454_v55 = vpop.f32.mrb[12].mxu0 }
 0x184   :  { %v426_v56 = vpop.f32.mrb[13].mxu0 }
 0x187   :  { %v5456_v57 = vpop.f32.mrb[14].mxu0 }
 0x188   :  { %v431_v58 = vpop.f32.mrb[15].mxu0 }
 0x18b   :  { %v5458_v59 = vpop.f32.mrb[16].mxu0 }
 0x18c   :  { %v436_v60 = vpop.f32.mrb[17].mxu0 }
 0x18f   :  { %v5460_v61 = vpop.f32.mrb[18].mxu0 }
 0x190   :  { %v441_v62 = vpop.f32.mrb[19].mxu0 }
 0x193   :  { %v5462_v63 = vpop.f32.mrb[20].mxu0 }
 0x194   :  { %v446_v0 = vpop.f32.mrb[21].mxu0 }
 0x197   :  { %v5464_v1 = vpop.f32.mrb[22].mxu0 }
 0x198   :  { %v451_v2 = vpop.f32.mrb[23].mxu0 }
 0x19b   :  { %v5466_v3 = vpop.f32.mrb[24].mxu0 }
 0x19c   :  { %v456_v4 = vpop.f32.mrb[25].mxu0 }
 0x19f   :  { %v5468_v5 = vpop.f32.mrb[26].mxu0 }
 0x1a0   :  { %v461_v6 = vpop.f32.mrb[27].mxu0 }
 0x1a3   :  { %v5470_v8 = vpop.f32.mrb[28].mxu0 }
 0x1a4   :  { %v466_v9 = vpop.f32.mrb[29].mxu0 }
 0x1a7   :  { %v5472_v10 = vpop.f32.mrb[30].mxu0 }
 0x1a8   :  { %v471_v11 = vpop.f32.mrb[31].mxu0 }
 0x1ab   :  { %v5474_v12 = vpop.f32.mrb[32].mxu0 }
 0x1ac   :  { %v476_v13 = vpop.f32.mrb[33].mxu0 }
 0x1af   :  { %v5476_v14 = vpop.f32.mrb[34].mxu0 }
 0x1b0   :  { %v481_v15 = vpop.f32.mrb[35].mxu0 }
 0x1b3   :  { %v5478_v16 = vpop.f32.mrb[36].mxu0 }
 0x1b4   :  { %v486_v17 = vpop.f32.mrb[37].mxu0 }
 0x1b7   :  { %v5480_v18 = vpop.f32.mrb[38].mxu0 }
 0x1b8   :  { %v491_v19 = vpop.f32.mrb[39].mxu0  ;;  %v609_v21 = vrot.slane %v5480_v18, 4 }
 0x1bb   :  { %v494_v20 = vpop.f32.mrb[40].mxu0 }
 0x1bc   :  { %v610_v22 = vrot.slane %v494_v20, 4  ;;  %v496_v23 = vpop.f32.mrb[41].mxu0 }
 0x1be   :  { %v611_v24 = vsel %vm608_vm6, %v609_v21, %v610_v22 }
 0x1bf   :  { %v499_v25 = vpop.f32.mrb[42].mxu0  ;;  %v668_v26 = vmax.f32 %v394_v43, %v611_v24 }
 0x1c0   :  { %v612_v27 = vrot.slane %v499_v25, 4  ;;  %v501_v28 = vpop.f32.mrb[43].mxu0 }
 0x1c1   :  { %4121 = vmatprep.mubr.msk.f32.mxu1 %vm692_vm7, %v668_v26 }
 0x1c2   :  { %v613_v29 = vsel %vm608_vm6, %v610_v22, %v612_v27 }
 0x1c3   :  { %v669_v30 = vmax.f32 %v399_v45, %v613_v29  ;;  %v504_v31 = vpop.f32.mrb[44].mxu0 }
 0x1c4   :  { %v614_v32 = vrot.slane %v504_v31, 4  ;;  %v506_v33 = vpop.f32.mrb[45].mxu0 }
 0x1c5   :  { %4122 = vmatmul.mubr.msk.f32.vlgmr.msra.gmra.mrb[0].mxu1 %vm692_vm7, %v669_v30 }
 0x1c6   :  { %v615_v34 = vsel %vm608_vm6, %v612_v27, %v614_v32 }
 0x1c7   :  { %v670_v35 = vmax.f32 %v404_v47, %v615_v34  ;;  %v509_v36 = vpop.f32.mrb[46].mxu0 }
 0x1c8   :  { %v616_v37 = vrot.slane %v509_v36, 4  ;;  %v511_v38 = vpop.f32.mrb[47].mxu0 }
 0x1c9   :  { %4124 = vmatprep.mubr.msk.f32.mxu1 %vm692_vm7, %v670_v35 }
 0x1ca   :  { %v617_v39 = vsel %vm608_vm6, %v614_v32, %v616_v37 }
 0x1cb   :  { %v671_v40 = vmax.f32 %v5448_v49, %v617_v39  ;;  %v514_v41 = vpop.f32.mrb[48].mxu0 }
 0x1cc   :  { %v618_v42 = vrot.slane %v514_v41, 4  ;;  %v516_v43 = vpop.f32.mrb[49].mxu0 }
 0x1cd   :  { %4125 = vmatmul.mubr.msk.f32.gmra.mrb[2].mxu1 %vm692_vm7, %v671_v40 }
 0x1ce   :  { %v619_v44 = vsel %vm608_vm6, %v616_v37, %v618_v42 }
 0x1cf   :  { %v672_v45 = vmax.f32 %v5450_v51, %v619_v44  ;;  %v519_v46 = vpop.f32.mrb[50].mxu0 }
 0x1d0   :  { %v620_v47 = vrot.slane %v519_v46, 4  ;;  %v521_v48 = vpop.f32.mrb[51].mxu0 }
 0x1d1   :  { %4127 = vmatprep.mubr.msk.f32.mxu1 %vm692_vm7, %v672_v45 }
 0x1d2   :  { %v621_v50 = vsel %vm608_vm6, %v618_v42, %v620_v47 }
 0x1d3   :  { %v673_v52 = vmax.f32 %v5452_v53, %v621_v50  ;;  %v524_v54 = vpop.f32.mrb[52].mxu0 }
 0x1d4   :  { %v622_v49 = vrot.slane %v524_v54, 4  ;;  %v526_v56 = vpop.f32.mrb[53].mxu0 }
 0x1d5   :  { %4128 = vmatmul.mubr.msk.f32.gmra.mrb[4].mxu1 %vm692_vm7, %v673_v52 }
 0x1d6   :  { %v623_v58 = vsel %vm608_vm6, %v620_v47, %v622_v49 }
 0x1d7   :  { %v674_v60 = vmax.f32 %v5454_v55, %v623_v58  ;;  %v529_v62 = vpop.f32.mrb[54].mxu0 }
 0x1d8   :  { %v624_v51 = vrot.slane %v529_v62, 4  ;;  %v531_v0 = vpop.f32.mrb[55].mxu0 }
 0x1d9   :  { %4130 = vmatprep.mubr.msk.f32.mxu1 %vm692_vm7, %v674_v60 }
 0x1da   :  { %v625_v2 = vsel %vm608_vm6, %v622_v49, %v624_v51 }
 0x1db   :  { %v675_v4 = vmax.f32 %v5456_v57, %v625_v2  ;;  %v534_v6 = vpop.f32.mrb[56].mxu0 }
 0x1dc   :  { %v626_v53 = vrot.slane %v534_v6, 4  ;;  %v536_v9 = vpop.f32.mrb[57].mxu0 }
 0x1dd   :  { %4131 = vmatmul.mubr.msk.f32.gmra.mrb[6].mxu1 %vm692_vm7, %v675_v4 }
 0x1de   :  { %v627_v11 = vsel %vm608_vm6, %v624_v51, %v626_v53 }
 0x1df   :  { %v676_v13 = vmax.f32 %v5458_v59, %v627_v11  ;;  %v539_v15 = vpop.f32.mrb[58].mxu0 }
 0x1e0   :  { %v628_v55 = vrot.slane %v539_v15, 4  ;;  %v541_v17 = vpop.f32.mrb[59].mxu0 }
 0x1e1   :  { %4133 = vmatprep.mubr.msk.f32.mxu1 %vm692_vm7, %v676_v13 }
 0x1e2   :  { %v629_v19 = vsel %vm608_vm6, %v626_v53, %v628_v55 }
 0x1e3   :  { %v677_v20 = vmax.f32 %v5460_v61, %v629_v19  ;;  %v544_v21 = vpop.f32.mrb[60].mxu0 }
 0x1e4   :  { %v630_v57 = vrot.slane %v544_v21, 4  ;;  %v546_v22 = vpop.f32.mrb[61].mxu0 }
 0x1e5   :  { %4134 = vmatmul.mubr.msk.f32.gmra.mrb[8].mxu1 %vm692_vm7, %v677_v20 }
 0x1e6   :  { %v631_v23 = vsel %vm608_vm6, %v628_v55, %v630_v57 }
 0x1e7   :  { %v678_v24 = vmax.f32 %v5462_v63, %v631_v23  ;;  %v549_v25 = vpop.f32.mrb[62].mxu0 }
 0x1e8   :  { %v632_v59 = vrot.slane %v549_v25, 4  ;;  %v551_v26 = vpop.f32.mrb[63].mxu0 }
 0x1e9   :  { %4136 = vmatprep.mubr.msk.f32.mxu1 %vm692_vm7, %v678_v24 }
 0x1ea   :  { %v633_v27 = vsel %vm608_vm6, %v630_v57, %v632_v59 }
 0x1eb   :  { %v679_v28 = vmax.f32 %v5464_v1, %v633_v27  ;;  %v554_v29 = vpop.f32.mrb[64].mxu0 }
 0x1ec   :  { %v634_v61 = vrot.slane %v554_v29, 4  ;;  %v556_v30 = vpop.f32.mrb[65].mxu0 }
 0x1ed   :  { %4137 = vmatmul.mubr.msk.f32.gmra.mrb[10].mxu1 %vm692_vm7, %v679_v28 }
 0x1ee   :  { %v635_v31 = vsel %vm608_vm6, %v632_v59, %v634_v61 }
 0x1ef   :  { %v680_v32 = vmax.f32 %v5466_v3, %v635_v31  ;;  %v559_v33 = vpop.f32.mrb[66].mxu0 }
 0x1f0   :  { %v636_v63 = vrot.slane %v559_v33, 4  ;;  %v561_v34 = vpop.f32.mrb[67].mxu0 }
 0x1f1   :  { %4139 = vmatprep.mubr.msk.f32.mxu1 %vm692_vm7, %v680_v32 }
 0x1f2   :  { %v637_v35 = vsel %vm608_vm6, %v634_v61, %v636_v63 }
 0x1f3   :  { %v681_v36 = vmax.f32 %v5468_v5, %v637_v35  ;;  %v564_v37 = vpop.f32.mrb[68].mxu0 }
 0x1f4   :  { %v638_v1 = vrot.slane %v564_v37, 4  ;;  %v566_v38 = vpop.f32.mrb[69].mxu0 }
 0x1f5   :  { %4140 = vmatmul.mubr.msk.f32.gmra.mrb[12].mxu1 %vm692_vm7, %v681_v36 }
 0x1f6   :  { %v639_v39 = vsel %vm608_vm6, %v636_v63, %v638_v1 }
 0x1f7   :  { %v682_v40 = vmax.f32 %v5470_v8, %v639_v39  ;;  %v569_v41 = vpop.f32.mrb[70].mxu0 }
 0x1f8   :  { %v640_v3 = vrot.slane %v569_v41, 4  ;;  %v571_v42 = vpop.f32.mrb[71].mxu0 }
 0x1f9   :  { %4142 = vmatprep.mubr.msk.f32.mxu1 %vm692_vm7, %v682_v40 }
 0x1fa   :  { %v641_v43 = vsel %vm608_vm6, %v638_v1, %v640_v3 }
 0x1fb   :  { %v683_v44 = vmax.f32 %v5472_v10, %v641_v43  ;;  %v574_v45 = vpop.f32.mrb[72].mxu0 }
 0x1fc   :  { %v642_v5 = vrot.slane %v574_v45, 4  ;;  %v576_v46 = vpop.f32.mrb[73].mxu0 }
 0x1fd   :  { %4143 = vmatmul.mubr.msk.f32.gmra.mrb[14].mxu1 %vm692_vm7, %v683_v44 }
 0x1fe   :  { %v643_v47 = vsel %vm608_vm6, %v640_v3, %v642_v5 }
 0x1ff   :  { %v684_v48 = vmax.f32 %v5474_v12, %v643_v47  ;;  %v579_v50 = vpop.f32.mrb[74].mxu0 }
 0x200   :  { %v644_v8 = vrot.slane %v579_v50, 4  ;;  %v581_v52 = vpop.f32.mrb[75].mxu0 }
 0x201   :  { %4145 = vmatprep.mubr.msk.f32.mxu1 %vm692_vm7, %v684_v48 }
 0x202   :  { %v645_v54 = vsel %vm608_vm6, %v642_v5, %v644_v8 }
 0x203   :  { %v685_v49 = vmax.f32 %v5476_v14, %v645_v54  ;;  %v584_v56 = vpop.f32.mrb[76].mxu0 }
 0x204   :  { %v646_v10 = vrot.slane %v584_v56, 4  ;;  %v586_v58 = vpop.f32.mrb[77].mxu0 }
 0x205   :  { %4146 = vmatmul.mubr.msk.f32.gmra.mrb[16].mxu1 %vm692_vm7, %v685_v49 }
 0x206   :  { %v647_v60 = vsel %vm608_vm6, %v644_v8, %v646_v10  ;;  %v687_v62 = vmax.f32 %v5480_v18, %v646_v10 }
 0x207   :  { %v686_v12 = vmax.f32 %v5478_v16, %v647_v60 }
 0x209   :  { %4148 = vmatprep.mubr.msk.f32.mxu1 %vm692_vm7, %v686_v12 }
 0x20a   :  { %4149 = vmatmul.mubr.msk.f32.gmra.mrb[18].mxu1 %vm692_vm7, %v687_v62 }
 0x298   :  { %v4123_v51 = vpop.f32.mrb[0].mxu1 }
 0x299   :  { %v823_v0 = vpop.f32.mrb[1].mxu1 }
 0x29a   :  { %942 = vrot.lane.b32.xlu0 %v823_v0, %s5176_s3 }
 0x2a0   :  { %v4126_v14 = vpop.f32.mrb[2].mxu1 }
 0x2a1   :  { %v833_v2 = vpop.f32.mrb[3].mxu1 }
 0x2a2   :  { %v4636_v4 = vpack.i.bf16 %v833_v2, %v4123_v51 }
 0x2a4   :  { %4637 = vrot.lane.b32.xlu1 %v4636_v4, %s5176_s3 }
 0x2a8   :  { %v5541_v6 = vpop.f32.mrb[4].mxu1 }
 0x2a9   :  { %v843_v53 = vpop.f32.mrb[5].mxu1 }
 0x2aa   :  { %v4641_v18 = vpack.i.bf16 %v843_v53, %v4126_v14 }
 0x2ac   :  { %4642 = vrot.lane.b32.xlu0 %v4641_v18, %s5176_s3 }
 0x2b0   :  { %v5544_v16 = vpop.f32.mrb[6].mxu1 }
 0x2b1   :  { %v5546_v9 = vpop.f32.mrb[7].mxu1 }
 0x2b2   :  { %v4646_v11 = vpack.i.bf16 %v5546_v9, %v5541_v6 }
 0x2b4   :  { %4647 = vrot.lane.b32.xlu1 %v4646_v11, %s5176_s3 }
 0x2b8   :  { %v5551_v13 = vpop.f32.mrb[8].mxu1 }
 0x2b9   :  { %v5553_v15 = vpop.f32.mrb[9].mxu1 }
 0x2ba   :  { %v4651_v55 = vpack.i.bf16 %v5553_v15, %v5544_v16 }
 0x2bc   :  { %4652 = vrot.lane.b32.xlu0 %v4651_v55, %s5176_s3 }
 0x2c0   :  { %v5558_v17 = vpop.f32.mrb[10].mxu1 }
 0x2c1   :  { %v5560_v19 = vpop.f32.mrb[11].mxu1 }
 0x2c2   :  { %v4656_v20 = vpack.i.bf16 %v5560_v19, %v5551_v13 }
 0x2c4   :  { %4657 = vrot.lane.b32.xlu1 %v4656_v20, %s5176_s3 }
 0x2c8   :  { %v5565_v21 = vpop.f32.mrb[12].mxu1 }
 0x2c9   :  { %968 = vrot.lane.b32.xlu1 %v5565_v21, %s5176_s3  ;;  %v5569_v57 = vpop.f32.mrb[13].mxu1 }
 0x2ca   :  { %v4661_v22 = vpack.i.bf16 %v5569_v57, %v5558_v17 }
 0x2cc   :  { %4662 = vrot.lane.b32.xlu0 %v4661_v22, %s5176_s3 }
 0x2d0   :  { %v5574_v23 = vpop.f32.mrb[14].mxu1 }
 0x2d1   :  { %v5576_v24 = vpop.f32.mrb[15].mxu1 }
 0x2d2   :  { %v4666_v25 = vpack.i.bf16 %v5574_v23, %v5576_v24 }
 0x2d4   :  { %4667 = vrot.lane.b32.xlu0 %v4666_v25, %s5176_s3 }
 0x2d8   :  { %v5581_v59 = vpop.f32.mrb[16].mxu1 }
 0x2d9   :  { %v5583_v26 = vpop.f32.mrb[17].mxu1 }
 0x2da   :  { %v4671_v27 = vpack.i.bf16 %v5581_v59, %v5583_v26 }
 0x2dc   :  { %4672 = vrot.lane.b32.xlu1 %v4671_v27, %s5176_s3 }
 0x2dd   :  { %v5588_v28 = vpop.f32.mrb[18].mxu1 }
 0x2de   :  { %980 = vrot.lane.b32.xlu0 %v5588_v28, %s5176_s3  ;;  %v5592_v29 = vpop.f32.mrb[19].mxu1 }
 0x2e0   :  { %978 = vrot.lane.b32.xlu1 %v5592_v29, %s5176_s3 }
 0x30c   :  { %v943_v61 = vpop.permute.xlu0 %942 }
 0x30d   :  { %v1002_v30 = vmax.f32 %v823_v0, %v943_v61 }
 0x30f   :  { %v5596_v31 = vmax.f32 %v1002_v30, 0.0 }
 0x311   :  { %v1062_v32 = vrot.slane %v5596_v31, 4 }
 0x313   :  { %1101 = vrot.lane.b32.xlu0 %v1062_v32, %s5171_s15 }
 0x316   :  { %v4638_v33 = vpop.permute.xlu1 %4637 }
 0x317   :  { %v4640_v63 = vunpack.i.h.bf16 %v4638_v33  ;;  %v4639_v34 = vunpack.i.l.bf16 %v4638_v33 }
 0x319   :  { %v1004_v35 = vmax.f32 %v833_v2, %v4640_v63  ;;  %v1003_v36 = vmax.f32 %v4123_v51, %v4639_v34 }
 0x31b   :  { %v5600_v37 = vmax.f32 %v1004_v35, 0.0  ;;  %v5602_v1 = vmax.f32 %v1003_v36, 0.0 }
 0x31d   :  { %v4318_v38 = vpack.c.bf16 %v5602_v1, %v5596_v31  ;;  %v1063_v39 = vrot.slane %v5602_v1, 4  ;;  %v1065_v40 = vrot.slane %v5600_v37, 4  ;;  %v4721_v41 = vpack.i.bf16 %v5600_v37, %v5602_v1 }
 0x31e   :  { %v4643_v3 = vpop.permute.xlu0 %4642 }
 0x31f   :  { %v4645_v42 = vunpack.i.h.bf16 %v4643_v3  ;;  %v4644_v43 = vunpack.i.l.bf16 %v4643_v3  ;;  %4319 = vmatpush1.bf16.msra.mxu1 %v4318_v38  ;;  %v1064_v44 = vsel %vm608_vm6, %v1062_v32, %v1063_v39  ;;  %v1066_v45 = vsel %vm608_vm6, %v1063_v39, %v1065_v40 }
 0x320   :  { %v4676_v5 = vpack.i.bf16 %v1066_v45, %v1064_v44  ;;  %4320 = vmatprep.subr.bf16.mxu1 %v5172_v7 }
 0x321   :  { %v1006_v46 = vmax.f32 %v843_v53, %v4645_v42  ;;  %v1005_v47 = vmax.f32 %v4126_v14, %v4644_v43 }
 0x322   :  { %4677 = vrot.lane.b32.xlu1 %v4676_v5, %s5171_s15 }
 0x323   :  { %v5614_v48 = vmax.f32 %v1006_v46, 0.0  ;;  %v5616_v50 = vmax.f32 %v1005_v47, 0.0 }
 0x325   :  { %v4321_v8 = vpack.c.bf16 %v5616_v50, %v5600_v37  ;;  %v1067_v52 = vrot.slane %v5616_v50, 4  ;;  %v1069_v54 = vrot.slane %v5614_v48, 4  ;;  %v4726_v49 = vpack.i.bf16 %v5614_v48, %v5616_v50 }
 0x326   :  { %v4648_v56 = vpop.permute.xlu1 %4647 }
 0x327   :  { %v4650_v10 = vunpack.i.h.bf16 %v4648_v56  ;;  %v4649_v58 = vunpack.i.l.bf16 %v4648_v56  ;;  %4322 = vmatpush1.bf16.msra.mxu1 %v4321_v8  ;;  %v1068_v60 = vsel %vm608_vm6, %v1065_v40, %v1067_v52  ;;  %v1070_v62 = vsel %vm608_vm6, %v1067_v52, %v1069_v54 }
 0x328   :  { %v4681_v12 = vpack.i.bf16 %v1070_v62, %v1068_v60  ;;  %4323 = vmatprep.subr.bf16.mxu1 %v5172_v7 }
 0x329   :  { %v1008_v51 = vmax.f32 %v5546_v9, %v4650_v10  ;;  %v1007_v0 = vmax.f32 %v5541_v6, %v4649_v58 }
 0x32a   :  { %4682 = vrot.lane.b32.xlu0 %v4681_v12, %s5171_s15  ;;  %v5681_v12 = vld [vmem:[%s6797_s2] sm:$0xff] }
 0x32b   :  { %v5630_v14 = vmax.f32 %v1008_v51, 0.0  ;;  %v5632_v2 = vmax.f32 %v1007_v0, 0.0  ;;  %v1304_v51 = vunpack.c.h.bf16 %v5681_v12 }
 0x32d   :  { %v4324_v4 = vpack.c.bf16 %v5632_v2, %v5614_v48  ;;  %v1071_v53 = vrot.slane %v5632_v2, 4  ;;  %v1073_v18 = vrot.slane %v5630_v14, 4  ;;  %v4731_v11 = vpack.i.bf16 %v5630_v14, %v5632_v2  ;;  %1652 = vmatprep.mubr.f32.mxu1 %v1304_v51 }
 0x32e   :  { %v4653_v55 = vpop.permute.xlu0 %4652 }
 0x32f   :  { %v4655_v9 = vunpack.i.h.bf16 %v4653_v55  ;;  %v4654_v20 = vunpack.i.l.bf16 %v4653_v55  ;;  %4325 = vmatpush1.bf16.msra.mxu1 %v4324_v4  ;;  %v1072_v6 = vsel %vm608_vm6, %v1069_v54, %v1071_v53  ;;  %v1074_v22 = vsel %vm608_vm6, %v1071_v53, %v1073_v18 }
 0x330   :  { %v4686_v25 = vpack.i.bf16 %v1074_v22, %v1072_v6  ;;  %4326 = vmatprep.subr.bf16.mxu1 %v5172_v7 }
 0x331   :  { %v1010_v27 = vmax.f32 %v5553_v15, %v4655_v9  ;;  %v1009_v61 = vmax.f32 %v5544_v16, %v4654_v20 }
 0x332   :  { %4687 = vrot.lane.b32.xlu1 %v4686_v25, %s5171_s15 }
 0x333   :  { %v5646_v30 = vmax.f32 %v1010_v27, 0.0  ;;  %v5648_v32 = vmax.f32 %v1009_v61, 0.0 }
 0x335   :  { %v4327_v33 = vpack.c.bf16 %v5648_v32, %v5630_v14  ;;  %v1075_v63 = vrot.slane %v5648_v32, 4  ;;  %v1077_v34 = vrot.slane %v5646_v30, 4  ;;  %v4736_v35 = vpack.i.bf16 %v5646_v30, %v5648_v32 }
 0x336   :  { %v4658_v36 = vpop.permute.xlu1 %4657 }
 0x337   :  { %v4660_v15 = vunpack.i.h.bf16 %v4658_v36  ;;  %v4659_v38 = vunpack.i.l.bf16 %v4658_v36  ;;  %4328 = vmatpush1.bf16.msra.mxu1 %v4327_v33  ;;  %v1076_v16 = vsel %vm608_vm6, %v1073_v18, %v1075_v63  ;;  %v1078_v39 = vsel %vm608_vm6, %v1075_v63, %v1077_v34 }
 0x338   :  { %v4691_v40 = vpack.i.bf16 %v1078_v39, %v1076_v16  ;;  %4329 = vmatprep.subr.bf16.mxu1 %v5172_v7 }
 0x339   :  { %v1012_v3 = vmax.f32 %v5560_v19, %v4660_v15  ;;  %v1011_v42 = vmax.f32 %v5551_v13, %v4659_v38 }
 0x33a   :  { %4692 = vrot.lane.b32.xlu0 %v4691_v40, %s5171_s15 }
 0x33b   :  { %v5662_v43 = vmax.f32 %v1012_v3, 0.0  ;;  %v5664_v44 = vmax.f32 %v1011_v42, 0.0  ;;  %v969_v45 = vpop.permute.xlu1 %968 }
 0x33c   :  { %v1015_v19 = vmax.f32 %v5565_v21, %v969_v45 }
 0x33d   :  { %v4330_v5 = vpack.c.bf16 %v5664_v44, %v5646_v30  ;;  %v1079_v46 = vrot.slane %v5664_v44, 4  ;;  %v1081_v47 = vrot.slane %v5662_v43, 4  ;;  %v4741_v8 = vpack.i.bf16 %v5662_v43, %v5664_v44 }
 0x33e   :  { %v4663_v13 = vpop.permute.xlu0 %4662  ;;  %v5683_v21 = vmax.f32 %v1015_v19, 0.0 }
 0x33f   :  { %v4665_v52 = vunpack.i.h.bf16 %v4663_v13  ;;  %v4664_v54 = vunpack.i.l.bf16 %v4663_v13  ;;  %4331 = vmatpush1.bf16.msra.mxu1 %v4330_v5  ;;  %v1080_v56 = vsel %vm608_vm6, %v1077_v34, %v1079_v46  ;;  %v1082_v10 = vsel %vm608_vm6, %v1079_v46, %v1081_v47 }
 0x340   :  { %v4696_v58 = vpack.i.bf16 %v1082_v10, %v1080_v56  ;;  %4332 = vmatprep.subr.bf16.mxu1 %v5172_v7  ;;  %v1087_v55 = vrot.slane %v5683_v21, 4 }
 0x341   :  { %v1014_v60 = vmax.f32 %v5569_v57, %v4665_v52  ;;  %v1013_v62 = vmax.f32 %v5558_v17, %v4664_v54 }
 0x342   :  { %4697 = vrot.lane.b32.xlu1 %v4696_v58, %s5171_s15 }
 0x343   :  { %v5687_v0 = vmax.f32 %v1014_v60, 0.0  ;;  %v5689_v4 = vmax.f32 %v1013_v62, 0.0 }
 0x345   :  { %v4333_v57 = vpack.c.bf16 %v5689_v4, %v5662_v43  ;;  %v1083_v17 = vrot.slane %v5689_v4, 4  ;;  %v1085_v53 = vrot.slane %v5687_v0, 4  ;;  %v4336_v18 = vpack.c.bf16 %v5683_v21, %v5687_v0 }
 0x346   :  { %v4668_v9 = vpop.permute.xlu0 %4667  ;;  %v4746_v20 = vpack.i.bf16 %v5687_v0, %v5689_v4 }
 0x347   :  { %v4670_v6 = vunpack.i.h.bf16 %v4668_v9  ;;  %v4669_v22 = vunpack.i.l.bf16 %v4668_v9  ;;  %4334 = vmatpush1.bf16.msra.mxu1 %v4333_v57  ;;  %v1084_v25 = vsel %vm608_vm6, %v1081_v47, %v1083_v17  ;;  %v1086_v27 = vsel %vm608_vm6, %v1083_v17, %v1085_v53 }
 0x348   :  { %4335 = vmatprep.subr.bf16.mxu1 %v5172_v7  ;;  %v4701_v61 = vpack.i.bf16 %v1086_v27, %v1084_v25  ;;  %v1088_v33 = vsel %vm608_vm6, %v1085_v53, %v1087_v55 }
 0x349   :  { %v1017_v63 = vmax.f32 %v5574_v23, %v4670_v6  ;;  %v1016_v34 = vmax.f32 %v5576_v24, %v4669_v22 }
 0x34a   :  { %4702 = vrot.lane.b32.xlu0 %v4701_v61, %s5171_s15 }
 0x34b   :  { %v1037_v36 = vmax.f32 %v1017_v63, 0.0  ;;  %v1036_v15 = vmax.f32 %v1016_v34, 0.0  ;;  %4337 = vmatpush1.bf16.msra.mxu1 %v4336_v18  ;;  %v1225_v34 = vld [vmem:[%s6797_s2 + $0x10] sm:$0xff] }
 0x34c   :  { %4338 = vmatprep.subr.bf16.mxu1 %v5172_v7 }
 0x34d   :  { %v4339_v38 = vpack.c.bf16 %v1037_v36, %v1036_v15  ;;  %v1089_v16 = vrot.slane %v1036_v15, 4  ;;  %v1091_v39 = vrot.slane %v1037_v36, 4  ;;  %v4751_v40 = vpack.i.bf16 %v1036_v15, %v5683_v21 }
 0x34e   :  { %v4673_v3 = vpop.permute.xlu1 %4672  ;;  %v1303_v15 = vunpack.c.l.bf16 %v5681_v12 }
 0x34f   :  { %v4675_v42 = vunpack.i.h.bf16 %v4673_v3  ;;  %v4674_v45 = vunpack.i.l.bf16 %v4673_v3  ;;  %4340 = vmatpush1.bf16.msra.mxu1 %v4339_v38  ;;  %v1090_v23 = vsel %vm608_vm6, %v1087_v55, %v1089_v16  ;;  %v1092_v24 = vsel %vm608_vm6, %v1089_v16, %v1091_v39  ;;  %v1227_v16 = vld [vmem:[%s6797_s2 + $0x20] sm:$0xff] }
 0x350   :  { %v981_v5 = vpop.permute.xlu0 %980  ;;  %v4706_v46 = vpack.i.bf16 %v1090_v23, %v1088_v33  ;;  %4341 = vmatprep.subr.bf16.mxu1 %v5172_v7  ;;  %v1308_v38 = vunpack.c.h.bf16 %v1225_v34  ;;  %v1229_v23 = vld [vmem:[%s6797_s2 + $0x30] sm:$0xff] }
 0x351   :  { %v1019_v47 = vmax.f32 %v5581_v59, %v4675_v42  ;;  %v1018_v19 = vmax.f32 %v5583_v26, %v4674_v45  ;;  %v1021_v13 = vmax.f32 %v5588_v28, %v981_v5  ;;  %v1312_v45 = vunpack.c.h.bf16 %v1227_v16 }
 0x352   :  { %4707 = vrot.lane.b32.xlu1 %v4706_v46, %s5171_s15  ;;  %v979_v52 = vpop.permute.xlu1 %978  ;;  %v1316_v5 = vunpack.c.h.bf16 %v1229_v23  ;;  %v1231_v46 = vld [vmem:[%s6797_s2 + $0x40] sm:$0xff] }
 0x353   :  { %v1039_v54 = vmax.f32 %v1019_v47, 0.0  ;;  %v1038_v56 = vmax.f32 %v1018_v19, 0.0  ;;  %v1041_v10 = vmax.f32 %v1021_v13, 0.0  ;;  %v1020_v58 = vmax.f32 %v5592_v29, %v979_v52 }
 0x354   :  { %v1315_v19 = vunpack.c.l.bf16 %v1229_v23 }
 0x355   :  { %v1040_v60 = vmax.f32 %v1020_v58, 0.0  ;;  %v4342_v62 = vpack.c.bf16 %v1039_v54, %v1038_v56  ;;  %v1093_v21 = vrot.slane %v1038_v56, 4  ;;  %v1095_v51 = vrot.slane %v1039_v54, 4 }
 0x356   :  { %v1099_v0 = vrot.slane %v1041_v10, 4  ;;  %v4756_v4 = vpack.i.bf16 %v1038_v56, %v1037_v36 }
 0x357   :  { %v1097_v57 = vrot.slane %v1040_v60, 4  ;;  %4343 = vmatpush1.bf16.msra.mxu1 %v4342_v62  ;;  %v1094_v59 = vsel %vm608_vm6, %v1091_v39, %v1093_v21  ;;  %v1096_v26 = vsel %vm608_vm6, %v1093_v21, %v1095_v51  ;;  %v4761_v28 = vpack.i.bf16 %v1040_v60, %v1039_v54 }
 0x358   :  { %v4711_v17 = vpack.i.bf16 %v1094_v59, %v1092_v24  ;;  %4344 = vmatprep.subr.bf16.mxu1 %v5172_v7  ;;  %v1311_v24 = vunpack.c.l.bf16 %v1227_v16  ;;  %v1320_v54 = vunpack.c.h.bf16 %v1231_v46 }
 0x359   :  { %v1098_v53 = vsel %vm608_vm6, %v1095_v51, %v1097_v57  ;;  %v1100_v29 = vsel %vm608_vm6, %v1097_v57, %v1099_v0  ;;  %v1319_v51 = vunpack.c.l.bf16 %v1231_v46  ;;  %v1235_v57 = vld [vmem:[%s6797_s2 + $0x60] sm:$0xff] }
 0x35a   :  { %4712 = vrot.lane.b32.xlu0 %v4711_v17, %s5171_s15  ;;  %v4716_v18 = vpack.i.bf16 %v1098_v53, %v1096_v26  ;;  %v1328_v17 = vunpack.c.h.bf16 %v1235_v57  ;;  %v1237_v53 = vld [vmem:[%s6797_s2 + $0x70] sm:$0xff] }
 0x35c   :  { %4717 = vrot.lane.b32.xlu1 %v4716_v18, %s5171_s15 }
 0x35e   :  { %1139 = vrot.lane.b32.xlu0 %v1100_v29, %s5171_s15 }
 0x360   :  { %1161 = vrot.lane.b32.xlu1 %v5596_v31, %s5173_s24 }
 0x362   :  { %4722 = vrot.lane.b32.xlu0 %v4721_v41, %s5173_s24 }
 0x364   :  { %4727 = vrot.lane.b32.xlu1 %v4726_v49, %s5173_s24 }
 0x366   :  { %4732 = vrot.lane.b32.xlu0 %v4731_v11, %s5173_s24 }
 0x368   :  { %4737 = vrot.lane.b32.xlu1 %v4736_v35, %s5173_s24 }
 0x36a   :  { %4742 = vrot.lane.b32.xlu0 %v4741_v8, %s5173_s24 }
 0x36c   :  { %4747 = vrot.lane.b32.xlu1 %v4746_v20, %s5173_s24 }
 0x36e   :  { %4752 = vrot.lane.b32.xlu0 %v4751_v40, %s5173_s24  ;;  %v1307_v40 = vunpack.c.l.bf16 %v1225_v34 }
 0x370   :  { %4757 = vrot.lane.b32.xlu1 %v4756_v4, %s5173_s24 }
 0x372   :  { %4762 = vrot.lane.b32.xlu0 %v4761_v28, %s5173_s24 }
 0x374   :  { %1199 = vrot.lane.b32.xlu1 %v1041_v10, %s5173_s24 }
 0x385   :  { %v1102_v31 = vpop.permute.xlu0 %1101 }
 0x386   :  { %v1221_v37 = vsel %vm608_vm6, %v1041_v10, %v1102_v31  ;;  %v1233_v10 = vld [vmem:[%s6797_s2 + $0x50] sm:$0xff] }
 0x387   :  { %v4345_v1 = vpack.c.bf16 %v1221_v37, %v1040_v60  ;;  %v1324_v0 = vunpack.c.h.bf16 %v1233_v10  ;;  %v1323_v28 = vunpack.c.l.bf16 %v1233_v10 }
 0x389   :  { %4346 = vmatpush1.bf16.msra.mxu1 %v4345_v1  ;;  %v1327_v1 = vunpack.c.l.bf16 %v1235_v57 }
 0x38a   :  { %4347 = vmatprep.subr.bf16.mxu1 %v5172_v7 }
 0x394   :  { %v4678_v41 = vpop.permute.xlu1 %4677 }
 0x395   :  { %v4680_v48 = vunpack.i.h.bf16 %v4678_v41  ;;  %v4679_v50 = vunpack.i.l.bf16 %v4678_v41  ;;  %v1332_v41 = vunpack.c.h.bf16 %v1237_v53 }
 0x397   :  { %v4348_v49 = vpack.c.bf16 %v4680_v48, %v4679_v50  ;;  %v1239_v48 = vld [vmem:[%s6797_s2 + $0x80] sm:$0xff] }
 0x399   :  { %4349 = vmatpush1.bf16.msra.mxu1 %v4348_v49 }
 0x39a   :  { %4350 = vmatprep.subr.bf16.mxu1 %v5172_v7 }
 0x39c   :  { %v4683_v14 = vpop.permute.xlu0 %4682 }
 0x39d   :  { %v4685_v2 = vunpack.i.h.bf16 %v4683_v14  ;;  %v4684_v11 = vunpack.i.l.bf16 %v4683_v14 }
 0x39f   :  { %v4351_v30 = vpack.c.bf16 %v4685_v2, %v4684_v11  ;;  %v1331_v11 = vunpack.c.l.bf16 %v1237_v53 }
 0x3a1   :  { %4352 = vmatpush1.bf16.msra.mxu1 %v4351_v30  ;;  %v1336_v30 = vunpack.c.h.bf16 %v1239_v48 }
 0x3a2   :  { %4353 = vmatprep.subr.bf16.mxu1 %v5172_v7 }
 0x3a4   :  { %v4688_v32 = vpop.permute.xlu1 %4687 }
 0x3a5   :  { %v4690_v35 = vunpack.i.h.bf16 %v4688_v32  ;;  %v4689_v43 = vunpack.i.l.bf16 %v4688_v32  ;;  %v1241_v32 = vld [vmem:[%s6797_s2 + $0x90] sm:$0xff] }
 0x3a7   :  { %v4354_v44 = vpack.c.bf16 %v4690_v35, %v4689_v43 }
 0x3a9   :  { %4355 = vmatpush1.bf16.msra.mxu1 %v4354_v44 }
 0x3aa   :  { %4356 = vmatprep.subr.bf16.mxu1 %v5172_v7 }
 0x3ac   :  { %v4693_v8 = vpop.permute.xlu0 %4692 }
 0x3ad   :  { %v4695_v55 = vunpack.i.h.bf16 %v4693_v8  ;;  %v4694_v9 = vunpack.i.l.bf16 %v4693_v8 }
 0x3af   :  { %v4357_v20 = vpack.c.bf16 %v4695_v55, %v4694_v9  ;;  %v1335_v55 = vunpack.c.l.bf16 %v1239_v48  ;;  %v1340_v9 = vunpack.c.h.bf16 %v1241_v32 }
 0x3b1   :  { %4358 = vmatpush1.bf16.msra.mxu1 %v4357_v20  ;;  %v1243_v20 = vld [vmem:[%s6797_s2 + $0xa0] sm:$0xff] }
 0x3b2   :  { %4359 = vmatprep.subr.bf16.mxu1 %v5172_v7  ;;  %v1343_v16 = vunpack.c.l.bf16 %v1243_v20 }
 0x3b4   :  { %v4698_v6 = vpop.permute.xlu1 %4697 }
 0x3b5   :  { %v4700_v22 = vunpack.i.h.bf16 %v4698_v6  ;;  %v4699_v25 = vunpack.i.l.bf16 %v4698_v6 }
 0x3b7   :  { %v4360_v27 = vpack.c.bf16 %v4700_v22, %v4699_v25 }
 0x3b9   :  { %4361 = vmatpush1.bf16.msra.mxu1 %v4360_v27 }
 0x3ba   :  { %4362 = vmatprep.subr.bf16.mxu1 %v5172_v7 }
 0x3bc   :  { %v4703_v61 = vpop.permute.xlu0 %4702 }
 0x3bd   :  { %v4705_v33 = vunpack.i.h.bf16 %v4703_v61  ;;  %v4704_v63 = vunpack.i.l.bf16 %v4703_v61  ;;  %v1339_v61 = vunpack.c.l.bf16 %v1241_v32 }
 0x3bf   :  { %v4363_v36 = vpack.c.bf16 %v4705_v33, %v4704_v63  ;;  %v1344_v33 = vunpack.c.h.bf16 %v1243_v20  ;;  %v1245_v63 = vld [vmem:[%s6797_s2 + $0xb0] sm:$0xff]  ;;  %v1267_v20 = vld [vmem:[%s6797_s2 + $0x160] sm:$0xff] }
 0x3c1   :  { %4364 = vmatpush1.bf16.msra.mxu1 %v4363_v36 }
 0x3c2   :  { %4365 = vmatprep.subr.bf16.mxu1 %v5172_v7 }
 0x3c4   :  { %v4708_v39 = vpop.permute.xlu1 %4707  ;;  %1653 = vmatmul.mubr.f32.vlgmr.msra.gmra.mrb[20].mxu1 %v1303_v15 }
 0x3c5   :  { %v4710_v3 = vunpack.i.h.bf16 %v4708_v39  ;;  %v4709_v42 = vunpack.i.l.bf16 %v4708_v39  ;;  %1657 = vmatprep.mubr.f32.mxu1 %v1308_v38  ;;  %v1348_v39 = vunpack.c.h.bf16 %v1245_v63 }
 0x3c7   :  { %v4366_v12 = vpack.c.bf16 %v4710_v3, %v4709_v42 }
 0x3c8   :  { %1658 = vmatmul.mubr.f32.gmra.mrb[22].mxu1 %v1307_v40  ;;  %v1247_v40 = vld [vmem:[%s6797_s2 + $0xc0] sm:$0xff] }
 0x3c9   :  { %4367 = vmatpush1.bf16.msra.mxu1 %v4366_v12  ;;  %1662 = vmatprep.mubr.f32.mxu1 %v1312_v45  ;;  %v1347_v12 = vunpack.c.l.bf16 %v1245_v63 }
 0x3ca   :  { %4368 = vmatprep.subr.bf16.mxu1 %v5172_v7 }
 0x3cc   :  { %v4713_v47 = vpop.permute.xlu0 %4712  ;;  %1663 = vmatmul.mubr.f32.gmra.mrb[24].mxu1 %v1311_v24  ;;  %v1352_v24 = vunpack.c.h.bf16 %v1247_v40 }
 0x3cd   :  { %v4715_v13 = vunpack.i.h.bf16 %v4713_v47  ;;  %v4714_v52 = vunpack.i.l.bf16 %v4713_v47  ;;  %1667 = vmatprep.mubr.f32.mxu1 %v1316_v5  ;;  %v1249_v5 = vld [vmem:[%s6797_s2 + $0xd0] sm:$0xff] }
 0x3ce   :  { %v4718_v56 = vpop.permute.xlu1 %4717 }
 0x3cf   :  { %v4369_v58 = vpack.c.bf16 %v4715_v13, %v4714_v52  ;;  %v4720_v60 = vunpack.i.h.bf16 %v4718_v56  ;;  %v4719_v62 = vunpack.i.l.bf16 %v4718_v56  ;;  %v1351_v52 = vunpack.c.l.bf16 %v1247_v40  ;;  %v1251_v56 = vld [vmem:[%s6797_s2 + $0xe0] sm:$0xff] }
 0x3d0   :  { %v1140_v21 = vpop.permute.xlu0 %1139  ;;  %1668 = vmatmul.mubr.f32.gmra.mrb[26].mxu1 %v1315_v19 }
 0x3d1   :  { %4370 = vmatpush1.bf16.msra.mxu1 %v4369_v58  ;;  %1672 = vmatprep.mubr.f32.mxu1 %v1320_v54  ;;  %v4372_v59 = vpack.c.bf16 %v4720_v60, %v4719_v62  ;;  %v1356_v54 = vunpack.c.h.bf16 %v1249_v5 }
 0x3d2   :  { %v1162_v4 = vpop.permute.xlu1 %1161  ;;  %4371 = vmatprep.subr.bf16.mxu1 %v5172_v7 }
 0x3d3   :  { %v4375_v29 = vpack.c.bf16 %v1162_v4, %v1140_v21  ;;  %v1355_v21 = vunpack.c.l.bf16 %v1249_v5  ;;  %v1281_v5 = vld [vmem:[%s6797_s2 + $0x1d0] sm:$0xff] }
 0x3d4   :  { %v4723_v26 = vpop.permute.xlu0 %4722  ;;  %1673 = vmatmul.mubr.f32.gmra.mrb[28].mxu1 %v1319_v51  ;;  %v1360_v51 = vunpack.c.h.bf16 %v1251_v56 }
 0x3d5   :  { %4373 = vmatpush1.bf16.msra.mxu1 %v4372_v59  ;;  %1677 = vmatprep.mubr.f32.mxu1 %v1324_v0  ;;  %v4725_v18 = vunpack.i.h.bf16 %v4723_v26  ;;  %v4724_v31 = vunpack.i.l.bf16 %v4723_v26  ;;  %v1253_v0 = vld [vmem:[%s6797_s2 + $0xf0] sm:$0xff]  ;;  %v1359_v26 = vunpack.c.l.bf16 %v1251_v56 }
 0x3d6   :  { %4374 = vmatprep.subr.bf16.mxu1 %v5172_v7  ;;  %v4728_v37 = vpop.permute.xlu1 %4727 }
 0x3d7   :  { %v4378_v50 = vpack.c.bf16 %v4725_v18, %v4724_v31  ;;  %v4730_v49 = vunpack.i.h.bf16 %v4728_v37  ;;  %v4729_v14 = vunpack.i.l.bf16 %v4728_v37  ;;  %v5177_v37 = vmov 0.0  }
 0x3d8   :  { %1678 = vmatmul.mubr.f32.gmra.mrb[30].mxu1 %v1323_v28  ;;  %v4733_v2 = vpop.permute.xlu0 %4732  ;;  %v1364_v28 = vunpack.c.h.bf16 %v1253_v0 }
 0x3d9   :  { %4376 = vmatpush1.bf16.msra.mxu1 %v4375_v29  ;;  %1682 = vmatprep.mubr.f32.mxu1 %v1328_v17  ;;  %v4381_v35 = vpack.c.bf16 %v4730_v49, %v4729_v14  ;;  %v4735_v43 = vunpack.i.h.bf16 %v4733_v2  ;;  %v4734_v44 = vunpack.i.l.bf16 %v4733_v2  ;;  %v1255_v17 = vld [vmem:[%s6797_s2 + $0x100] sm:$0xff]  ;;  %v1363_v29 = vunpack.c.l.bf16 %v1253_v0 }
 0x3da   :  { %4377 = vmatprep.subr.bf16.mxu1 %v5172_v7  ;;  %v4738_v8 = vpop.permute.xlu1 %4737  ;;  %v1368_v31 = vunpack.c.h.bf16 %v1255_v17  ;;  %v1367_v48 = vunpack.c.l.bf16 %v1255_v17  ;;  %v1259_v49 = vld [vmem:[%s6797_s2 + $0x120] sm:$0xff] }
 0x3db   :  { %v4384_v6 = vpack.c.bf16 %v4735_v43, %v4734_v44  ;;  %v4740_v22 = vunpack.i.h.bf16 %v4738_v8  ;;  %v4739_v25 = vunpack.i.l.bf16 %v4738_v8  ;;  %v1376_v2 = vunpack.c.h.bf16 %v1259_v49  ;;  %v1265_v8 = vld [vmem:[%s6797_s2 + $0x150] sm:$0xff] }
 0x3dc   :  { %1683 = vmatmul.mubr.f32.gmra.mrb[32].mxu1 %v1327_v1  ;;  %v4743_v27 = vpop.permute.xlu0 %4742  ;;  %v1257_v1 = vld [vmem:[%s6797_s2 + $0x110] sm:$0xff] }
 0x3dd   :  { %4379 = vmatpush1.bf16.msra.mxu1 %v4378_v50  ;;  %1687 = vmatprep.mubr.f32.mxu1 %v1332_v41  ;;  %v4387_v34 = vpack.c.bf16 %v4740_v22, %v4739_v25  ;;  %v4745_v36 = vunpack.i.h.bf16 %v4743_v27  ;;  %v4744_v15 = vunpack.i.l.bf16 %v4743_v27  ;;  %v1372_v50 = vunpack.c.h.bf16 %v1257_v1  ;;  %v1269_v25 = vld [vmem:[%s6797_s2 + $0x170] sm:$0xff] }
 0x3de   :  { %4380 = vmatprep.subr.bf16.mxu1 %v5172_v7  ;;  %v4748_v38 = vpop.permute.xlu1 %4747  ;;  %v1371_v14 = vunpack.c.l.bf16 %v1257_v1  ;;  %v1392_v22 = vunpack.c.h.bf16 %v1267_v20  ;;  %v1391_v27 = vunpack.c.l.bf16 %v1267_v20  ;;  %v1395_v63 = vunpack.c.l.bf16 %v1269_v25 }
 0x3df   :  { %v4390_v3 = vpack.c.bf16 %v4745_v36, %v4744_v15  ;;  %v4750_v42 = vunpack.i.h.bf16 %v4748_v38  ;;  %v4749_v45 = vunpack.i.l.bf16 %v4748_v38  ;;  %v1273_v36 = vld [vmem:[%s6797_s2 + $0x190] sm:$0xff] }
 0x3e0   :  { %1688 = vmatmul.mubr.f32.gmra.mrb[34].mxu1 %v1331_v11  ;;  %v4753_v23 = vpop.permute.xlu0 %4752  ;;  %v1261_v11 = vld [vmem:[%s6797_s2 + $0x130] sm:$0xff]  ;;  %v1404_v38 = vunpack.c.h.bf16 %v1273_v36 }
 0x3e1   :  { %4382 = vmatpush1.bf16.msra.mxu1 %v4381_v35  ;;  %1692 = vmatprep.mubr.f32.mxu1 %v1336_v30  ;;  %v4393_v46 = vpack.c.bf16 %v4750_v42, %v4749_v45  ;;  %v4755_v47 = vunpack.i.h.bf16 %v4753_v23  ;;  %v4754_v19 = vunpack.i.l.bf16 %v4753_v23  ;;  %v1375_v30 = vunpack.c.l.bf16 %v1259_v49  ;;  %v1263_v35 = vld [vmem:[%s6797_s2 + $0x140] sm:$0xff] }
 0x3e2   :  { %4383 = vmatprep.subr.bf16.mxu1 %v5172_v7  ;;  %v4758_v13 = vpop.permute.xlu1 %4757  ;;  %v1380_v32 = vunpack.c.h.bf16 %v1261_v11  ;;  %v1379_v43 = vunpack.c.l.bf16 %v1261_v11  ;;  %v1384_v44 = vunpack.c.h.bf16 %v1263_v35  ;;  %v1279_v23 = vld [vmem:[%s6797_s2 + $0x1c0] sm:$0xff] }
 0x3e3   :  { %v4396_v10 = vpack.c.bf16 %v4755_v47, %v4754_v19  ;;  %v4760_v58 = vunpack.i.h.bf16 %v4758_v13  ;;  %v4759_v60 = vunpack.i.l.bf16 %v4758_v13  ;;  %v1420_v47 = vunpack.c.h.bf16 %v1281_v5  ;;  %v1283_v19 = vld [vmem:[%s6797_s2 + $0x1e0] sm:$0xff] }
 0x3e4   :  { %1693 = vmatmul.mubr.f32.gmra.mrb[36].mxu1 %v1335_v55  ;;  %v4763_v62 = vpop.permute.xlu0 %4762  ;;  %v1383_v55 = vunpack.c.l.bf16 %v1263_v35  ;;  %v1419_v13 = vunpack.c.l.bf16 %v1281_v5  ;;  %v1423_v56 = vunpack.c.l.bf16 %v1283_v19 }
 0x3e5   :  { %4385 = vmatpush1.bf16.msra.mxu1 %v4384_v6  ;;  %1697 = vmatprep.mubr.f32.mxu1 %v1340_v9  ;;  %v4399_v4 = vpack.c.bf16 %v4760_v58, %v4759_v60  ;;  %v4765_v57 = vunpack.i.h.bf16 %v4763_v62  ;;  %v4764_v59 = vunpack.i.l.bf16 %v4763_v62  ;;  %v1388_v9 = vunpack.c.h.bf16 %v1265_v8  ;;  %v1287_v58 = vld [vmem:[%s6797_s2 + $0x200] sm:$0xff] }
 0x3e6   :  { %4386 = vmatprep.subr.bf16.mxu1 %v5172_v7  ;;  %v1200_v18 = vpop.permute.xlu1 %1199  ;;  %v1387_v6 = vunpack.c.l.bf16 %v1265_v8  ;;  %v1432_v62 = vunpack.c.h.bf16 %v1287_v58 }
 0x3e7   :  { %v4402_v53 = vpack.c.bf16 %v4765_v57, %v4764_v59  ;;  %v1222_v41 = vsel %vm608_vm6, %v1200_v18, 1.0 }
 0x3e8   :  { %1698 = vmatmul.mubr.f32.gmra.mrb[38].mxu1 %v1339_v61  ;;  %v1396_v61 = vunpack.c.h.bf16 %v1269_v25 }
 0x3e9   :  { %4388 = vmatpush1.bf16.msra.mxu1 %v4387_v34  ;;  %1702 = vmatprep.mubr.f32.mxu1 %v1344_v33  ;;  %v1271_v33 = vld [vmem:[%s6797_s2 + $0x180] sm:$0xff] }
 0x3ea   :  { %4389 = vmatprep.subr.bf16.mxu1 %v5172_v7  ;;  %v1400_v34 = vunpack.c.h.bf16 %v1271_v33  ;;  %v1399_v15 = vunpack.c.l.bf16 %v1271_v33 }
 0x3ec   :  { %1703 = vmatmul.mubr.f32.gmra.mrb[40].mxu1 %v1343_v16  ;;  %v1275_v16 = vld [vmem:[%s6797_s2 + $0x1a0] sm:$0xff] }
 0x3ed   :  { %4391 = vmatpush1.bf16.msra.mxu1 %v4390_v3  ;;  %1707 = vmatprep.mubr.f32.mxu1 %v1348_v39  ;;  %v1403_v39 = vunpack.c.l.bf16 %v1273_v36  ;;  %v1408_v40 = vunpack.c.h.bf16 %v1275_v16  ;;  %v1277_v3 = vld [vmem:[%s6797_s2 + $0x1b0] sm:$0xff]  ;;  %v1407_v42 = vunpack.c.l.bf16 %v1275_v16 }
 0x3ee   :  { %4392 = vmatprep.subr.bf16.mxu1 %v5172_v7  ;;  %v1412_v45 = vunpack.c.h.bf16 %v1277_v3 }
 0x3f0   :  { %1708 = vmatmul.mubr.f32.gmra.mrb[42].mxu1 %v1347_v12  ;;  %v1411_v12 = vunpack.c.l.bf16 %v1277_v3 }
 0x3f1   :  { %4394 = vmatpush1.bf16.msra.mxu1 %v4393_v46  ;;  %1712 = vmatprep.mubr.f32.mxu1 %v1352_v24  ;;  %v1416_v24 = vunpack.c.h.bf16 %v1279_v23  ;;  %v1415_v46 = vunpack.c.l.bf16 %v1279_v23 }
 0x3f2   :  { %4395 = vmatprep.subr.bf16.mxu1 %v5172_v7 }
 0x3f4   :  { %1713 = vmatmul.mubr.f32.gmra.mrb[44].mxu1 %v1351_v52  ;;  %v1424_v52 = vunpack.c.h.bf16 %v1283_v19 }
 0x3f5   :  { %4397 = vmatpush1.bf16.msra.mxu1 %v4396_v10  ;;  %1717 = vmatprep.mubr.f32.mxu1 %v1356_v54  ;;  %v1285_v54 = vld [vmem:[%s6797_s2 + $0x1f0] sm:$0xff] }
 0x3f6   :  { %4398 = vmatprep.subr.bf16.mxu1 %v5172_v7  ;;  %v1428_v10 = vunpack.c.h.bf16 %v1285_v54  ;;  %v1427_v60 = vunpack.c.l.bf16 %v1285_v54 }
 0x3f8   :  { %1718 = vmatmul.mubr.f32.gmra.mrb[46].mxu1 %v1355_v21  ;;  %v1289_v21 = vld [vmem:[%s6797_s2 + $0x210] sm:$0xff] }
 0x3f9   :  { %4400 = vmatpush1.bf16.msra.mxu1 %v4399_v4  ;;  %1722 = vmatprep.mubr.f32.mxu1 %v1360_v51  ;;  %v1431_v51 = vunpack.c.l.bf16 %v1287_v58  ;;  %v1436_v0 = vunpack.c.h.bf16 %v1289_v21  ;;  %v1291_v4 = vld [vmem:[%s6797_s2 + $0x220] sm:$0xff]  ;;  %v1435_v57 = vunpack.c.l.bf16 %v1289_v21 }
 0x3fa   :  { %4401 = vmatprep.subr.bf16.mxu1 %v5172_v7  ;;  %v1440_v59 = vunpack.c.h.bf16 %v1291_v4 }
 0x3fc   :  { %1723 = vmatmul.mubr.f32.gmra.mrb[48].mxu1 %v1359_v26  ;;  %v1293_v26 = vld [vmem:[%s6797_s2 + $0x230] sm:$0xff] }
 0x3fd   :  { %4403 = vmatpush1.bf16.msra.mxu1 %v4402_v53  ;;  %1727 = vmatprep.mubr.f32.mxu1 %v1364_v28  ;;  %v1439_v28 = vunpack.c.l.bf16 %v1291_v4  ;;  %v1444_v17 = vunpack.c.h.bf16 %v1293_v26  ;;  %v1295_v53 = vld [vmem:[%s6797_s2 + $0x240] sm:$0xff] }
 0x3fe   :  { %1905 = vmatprep.subr.mxu1 %v5177_v37  ;;  %v1448_v18 = vunpack.c.h.bf16 %v1295_v53  ;;  %v1447_v1 = vunpack.c.l.bf16 %v1295_v53 }
 0x400   :  { %1728 = vmatmul.mubr.f32.gmra.mrb[50].mxu1 %v1363_v29  ;;  %v1443_v29 = vunpack.c.l.bf16 %v1293_v26 }
 0x401   :  { %3860 = vmatpush1.msk.msra.mxu1 %vm1584_vm8, %v1222_v41  ;;  %1732 = vmatprep.mubr.f32.mxu1 %v1368_v31  ;;  %v1297_v31 = vld [vmem:[%s6797_s2 + $0x250] sm:$0xff] }
 0x402   :  { %v1452_v41 = vunpack.c.h.bf16 %v1297_v31 }
 0x404   :  { %1733 = vmatmul.mubr.f32.gmra.mrb[52].mxu1 %v1367_v48  ;;  %v1299_v48 = vld [vmem:[%s6797_s2 + $0x260] sm:$0xff] }
 0x405   :  { %1737 = vmatprep.mubr.f32.mxu1 %v1372_v50  ;;  %v1451_v50 = vunpack.c.l.bf16 %v1297_v31  ;;  %v1456_v49 = vunpack.c.h.bf16 %v1299_v48 }
 0x408   :  { %1738 = vmatmul.mubr.f32.gmra.mrb[54].mxu1 %v1371_v14  ;;  %v1301_v14 = vld [vmem:[%s6797_s2 + $0x270] sm:$0xff] }
 0x409   :  { %1742 = vmatprep.mubr.f32.mxu1 %v1376_v2  ;;  %v1455_v2 = vunpack.c.l.bf16 %v1299_v48  ;;  %v1460_v11 = vunpack.c.h.bf16 %v1301_v14 }
 0x40c   :  { %1743 = vmatmul.mubr.f32.gmra.mrb[56].mxu1 %v1375_v30  ;;  %v1224_v30 = vld [vmem:[%s6797_s2 + $0x8] sm:$0xff] }
 0x40d   :  { %1747 = vmatprep.mubr.f32.mxu1 %v1380_v32  ;;  %v1459_v32 = vunpack.c.l.bf16 %v1301_v14  ;;  %v1306_v35 = vunpack.c.h.bf16 %v1224_v30 }
 0x410   :  { %1748 = vmatmul.mubr.f32.gmra.mrb[58].mxu1 %v1379_v43  ;;  %v1226_v43 = vld [vmem:[%s6797_s2 + $0x18] sm:$0xff] }
 0x411   :  { %1752 = vmatprep.mubr.f32.mxu1 %v1384_v44  ;;  %v1305_v44 = vunpack.c.l.bf16 %v1224_v30  ;;  %v1310_v8 = vunpack.c.h.bf16 %v1226_v43 }
 0x414   :  { %1753 = vmatmul.mubr.f32.gmra.mrb[60].mxu1 %v1383_v55  ;;  %v1228_v55 = vld [vmem:[%s6797_s2 + $0x28] sm:$0xff] }
 0x415   :  { %1757 = vmatprep.mubr.f32.mxu1 %v1388_v9  ;;  %v1309_v9 = vunpack.c.l.bf16 %v1226_v43  ;;  %v1314_v20 = vunpack.c.h.bf16 %v1228_v55 }
 0x418   :  { %1758 = vmatmul.mubr.f32.gmra.mrb[62].mxu1 %v1387_v6  ;;  %v1230_v6 = vld [vmem:[%s6797_s2 + $0x38] sm:$0xff] }
 0x419   :  { %1762 = vmatprep.mubr.f32.mxu1 %v1392_v22  ;;  %v1313_v22 = vunpack.c.l.bf16 %v1228_v55  ;;  %v1318_v25 = vunpack.c.h.bf16 %v1230_v6 }
 0x41c   :  { %1763 = vmatmul.mubr.f32.gmra.mrb[64].mxu1 %v1391_v27  ;;  %v1232_v27 = vld [vmem:[%s6797_s2 + $0x48] sm:$0xff] }
 0x41d   :  { %1767 = vmatprep.mubr.f32.mxu1 %v1396_v61  ;;  %v1317_v61 = vunpack.c.l.bf16 %v1230_v6  ;;  %v1322_v33 = vunpack.c.h.bf16 %v1232_v27 }
 0x420   :  { %1768 = vmatmul.mubr.f32.gmra.mrb[66].mxu1 %v1395_v63  ;;  %v1234_v63 = vld [vmem:[%s6797_s2 + $0x58] sm:$0xff] }
 0x421   :  { %1772 = vmatprep.mubr.f32.mxu1 %v1400_v34  ;;  %v1321_v34 = vunpack.c.l.bf16 %v1232_v27  ;;  %v1326_v36 = vunpack.c.h.bf16 %v1234_v63 }
 0x424   :  { %1773 = vmatmul.mubr.f32.gmra.mrb[68].mxu1 %v1399_v15  ;;  %v1236_v15 = vld [vmem:[%s6797_s2 + $0x68] sm:$0xff] }
 0x425   :  { %1777 = vmatprep.mubr.f32.mxu1 %v1404_v38  ;;  %v1325_v38 = vunpack.c.l.bf16 %v1234_v63  ;;  %v1330_v16 = vunpack.c.h.bf16 %v1236_v15 }
 0x428   :  { %1778 = vmatmul.mubr.f32.gmra.mrb[70].mxu1 %v1403_v39  ;;  %v1238_v39 = vld [vmem:[%s6797_s2 + $0x78] sm:$0xff] }
 0x429   :  { %1782 = vmatprep.mubr.f32.mxu1 %v1408_v40  ;;  %v1329_v40 = vunpack.c.l.bf16 %v1236_v15  ;;  %v1334_v3 = vunpack.c.h.bf16 %v1238_v39 }
 0x42c   :  { %1783 = vmatmul.mubr.f32.gmra.mrb[72].mxu1 %v1407_v42  ;;  %v1240_v42 = vld [vmem:[%s6797_s2 + $0x88] sm:$0xff] }
 0x42d   :  { %1787 = vmatprep.mubr.f32.mxu1 %v1412_v45  ;;  %v1333_v45 = vunpack.c.l.bf16 %v1238_v39  ;;  %v1338_v23 = vunpack.c.h.bf16 %v1240_v42 }
 0x430   :  { %1788 = vmatmul.mubr.f32.gmra.mrb[74].mxu1 %v1411_v12  ;;  %v1242_v12 = vld [vmem:[%s6797_s2 + $0x98] sm:$0xff] }
 0x431   :  { %1792 = vmatprep.mubr.f32.mxu1 %v1416_v24  ;;  %v1337_v24 = vunpack.c.l.bf16 %v1240_v42  ;;  %v1342_v5 = vunpack.c.h.bf16 %v1242_v12 }
 0x434   :  { %1793 = vmatmul.mubr.f32.gmra.mrb[76].mxu1 %v1415_v46  ;;  %v1244_v46 = vld [vmem:[%s6797_s2 + $0xa8] sm:$0xff] }
 0x435   :  { %1797 = vmatprep.mubr.f32.mxu1 %v1420_v47  ;;  %v1341_v47 = vunpack.c.l.bf16 %v1242_v12  ;;  %v1346_v19 = vunpack.c.h.bf16 %v1244_v46 }
 0x438   :  { %1798 = vmatmul.mubr.f32.gmra.mrb[78].mxu1 %v1419_v13  ;;  %v1246_v13 = vld [vmem:[%s6797_s2 + $0xb8] sm:$0xff] }
 0x439   :  { %1802 = vmatprep.mubr.f32.mxu1 %v1424_v52  ;;  %v1345_v52 = vunpack.c.l.bf16 %v1244_v46  ;;  %v1350_v54 = vunpack.c.h.bf16 %v1246_v13 }
 0x43c   :  { %1803 = vmatmul.mubr.f32.gmra.mrb[80].mxu1 %v1423_v56  ;;  %v1248_v56 = vld [vmem:[%s6797_s2 + $0xc8] sm:$0xff] }
 0x43d   :  { %1807 = vmatprep.mubr.f32.mxu1 %v1428_v10  ;;  %v1349_v10 = vunpack.c.l.bf16 %v1246_v13  ;;  %v1354_v58 = vunpack.c.h.bf16 %v1248_v56 }
 0x440   :  { %1808 = vmatmul.mubr.f32.gmra.mrb[82].mxu1 %v1427_v60  ;;  %v1250_v60 = vld [vmem:[%s6797_s2 + $0xd8] sm:$0xff] }
 0x441   :  { %1812 = vmatprep.mubr.f32.mxu1 %v1432_v62  ;;  %v1353_v62 = vunpack.c.l.bf16 %v1248_v56  ;;  %v1358_v21 = vunpack.c.h.bf16 %v1250_v60 }
 0x444   :  { %1813 = vmatmul.mubr.f32.gmra.mrb[84].mxu1 %v1431_v51  ;;  %v1252_v51 = vld [vmem:[%s6797_s2 + $0xe8] sm:$0xff] }
 0x445   :  { %1817 = vmatprep.mubr.f32.mxu1 %v1436_v0  ;;  %v1357_v0 = vunpack.c.l.bf16 %v1250_v60  ;;  %v1362_v4 = vunpack.c.h.bf16 %v1252_v51 }
 0x448   :  { %1818 = vmatmul.mubr.f32.gmra.mrb[86].mxu1 %v1435_v57  ;;  %v1254_v57 = vld [vmem:[%s6797_s2 + $0xf8] sm:$0xff] }
 0x449   :  { %1822 = vmatprep.mubr.f32.mxu1 %v1440_v59  ;;  %v1361_v59 = vunpack.c.l.bf16 %v1252_v51  ;;  %v1366_v26 = vunpack.c.h.bf16 %v1254_v57 }
 0x44c   :  { %1823 = vmatmul.mubr.f32.gmra.mrb[88].mxu1 %v1439_v28  ;;  %v1256_v28 = vld [vmem:[%s6797_s2 + $0x108] sm:$0xff] }
 0x44d   :  { %1827 = vmatprep.mubr.f32.mxu1 %v1444_v17  ;;  %v1365_v17 = vunpack.c.l.bf16 %v1254_v57  ;;  %v1370_v53 = vunpack.c.h.bf16 %v1256_v28 }
 0x450   :  { %1828 = vmatmul.mubr.f32.gmra.mrb[90].mxu1 %v1443_v29  ;;  %v1258_v29 = vld [vmem:[%s6797_s2 + $0x118] sm:$0xff] }
 0x451   :  { %1832 = vmatprep.mubr.f32.mxu1 %v1448_v18  ;;  %v1369_v18 = vunpack.c.l.bf16 %v1256_v28  ;;  %v1374_v31 = vunpack.c.h.bf16 %v1258_v29 }
 0x454   :  { %1833 = vmatmul.mubr.f32.gmra.mrb[92].mxu1 %v1447_v1  ;;  %v1260_v1 = vld [vmem:[%s6797_s2 + $0x128] sm:$0xff] }
 0x455   :  { %1837 = vmatprep.mubr.f32.mxu1 %v1452_v41  ;;  %v1373_v41 = vunpack.c.l.bf16 %v1258_v29  ;;  %v1378_v48 = vunpack.c.h.bf16 %v1260_v1 }
 0x458   :  { %1838 = vmatmul.mubr.f32.gmra.mrb[94].mxu1 %v1451_v50  ;;  %v1262_v50 = vld [vmem:[%s6797_s2 + $0x138] sm:$0xff] }
 0x459   :  { %1842 = vmatprep.mubr.f32.mxu1 %v1456_v49  ;;  %v1377_v49 = vunpack.c.l.bf16 %v1260_v1  ;;  %v1382_v14 = vunpack.c.h.bf16 %v1262_v50 }
 0x45c   :  { %1843 = vmatmul.mubr.f32.gmra.mrb[96].mxu1 %v1455_v2  ;;  %v1264_v2 = vld [vmem:[%s6797_s2 + $0x148] sm:$0xff] }
 0x45d   :  { %1847 = vmatprep.mubr.f32.mxu1 %v1460_v11  ;;  %v1381_v11 = vunpack.c.l.bf16 %v1262_v50  ;;  %v1386_v30 = vunpack.c.h.bf16 %v1264_v2 }
 0x460   :  { %1848 = vmatmul.mubr.f32.gmra.mrb[98].mxu1 %v1459_v32  ;;  %v1266_v32 = vld [vmem:[%s6797_s2 + $0x158] sm:$0xff] }
 0x461   :  { %3861 = vmatprep.mubr.msk.f32.mxu1 %vm1463_vm9, %v1306_v35  ;;  %v1385_v35 = vunpack.c.l.bf16 %v1264_v2  ;;  %v1390_v43 = vunpack.c.h.bf16 %v1266_v32  ;;  %v2139_v2 = vld [vmem:[%s6799_s4 + $0x8] sm:$0x7] }
 0x464   :  { %1918 = vmatmul.mubr.f32.vlgmr.msra.gmra.mrb[20].mxu1 %v1305_v44  ;;  %v1268_v44 = vld [vmem:[%s6797_s2 + $0x168] sm:$0xff] }
 0x465   :  { %3862 = vmatprep.mubr.msk.f32.mxu1 %vm1463_vm9, %v1310_v8  ;;  %v1389_v8 = vunpack.c.l.bf16 %v1266_v32  ;;  %v1394_v55 = vunpack.c.h.bf16 %v1268_v44 }
 0x468   :  { %1923 = vmatmul.mubr.f32.gmra.mrb[22].mxu1 %v1309_v9  ;;  %v1270_v9 = vld [vmem:[%s6797_s2 + $0x178] sm:$0xff] }
 0x469   :  { %3863 = vmatprep.mubr.msk.f32.mxu1 %vm1463_vm9, %v1314_v20  ;;  %v1393_v20 = vunpack.c.l.bf16 %v1268_v44  ;;  %v1398_v6 = vunpack.c.h.bf16 %v1270_v9 }
 0x46c   :  { %1928 = vmatmul.mubr.f32.gmra.mrb[24].mxu1 %v1313_v22  ;;  %v1272_v22 = vld [vmem:[%s6797_s2 + $0x188] sm:$0xff] }
 0x46d   :  { %3864 = vmatprep.mubr.msk.f32.mxu1 %vm1463_vm9, %v1318_v25  ;;  %v1397_v25 = vunpack.c.l.bf16 %v1270_v9  ;;  %v1402_v27 = vunpack.c.h.bf16 %v1272_v22 }
 0x470   :  { %1933 = vmatmul.mubr.f32.gmra.mrb[26].mxu1 %v1317_v61  ;;  %v1274_v61 = vld [vmem:[%s6797_s2 + $0x198] sm:$0xff] }
 0x471   :  { %3865 = vmatprep.mubr.msk.f32.mxu1 %vm1463_vm9, %v1322_v33  ;;  %v1401_v33 = vunpack.c.l.bf16 %v1272_v22  ;;  %v1406_v63 = vunpack.c.h.bf16 %v1274_v61 }
 0x474   :  { %1938 = vmatmul.mubr.f32.gmra.mrb[28].mxu1 %v1321_v34  ;;  %v1276_v34 = vld [vmem:[%s6797_s2 + $0x1a8] sm:$0xff] }
 0x475   :  { %3866 = vmatprep.mubr.msk.f32.mxu1 %vm1463_vm9, %v1326_v36  ;;  %v1405_v36 = vunpack.c.l.bf16 %v1274_v61  ;;  %v1410_v15 = vunpack.c.h.bf16 %v1276_v34 }
 0x478   :  { %1943 = vmatmul.mubr.f32.gmra.mrb[30].mxu1 %v1325_v38  ;;  %v1278_v38 = vld [vmem:[%s6797_s2 + $0x1b8] sm:$0xff] }
 0x479   :  { %3867 = vmatprep.mubr.msk.f32.mxu1 %vm1463_vm9, %v1330_v16  ;;  %v1409_v16 = vunpack.c.l.bf16 %v1276_v34  ;;  %v1414_v39 = vunpack.c.h.bf16 %v1278_v38 }
 0x47c   :  { %1948 = vmatmul.mubr.f32.gmra.mrb[32].mxu1 %v1329_v40  ;;  %v1280_v40 = vld [vmem:[%s6797_s2 + $0x1c8] sm:$0xff] }
 0x47d   :  { %3868 = vmatprep.mubr.msk.f32.mxu1 %vm1463_vm9, %v1334_v3  ;;  %v1413_v3 = vunpack.c.l.bf16 %v1278_v38  ;;  %v1418_v42 = vunpack.c.h.bf16 %v1280_v40 }
 0x480   :  { %1953 = vmatmul.mubr.f32.gmra.mrb[34].mxu1 %v1333_v45  ;;  %v1282_v45 = vld [vmem:[%s6797_s2 + $0x1d8] sm:$0xff] }
 0x481   :  { %3869 = vmatprep.mubr.msk.f32.mxu1 %vm1463_vm9, %v1338_v23  ;;  %v1417_v23 = vunpack.c.l.bf16 %v1280_v40  ;;  %v1422_v12 = vunpack.c.h.bf16 %v1282_v45 }
 0x484   :  { %1958 = vmatmul.mubr.f32.gmra.mrb[36].mxu1 %v1337_v24  ;;  %v1284_v24 = vld [vmem:[%s6797_s2 + $0x1e8] sm:$0xff] }
 0x485   :  { %3870 = vmatprep.mubr.msk.f32.mxu1 %vm1463_vm9, %v1342_v5  ;;  %v1421_v5 = vunpack.c.l.bf16 %v1282_v45  ;;  %v1426_v46 = vunpack.c.h.bf16 %v1284_v24 }
 0x488   :  { %1963 = vmatmul.mubr.f32.gmra.mrb[38].mxu1 %v1341_v47  ;;  %v1286_v47 = vld [vmem:[%s6797_s2 + $0x1f8] sm:$0xff] }
 0x489   :  { %3871 = vmatprep.mubr.msk.f32.mxu1 %vm1463_vm9, %v1346_v19  ;;  %v1425_v19 = vunpack.c.l.bf16 %v1284_v24  ;;  %v1430_v13 = vunpack.c.h.bf16 %v1286_v47 }
 0x48c   :  { %1968 = vmatmul.mubr.f32.gmra.mrb[40].mxu1 %v1345_v52  ;;  %v1288_v52 = vld [vmem:[%s6797_s2 + $0x208] sm:$0xff] }
 0x48d   :  { %3872 = vmatprep.mubr.msk.f32.mxu1 %vm1463_vm9, %v1350_v54  ;;  %v1429_v54 = vunpack.c.l.bf16 %v1286_v47  ;;  %v1434_v56 = vunpack.c.h.bf16 %v1288_v52 }
 0x490   :  { %1973 = vmatmul.mubr.f32.gmra.mrb[42].mxu1 %v1349_v10  ;;  %v1290_v10 = vld [vmem:[%s6797_s2 + $0x218] sm:$0xff] }
 0x491   :  { %3873 = vmatprep.mubr.msk.f32.mxu1 %vm1463_vm9, %v1354_v58  ;;  %v1433_v58 = vunpack.c.l.bf16 %v1288_v52  ;;  %v1438_v60 = vunpack.c.h.bf16 %v1290_v10 }
 0x494   :  { %1978 = vmatmul.mubr.f32.gmra.mrb[44].mxu1 %v1353_v62  ;;  %v1292_v62 = vld [vmem:[%s6797_s2 + $0x228] sm:$0xff] }
 0x495   :  { %3874 = vmatprep.mubr.msk.f32.mxu1 %vm1463_vm9, %v1358_v21  ;;  %v1437_v21 = vunpack.c.l.bf16 %v1290_v10  ;;  %v1442_v51 = vunpack.c.h.bf16 %v1292_v62 }
 0x498   :  { %1983 = vmatmul.mubr.f32.gmra.mrb[46].mxu1 %v1357_v0  ;;  %v1294_v0 = vld [vmem:[%s6797_s2 + $0x238] sm:$0xff] }
 0x499   :  { %3875 = vmatprep.mubr.msk.f32.mxu1 %vm1463_vm9, %v1362_v4  ;;  %v1441_v4 = vunpack.c.l.bf16 %v1292_v62  ;;  %v1446_v57 = vunpack.c.h.bf16 %v1294_v0 }
 0x49c   :  { %1988 = vmatmul.mubr.f32.gmra.mrb[48].mxu1 %v1361_v59  ;;  %v1296_v59 = vld [vmem:[%s6797_s2 + $0x248] sm:$0xff] }
 0x49d   :  { %3876 = vmatprep.mubr.msk.f32.mxu1 %vm1463_vm9, %v1366_v26  ;;  %v1445_v26 = vunpack.c.l.bf16 %v1294_v0  ;;  %v1450_v28 = vunpack.c.h.bf16 %v1296_v59 }
 0x4a0   :  { %1993 = vmatmul.mubr.f32.gmra.mrb[50].mxu1 %v1365_v17  ;;  %v1298_v17 = vld [vmem:[%s6797_s2 + $0x258] sm:$0xff] }
 0x4a1   :  { %3877 = vmatprep.mubr.msk.f32.mxu1 %vm1463_vm9, %v1370_v53  ;;  %v1449_v53 = vunpack.c.l.bf16 %v1296_v59  ;;  %v1454_v29 = vunpack.c.h.bf16 %v1298_v17 }
 0x4a4   :  { %1998 = vmatmul.mubr.f32.gmra.mrb[52].mxu1 %v1369_v18  ;;  %v1300_v18 = vld [vmem:[%s6797_s2 + $0x268] sm:$0xff] }
 0x4a5   :  { %3878 = vmatprep.mubr.msk.f32.mxu1 %vm1463_vm9, %v1374_v31  ;;  %v1453_v31 = vunpack.c.l.bf16 %v1298_v17  ;;  %v1458_v1 = vunpack.c.h.bf16 %v1300_v18 }
 0x4a8   :  { %2003 = vmatmul.mubr.f32.gmra.mrb[54].mxu1 %v1373_v41  ;;  %v1302_v41 = vld [vmem:[%s6797_s2 + $0x278] sm:$0xff]  ;;  %s5178_s2 = smov 123  }
 0x4a9   :  { %3879 = vmatprep.mubr.msk.f32.mxu1 %vm1463_vm9, %v1378_v48  ;;  %v1457_v48 = vunpack.c.l.bf16 %v1300_v18  ;;  %v1462_v50 = vunpack.c.h.bf16 %v1302_v41 }
 0x4ac   :  { %2008 = vmatmul.mubr.f32.gmra.mrb[56].mxu1 %v1377_v49  ;;  %v1461_v49 = vunpack.c.l.bf16 %v1302_v41 }
 0x4ad   :  { %3880 = vmatprep.mubr.msk.f32.mxu1 %vm1463_vm9, %v1382_v14  ;;  %v2138_v14 = vld [vmem:[%s6799_s4] sm:$0xff]  ;;  %s5179_s4 = smov 1  }
 0x4b0   :  { %2013 = vmatmul.mubr.f32.gmra.mrb[58].mxu1 %v1381_v11  ;;  %v4404_v11 = vpack.c.bf16 %v2139_v2, %v2138_v14 }
 0x4b1   :  { %3881 = vmatprep.mubr.msk.f32.mxu1 %vm1463_vm9, %v1386_v30 }
 0x4b2   :  { %4406 = vmatprep.subr.msk.bf16.mxu0 %vm4405_vm11, %v4404_v11 }
 0x4b3   :  { %4409 = vmatpush3.bf16.msk.msra.mxu0 %vm4405_vm11, %v4404_v11 }
 0x4b4   :  { %2018 = vmatmul.mubr.f32.gmra.mrb[60].mxu1 %v1385_v35 }
 0x4b5   :  { %3882 = vmatprep.mubr.msk.f32.mxu1 %vm1463_vm9, %v1390_v43 }
 0x4b8   :  { %2023 = vmatmul.mubr.f32.gmra.mrb[62].mxu1 %v1389_v8 }
 0x4b9   :  { %3883 = vmatprep.mubr.msk.f32.mxu1 %vm1463_vm9, %v1394_v55 }
 0x4bc   :  { %2028 = vmatmul.mubr.f32.gmra.mrb[64].mxu1 %v1393_v20 }
 0x4bd   :  { %3884 = vmatprep.mubr.msk.f32.mxu1 %vm1463_vm9, %v1398_v6 }
 0x4c0   :  { %2033 = vmatmul.mubr.f32.gmra.mrb[66].mxu1 %v1397_v25 }
 0x4c1   :  { %3885 = vmatprep.mubr.msk.f32.mxu1 %vm1463_vm9, %v1402_v27 }
 0x4c4   :  { %2038 = vmatmul.mubr.f32.gmra.mrb[68].mxu1 %v1401_v33 }
 0x4c5   :  { %3886 = vmatprep.mubr.msk.f32.mxu1 %vm1463_vm9, %v1406_v63 }
 0x4c8   :  { %2043 = vmatmul.mubr.f32.gmra.mrb[70].mxu1 %v1405_v36 }
 0x4c9   :  { %3887 = vmatprep.mubr.msk.f32.mxu1 %vm1463_vm9, %v1410_v15 }
 0x4cc   :  { %2048 = vmatmul.mubr.f32.gmra.mrb[72].mxu1 %v1409_v16 }
 0x4cd   :  { %3888 = vmatprep.mubr.msk.f32.mxu1 %vm1463_vm9, %v1414_v39 }
 0x4d0   :  { %2053 = vmatmul.mubr.f32.gmra.mrb[74].mxu1 %v1413_v3 }
 0x4d1   :  { %3889 = vmatprep.mubr.msk.f32.mxu1 %vm1463_vm9, %v1418_v42 }
 0x4d4   :  { %2058 = vmatmul.mubr.f32.gmra.mrb[76].mxu1 %v1417_v23 }
 0x4d5   :  { %3890 = vmatprep.mubr.msk.f32.mxu1 %vm1463_vm9, %v1422_v12 }
 0x4d8   :  { %2063 = vmatmul.mubr.f32.gmra.mrb[78].mxu1 %v1421_v5 }
 0x4d9   :  { %3891 = vmatprep.mubr.msk.f32.mxu1 %vm1463_vm9, %v1426_v46 }
 0x4dc   :  { %2068 = vmatmul.mubr.f32.gmra.mrb[80].mxu1 %v1425_v19 }
 0x4dd   :  { %3892 = vmatprep.mubr.msk.f32.mxu1 %vm1463_vm9, %v1430_v13 }
 0x4e0   :  { %2073 = vmatmul.mubr.f32.gmra.mrb[82].mxu1 %v1429_v54 }
 0x4e1   :  { %3893 = vmatprep.mubr.msk.f32.mxu1 %vm1463_vm9, %v1434_v56 }
 0x4e4   :  { %2078 = vmatmul.mubr.f32.gmra.mrb[84].mxu1 %v1433_v58 }
 0x4e5   :  { %3894 = vmatprep.mubr.msk.f32.mxu1 %vm1463_vm9, %v1438_v60 }
 0x4e8   :  { %2083 = vmatmul.mubr.f32.gmra.mrb[86].mxu1 %v1437_v21 }
 0x4e9   :  { %3895 = vmatprep.mubr.msk.f32.mxu1 %vm1463_vm9, %v1442_v51 }
 0x4ec   :  { %2088 = vmatmul.mubr.f32.gmra.mrb[88].mxu1 %v1441_v4 }
 0x4ed   :  { %3896 = vmatprep.mubr.msk.f32.mxu1 %vm1463_vm9, %v1446_v57 }
 0x4f0   :  { %2093 = vmatmul.mubr.f32.gmra.mrb[90].mxu1 %v1445_v26 }
 0x4f1   :  { %3897 = vmatprep.mubr.msk.f32.mxu1 %vm1463_vm9, %v1450_v28 }
 0x4f4   :  { %2098 = vmatmul.mubr.f32.gmra.mrb[92].mxu1 %v1449_v53 }
 0x4f5   :  { %3898 = vmatprep.mubr.msk.f32.mxu1 %vm1463_vm9, %v1454_v29 }
 0x4f8   :  { %2103 = vmatmul.mubr.f32.gmra.mrb[94].mxu1 %v1453_v31 }
 0x4f9   :  { %3899 = vmatprep.mubr.msk.f32.mxu1 %vm1463_vm9, %v1458_v1 }
 0x4fc   :  { %2108 = vmatmul.mubr.f32.gmra.mrb[96].mxu1 %v1457_v48 }
 0x4fd   :  { %3900 = vmatprep.mubr.msk.f32.mxu1 %vm1463_vm9, %v1462_v50 }
 0x500   :  { %2113 = vmatmul.mubr.f32.gmra.mrb[98].mxu1 %v1461_v49 }
 0x537   :  { %v1919_v30 = vpop.f32.mrb[20].mxu1 }
 0x538   :  { %v1921_v32 = vpop.f32.mrb[21].mxu1 }
 0x53b   :  { %v1924_v35 = vpop.f32.mrb[22].mxu1 }
 0x53c   :  { %v1926_v43 = vpop.f32.mrb[23].mxu1 }
 0x53f   :  { %v1929_v44 = vpop.f32.mrb[24].mxu1 }
 0x540   :  { %v1931_v8 = vpop.f32.mrb[25].mxu1 }
 0x543   :  { %v1934_v55 = vpop.f32.mrb[26].mxu1 }
 0x544   :  { %v1936_v9 = vpop.f32.mrb[27].mxu1 }
 0x547   :  { %v1939_v20 = vpop.f32.mrb[28].mxu1 }
 0x548   :  { %v1941_v6 = vpop.f32.mrb[29].mxu1 }
 0x54b   :  { %v1944_v22 = vpop.f32.mrb[30].mxu1 }
 0x54c   :  { %v1946_v25 = vpop.f32.mrb[31].mxu1 }
 0x54f   :  { %v1949_v27 = vpop.f32.mrb[32].mxu1 }
 0x550   :  { %v1951_v61 = vpop.f32.mrb[33].mxu1 }
 0x553   :  { %v1954_v33 = vpop.f32.mrb[34].mxu1 }
 0x554   :  { %v1956_v63 = vpop.f32.mrb[35].mxu1 }
 0x557   :  { %v1959_v34 = vpop.f32.mrb[36].mxu1 }
 0x558   :  { %v1961_v36 = vpop.f32.mrb[37].mxu1 }
 0x55b   :  { %v6059_v15 = vpop.f32.mrb[38].mxu1 }
 0x55c   :  { %v1966_v38 = vpop.f32.mrb[39].mxu1 }
 0x55f   :  { %v6061_v16 = vpop.f32.mrb[40].mxu1 }
 0x560   :  { %v1971_v39 = vpop.f32.mrb[41].mxu1 }
 0x563   :  { %v6063_v40 = vpop.f32.mrb[42].mxu1 }
 0x564   :  { %v1976_v3 = vpop.f32.mrb[43].mxu1 }
 0x567   :  { %v6065_v42 = vpop.f32.mrb[44].mxu1 }
 0x568   :  { %v1981_v45 = vpop.f32.mrb[45].mxu1 }
 0x56b   :  { %v6067_v23 = vpop.f32.mrb[46].mxu1 }
 0x56c   :  { %v1986_v12 = vpop.f32.mrb[47].mxu1 }
 0x56f   :  { %v6069_v24 = vpop.f32.mrb[48].mxu1 }
 0x570   :  { %v1991_v5 = vpop.f32.mrb[49].mxu1 }
 0x573   :  { %v6071_v46 = vpop.f32.mrb[50].mxu1 }
 0x574   :  { %v1996_v47 = vpop.f32.mrb[51].mxu1 }
 0x577   :  { %v6073_v19 = vpop.f32.mrb[52].mxu1 }
 0x578   :  { %v2001_v13 = vpop.f32.mrb[53].mxu1 }
 0x57b   :  { %v6075_v52 = vpop.f32.mrb[54].mxu1 }
 0x57c   :  { %v2006_v54 = vpop.f32.mrb[55].mxu1 }
 0x57f   :  { %v6077_v56 = vpop.f32.mrb[56].mxu1 }
 0x580   :  { %v2011_v10 = vpop.f32.mrb[57].mxu1 }
 0x583   :  { %v6079_v58 = vpop.f32.mrb[58].mxu1 }
 0x584   :  { %v2016_v60 = vpop.f32.mrb[59].mxu1 }
 0x587   :  { %v2019_v62 = vpop.f32.mrb[60].mxu1 }
 0x588   :  { %v2118_v21 = vmax.f32 %v1919_v30, %v2019_v62  ;;  %v2021_v51 = vpop.f32.mrb[61].mxu1 }
 0x58a   :  { %4155 = vmatprep.mubr.msk.f32.mxu0 %vm2140_vm12, %v2118_v21 }
 0x58b   :  { %v2024_v0 = vpop.f32.mrb[62].mxu1 }
 0x58c   :  { %v2119_v4 = vmax.f32 %v1924_v35, %v2024_v0  ;;  %v2026_v57 = vpop.f32.mrb[63].mxu1 }
 0x58e   :  { %4156 = vmatmul.mubr.msk.f32.vlgmr.msra.gmra.mrb[78].mxu0 %vm2140_vm12, %v2119_v4 }
 0x58f   :  { %v2029_v59 = vpop.f32.mrb[64].mxu1 }
 0x590   :  { %v2120_v26 = vmax.f32 %v1929_v44, %v2029_v59  ;;  %v2031_v28 = vpop.f32.mrb[65].mxu1 }
 0x592   :  { %4158 = vmatprep.mubr.msk.f32.mxu0 %vm2140_vm12, %v2120_v26 }
 0x593   :  { %v2034_v17 = vpop.f32.mrb[66].mxu1 }
 0x594   :  { %v2121_v53 = vmax.f32 %v1934_v55, %v2034_v17  ;;  %v2036_v29 = vpop.f32.mrb[67].mxu1 }
 0x596   :  { %4159 = vmatmul.mubr.msk.f32.gmra.mrb[80].mxu0 %vm2140_vm12, %v2121_v53 }
 0x597   :  { %v2039_v18 = vpop.f32.mrb[68].mxu1 }
 0x598   :  { %v2122_v31 = vmax.f32 %v1939_v20, %v2039_v18  ;;  %v2041_v1 = vpop.f32.mrb[69].mxu1 }
 0x59a   :  { %4161 = vmatprep.mubr.msk.f32.mxu0 %vm2140_vm12, %v2122_v31 }
 0x59b   :  { %v2044_v41 = vpop.f32.mrb[70].mxu1 }
 0x59c   :  { %v2123_v48 = vmax.f32 %v1944_v22, %v2044_v41  ;;  %v2046_v50 = vpop.f32.mrb[71].mxu1 }
 0x59e   :  { %4162 = vmatmul.mubr.msk.f32.gmra.mrb[82].mxu0 %vm2140_vm12, %v2123_v48 }
 0x59f   :  { %v2049_v49 = vpop.f32.mrb[72].mxu1 }
 0x5a0   :  { %v2124_v14 = vmax.f32 %v1949_v27, %v2049_v49  ;;  %v2051_v2 = vpop.f32.mrb[73].mxu1 }
 0x5a2   :  { %4164 = vmatprep.mubr.msk.f32.mxu0 %vm2140_vm12, %v2124_v14 }
 0x5a3   :  { %v2054_v11 = vpop.f32.mrb[74].mxu1 }
 0x5a4   :  { %v2125_v30 = vmax.f32 %v1954_v33, %v2054_v11  ;;  %v2056_v32 = vpop.f32.mrb[75].mxu1 }
 0x5a6   :  { %4165 = vmatmul.mubr.msk.f32.gmra.mrb[84].mxu0 %vm2140_vm12, %v2125_v30 }
 0x5a7   :  { %v2059_v35 = vpop.f32.mrb[76].mxu1 }
 0x5a8   :  { %v2126_v43 = vmax.f32 %v1959_v34, %v2059_v35  ;;  %v2061_v44 = vpop.f32.mrb[77].mxu1 }
 0x5aa   :  { %4167 = vmatprep.mubr.msk.f32.mxu0 %vm2140_vm12, %v2126_v43 }
 0x5ab   :  { %v2064_v8 = vpop.f32.mrb[78].mxu1 }
 0x5ac   :  { %v2127_v55 = vmax.f32 %v6059_v15, %v2064_v8  ;;  %v2066_v9 = vpop.f32.mrb[79].mxu1 }
 0x5ae   :  { %4168 = vmatmul.mubr.msk.f32.gmra.mrb[86].mxu0 %vm2140_vm12, %v2127_v55 }
 0x5af   :  { %v2069_v20 = vpop.f32.mrb[80].mxu1 }
 0x5b0   :  { %v2128_v6 = vmax.f32 %v6061_v16, %v2069_v20  ;;  %v2071_v22 = vpop.f32.mrb[81].mxu1 }
 0x5b2   :  { %4170 = vmatprep.mubr.msk.f32.mxu0 %vm2140_vm12, %v2128_v6 }
 0x5b3   :  { %v2074_v25 = vpop.f32.mrb[82].mxu1 }
 0x5b4   :  { %v2129_v27 = vmax.f32 %v6063_v40, %v2074_v25  ;;  %v2076_v61 = vpop.f32.mrb[83].mxu1 }
 0x5b6   :  { %4171 = vmatmul.mubr.msk.f32.gmra.mrb[88].mxu0 %vm2140_vm12, %v2129_v27 }
 0x5b7   :  { %v2079_v33 = vpop.f32.mrb[84].mxu1 }
 0x5b8   :  { %v2130_v63 = vmax.f32 %v6065_v42, %v2079_v33  ;;  %v2081_v34 = vpop.f32.mrb[85].mxu1 }
 0x5ba   :  { %4173 = vmatprep.mubr.msk.f32.mxu0 %vm2140_vm12, %v2130_v63 }
 0x5bb   :  { %v2084_v36 = vpop.f32.mrb[86].mxu1 }
 0x5bc   :  { %v2131_v15 = vmax.f32 %v6067_v23, %v2084_v36  ;;  %v2086_v38 = vpop.f32.mrb[87].mxu1 }
 0x5be   :  { %4174 = vmatmul.mubr.msk.f32.gmra.mrb[90].mxu0 %vm2140_vm12, %v2131_v15 }
 0x5bf   :  { %v2089_v16 = vpop.f32.mrb[88].mxu1 }
 0x5c0   :  { %v2132_v39 = vmax.f32 %v6069_v24, %v2089_v16  ;;  %v2091_v3 = vpop.f32.mrb[89].mxu1 }
 0x5c2   :  { %4176 = vmatprep.mubr.msk.f32.mxu0 %vm2140_vm12, %v2132_v39 }
 0x5c3   :  { %v2094_v40 = vpop.f32.mrb[90].mxu1 }
 0x5c4   :  { %v2133_v45 = vmax.f32 %v6071_v46, %v2094_v40  ;;  %v2096_v12 = vpop.f32.mrb[91].mxu1 }
 0x5c6   :  { %4177 = vmatmul.mubr.msk.f32.gmra.mrb[92].mxu0 %vm2140_vm12, %v2133_v45 }
 0x5c7   :  { %v2099_v42 = vpop.f32.mrb[92].mxu1 }
 0x5c8   :  { %v2134_v5 = vmax.f32 %v6073_v19, %v2099_v42  ;;  %v2101_v47 = vpop.f32.mrb[93].mxu1 }
 0x5ca   :  { %4179 = vmatprep.mubr.msk.f32.mxu0 %vm2140_vm12, %v2134_v5 }
 0x5cb   :  { %v2104_v23 = vpop.f32.mrb[94].mxu1 }
 0x5cc   :  { %v2135_v13 = vmax.f32 %v6075_v52, %v2104_v23  ;;  %v2106_v54 = vpop.f32.mrb[95].mxu1 }
 0x5ce   :  { %4180 = vmatmul.mubr.msk.f32.gmra.mrb[94].mxu0 %vm2140_vm12, %v2135_v13 }
 0x5cf   :  { %v2109_v24 = vpop.f32.mrb[96].mxu1 }
 0x5d0   :  { %v2136_v10 = vmax.f32 %v6077_v56, %v2109_v24  ;;  %v2111_v60 = vpop.f32.mrb[97].mxu1 }
 0x5d2   :  { %4182 = vmatprep.mubr.msk.f32.mxu0 %vm2140_vm12, %v2136_v10 }
 0x5d3   :  { %v2114_v46 = vpop.f32.mrb[98].mxu1 }
 0x5d4   :  { %v2137_v62 = vmax.f32 %v6079_v58, %v2114_v46  ;;  %v2116_v21 = vpop.f32.mrb[99].mxu1 }
 0x5d6   :  { %4183 = vmatmul.mubr.msk.f32.gmra.mrb[96].mxu0 %vm2140_vm12, %v2137_v62 }
 0x661   :  { %v6112_v19 = vpop.f32.mrb[78].mxu0 }
 0x662   :  { %v6114_v51 = vpop.f32.mrb[79].mxu0 }
 0x663   :  { %v4801_v52 = vpack.i.bf16 %v6112_v19, %v6114_v51 }
 0x669   :  { %v6118_v0 = vpop.f32.mrb[80].mxu0 }
 0x66a   :  { %v6120_v4 = vpop.f32.mrb[81].mxu0 }
 0x66b   :  { %v4806_v56 = vpack.i.bf16 %v6118_v0, %v6120_v4 }
 0x671   :  { %v6124_v57 = vpop.f32.mrb[82].mxu0 }
 0x672   :  { %v6126_v58 = vpop.f32.mrb[83].mxu0 }
 0x673   :  { %v4811_v59 = vpack.i.bf16 %v6124_v57, %v6126_v58 }
 0x679   :  { %v6130_v26 = vpop.f32.mrb[84].mxu0 }
 0x67a   :  { %v6132_v28 = vpop.f32.mrb[85].mxu0 }
 0x67b   :  { %v4791_v17 = vpack.i.bf16 %v6130_v26, %v6132_v28 }
 0x681   :  { %v6136_v53 = vpop.f32.mrb[86].mxu0 }
 0x682   :  { %v6138_v29 = vpop.f32.mrb[87].mxu0 }
 0x683   :  { %v4796_v18 = vpack.i.bf16 %v6136_v53, %v6138_v29 }
 0x689   :  { %v4172_v31 = vpop.f32.mrb[88].mxu0 }
 0x68a   :  { %v2321_v1 = vpop.f32.mrb[89].mxu0 }
 0x68b   :  { %v4776_v41 = vpack.i.bf16 %v4172_v31, %v2321_v1 }
 0x691   :  { %v4175_v48 = vpop.f32.mrb[90].mxu0 }
 0x692   :  { %v2331_v50 = vpop.f32.mrb[91].mxu0 }
 0x693   :  { %v4781_v49 = vpack.i.bf16 %v4175_v48, %v2331_v50 }
 0x699   :  { %v4178_v14 = vpop.f32.mrb[92].mxu0 }
 0x69a   :  { %v2341_v2 = vpop.f32.mrb[93].mxu0 }
 0x69b   :  { %v4786_v11 = vpack.i.bf16 %v4178_v14, %v2341_v2 }
 0x6a1   :  { %v4181_v30 = vpop.f32.mrb[94].mxu0 }
 0x6a2   :  { %v2351_v32 = vpop.f32.mrb[95].mxu0 }
 0x6a3   :  { %v4766_v35 = vpack.i.bf16 %v4181_v30, %v2351_v32 }
 0x6a5   :  { %4767 = vrot.lane.b32.xlu0 %v4766_v35, %s5178_s2 }
 0x6a9   :  { %4777 = vrot.lane.b32.xlu0 %v4776_v41, %s5178_s2  ;;  %v4184_v43 = vpop.f32.mrb[96].mxu0 }
 0x6aa   :  { %v2361_v44 = vpop.f32.mrb[97].mxu0 }
 0x6ab   :  { %v4771_v8 = vpack.i.bf16 %v4184_v43, %v2361_v44 }
 0x6ad   :  { %4787 = vrot.lane.b32.xlu0 %v4786_v11, %s5178_s2  ;;  %4772 = vrot.lane.b32.xlu1 %v4771_v8, %s5178_s2 }
 0x6b1   :  { %4797 = vrot.lane.b32.xlu0 %v4796_v18, %s5178_s2  ;;  %4782 = vrot.lane.b32.xlu1 %v4781_v49, %s5178_s2 }
 0x6b5   :  { %4802 = vrot.lane.b32.xlu0 %v4801_v52, %s5178_s2  ;;  %4792 = vrot.lane.b32.xlu1 %v4791_v17, %s5178_s2 }
 0x6b9   :  { %4807 = vrot.lane.b32.xlu0 %v4806_v56, %s5178_s2 }
 0x6bd   :  { %4812 = vrot.lane.b32.xlu0 %v4811_v59, %s5178_s2 }
 0x717   :  { %v4768_v55 = vpop.permute.xlu0 %4767 }
 0x718   :  { %v4770_v9 = vunpack.i.h.bf16 %v4768_v55  ;;  %v4769_v20 = vunpack.i.l.bf16 %v4768_v55 }
 0x71a   :  { %v2467_v6 = vmax.f32 %v4181_v30, %v4770_v9  ;;  %v2466_v22 = vmax.f32 %v2351_v32, %v4769_v20 }
 0x71b   :  { %v4778_v25 = vpop.permute.xlu0 %4777 }
 0x71c   :  { %v2487_v27 = vmax.f32 %v2467_v6, 0.0  ;;  %v2486_v61 = vmax.f32 %v2466_v22, 0.0  ;;  %v4780_v33 = vunpack.i.h.bf16 %v4778_v25  ;;  %v4779_v63 = vunpack.i.l.bf16 %v4778_v25 }
 0x71e   :  { %v2461_v34 = vmax.f32 %v4172_v31, %v4780_v33  ;;  %v2460_v36 = vmax.f32 %v2321_v1, %v4779_v63  ;;  %v6142_v15 = vpack.i.bf16 %v2487_v27, %v2486_v61 }
 0x71f   :  { %v4788_v38 = vpop.permute.xlu0 %4787  ;;  %v4773_v16 = vpop.permute.xlu1 %4772 }
 0x720   :  { %v2481_v39 = vmax.f32 %v2461_v34, 0.0  ;;  %v2480_v3 = vmax.f32 %v2460_v36, 0.0  ;;  %v4790_v40 = vunpack.i.h.bf16 %v4788_v38  ;;  %v4789_v45 = vunpack.i.l.bf16 %v4788_v38 }
 0x721   :  { %v4775_v12 = vunpack.i.h.bf16 %v4773_v16  ;;  %v4774_v42 = vunpack.i.l.bf16 %v4773_v16 }
 0x722   :  { %v2465_v5 = vmax.f32 %v4178_v14, %v4790_v40  ;;  %v2464_v47 = vmax.f32 %v2341_v2, %v4789_v45  ;;  %v6144_v23 = vpack.i.bf16 %v2481_v39, %v2480_v3 }
 0x723   :  { %v2469_v13 = vmax.f32 %v4184_v43, %v4775_v12  ;;  %v2468_v54 = vmax.f32 %v2361_v44, %v4774_v42  ;;  %v4783_v24 = vpop.permute.xlu1 %4782 }
 0x724   :  { %v2485_v10 = vmax.f32 %v2465_v5, 0.0  ;;  %v2484_v60 = vmax.f32 %v2464_v47, 0.0  ;;  %4817 = vrot.lane.b32.xlu1 %v6144_v23, %s5173_s24  ;;  %v4785_v21 = vunpack.i.h.bf16 %v4783_v24  ;;  %v4784_v52 = vunpack.i.l.bf16 %v4783_v24 }
 0x725   :  { %v2489_v46 = vmax.f32 %v2469_v13, 0.0  ;;  %v2488_v62 = vmax.f32 %v2468_v54, 0.0 }
 0x726   :  { %v6148_v56 = vpack.i.bf16 %v2485_v10, %v2484_v60  ;;  %v2463_v59 = vmax.f32 %v4175_v48, %v4785_v21  ;;  %v2462_v17 = vmax.f32 %v2331_v50, %v4784_v52  ;;  %v4798_v50 = vpop.permute.xlu0 %4797 }
 0x727   :  { %v4793_v18 = vpop.permute.xlu1 %4792  ;;  %v6150_v31 = vpack.i.bf16 %v2489_v46, %v2488_v62  ;;  %v4800_v30 = vunpack.i.h.bf16 %v4798_v50  ;;  %v4799_v32 = vunpack.i.l.bf16 %v4798_v50 }
 0x728   :  { %4827 = vrot.lane.b32.xlu0 %v6148_v56, %s5173_s24  ;;  %v2483_v1 = vmax.f32 %v2463_v59, 0.0  ;;  %v2482_v41 = vmax.f32 %v2462_v17, 0.0  ;;  %v4795_v49 = vunpack.i.h.bf16 %v4793_v18  ;;  %v4794_v14 = vunpack.i.l.bf16 %v4793_v18 }
 0x72a   :  { %v4821_v2 = vpack.i.bf16 %v2483_v1, %v2482_v41  ;;  %v6158_v11 = vmax.f32 %v6130_v26, %v4795_v49  ;;  %v6161_v48 = vmax.f32 %v6132_v28, %v4794_v14  ;;  %v6173_v26 = vmax.f32 %v6136_v53, %v4800_v30  ;;  %v4803_v8 = vpop.permute.xlu0 %4802 }
 0x72b   :  { %v6176_v28 = vmax.f32 %v6138_v29, %v4799_v32  ;;  %v4805_v9 = vunpack.i.h.bf16 %v4803_v8  ;;  %v4804_v29 = vunpack.i.l.bf16 %v4803_v8  ;;  %v6316_v32 = vld [vmem:[%s6800_s5] sm:$0xff] }
 0x72c   :  { %4847 = vrot.lane.b32.xlu0 %v6144_v23, %s5171_s15  ;;  %4822 = vrot.lane.b32.xlu1 %v4821_v2, %s5173_s24  ;;  %v2477_v35 = vmax.f32 %v6158_v11, 0.0  ;;  %v2476_v43 = vmax.f32 %v6161_v48, 0.0  ;;  %v2479_v55 = vmax.f32 %v6173_v26, 0.0  ;;  %v2959_v8 = vunpack.c.h.bf16 %v6316_v32 }
 0x72d   :  { %v2478_v53 = vmax.f32 %v6176_v28, 0.0  ;;  %v6195_v20 = vmax.f32 %v6112_v19, %v4805_v9  ;;  %v6198_v6 = vmax.f32 %v6114_v51, %v4804_v29 }
 0x72e   :  { %v6182_v44 = vpack.i.bf16 %v2477_v35, %v2476_v43  ;;  %v4808_v25 = vpop.permute.xlu0 %4807  ;;  %3203 = vmatprep.mubr.f32.mxu0 %v2959_v8 }
 0x72f   :  { %v6204_v22 = vpack.i.bf16 %v2479_v55, %v2478_v53  ;;  %v2471_v27 = vmax.f32 %v6195_v20, 0.0  ;;  %v2470_v19 = vmax.f32 %v6198_v6, 0.0  ;;  %v4810_v61 = vunpack.i.h.bf16 %v4808_v25 }
 0x730   :  { %4852 = vrot.lane.b32.xlu0 %v4821_v2, %s5171_s15  ;;  %4832 = vrot.lane.b32.xlu1 %v6142_v15, %s5171_s15  ;;  %v4809_v33 = vunpack.i.l.bf16 %v4808_v25 }
 0x731   :  { %v6215_v51 = vmax.f32 %v6118_v0, %v4810_v61  ;;  %v6224_v34 = vpack.i.bf16 %v2471_v27, %v2470_v19 }
 0x732   :  { %v6218_v63 = vmax.f32 %v6120_v4, %v4809_v33  ;;  %v4813_v36 = vpop.permute.xlu0 %4812 }
 0x733   :  { %v2473_v38 = vmax.f32 %v6215_v51, 0.0  ;;  %v4815_v16 = vunpack.i.h.bf16 %v4813_v36  ;;  %v4814_v4 = vunpack.i.l.bf16 %v4813_v36 }
 0x734   :  { %4862 = vrot.lane.b32.xlu0 %v6148_v56, %s5171_s15  ;;  %4837 = vrot.lane.b32.xlu1 %v6150_v31, %s5171_s15  ;;  %v2472_v0 = vmax.f32 %v6218_v63, 0.0 }
 0x735   :  { %v6237_v39 = vmax.f32 %v6124_v57, %v4815_v16  ;;  %v6240_v3 = vmax.f32 %v6126_v58, %v4814_v4 }
 0x736   :  { %v6246_v40 = vpack.i.bf16 %v2473_v38, %v2472_v0 }
 0x737   :  { %v2475_v45 = vmax.f32 %v6237_v39, 0.0  ;;  %v2474_v57 = vmax.f32 %v6240_v3, 0.0 }
 0x738   :  { %4872 = vrot.lane.b32.xlu0 %v6182_v44, %s5171_s15  ;;  %4842 = vrot.lane.b32.xlu1 %v6142_v15, %s5173_s24 }
 0x739   :  { %v6261_v58 = vpack.i.bf16 %v2475_v45, %v2474_v57 }
 0x73c   :  { %4877 = vrot.lane.b32.xlu0 %v6144_v23, %s5179_s4  ;;  %4857 = vrot.lane.b32.xlu1 %v6144_v23, %s5180_s19 }
 0x740   :  { %4887 = vrot.lane.b32.xlu0 %v6204_v22, %s5171_s15  ;;  %4867 = vrot.lane.b32.xlu1 %v4821_v2, %s5180_s19 }
 0x744   :  { %4892 = vrot.lane.b32.xlu0 %v4821_v2, %s5179_s4  ;;  %4882 = vrot.lane.b32.xlu1 %v6148_v56, %s5180_s19 }
 0x748   :  { %4907 = vrot.lane.b32.xlu0 %v6224_v34, %s5173_s24  ;;  %4897 = vrot.lane.b32.xlu1 %v6150_v31, %s5173_s24 }
 0x74c   :  { %4912 = vrot.lane.b32.xlu0 %v6148_v56, %s5179_s4  ;;  %4902 = vrot.lane.b32.xlu1 %v6142_v15, %s5180_s19 }
 0x750   :  { %4917 = vrot.lane.b32.xlu0 %v6246_v40, %s5173_s24  ;;  %4927 = vrot.lane.b32.xlu1 %v6144_v23, %s5181_s20 }
 0x754   :  { %4922 = vrot.lane.b32.xlu0 %v6142_v15, %s5179_s4  ;;  %4937 = vrot.lane.b32.xlu1 %v4821_v2, %s5181_s20 }
 0x758   :  { %4932 = vrot.lane.b32.xlu0 %v6261_v58, %s5173_s24  ;;  %4947 = vrot.lane.b32.xlu1 %v6150_v31, %s5180_s19 }
 0x75c   :  { %4942 = vrot.lane.b32.xlu0 %v6182_v44, %s5173_s24 }
 0x760   :  { %4952 = vrot.lane.b32.xlu0 %v6150_v31, %s5179_s4 }
 0x764   :  { %4987 = vrot.lane.b32.xlu0 %v6224_v34, %s5171_s15 }
 0x768   :  { %4997 = vrot.lane.b32.xlu0 %v6148_v56, %s5181_s20 }
 0x796   :  { %v4818_v12 = vpop.permute.xlu1 %4817 }
 0x797   :  { %4957 = vrot.lane.b32.xlu1 %v4818_v12, %s5179_s4 }
 0x79a   :  { %v4828_v42 = vpop.permute.xlu0 %4827 }
 0x79e   :  { %v4848_v5 = vpop.permute.xlu0 %4847  ;;  %v4823_v47 = vpop.permute.xlu1 %4822 }
 0x79f   :  { %4962 = vrot.lane.b32.xlu1 %v4823_v47, %s5179_s4 }
 0x7a2   :  { %v4853_v23 = vpop.permute.xlu0 %4852  ;;  %v4833_v13 = vpop.permute.xlu1 %4832 }
 0x7a3   :  { %5012 = vrot.lane.b32.xlu0 %v4853_v23, %s5179_s4  ;;  %4967 = vrot.lane.b32.xlu1 %v4828_v42, %s5179_s4 }
 0x7a6   :  { %v4863_v54 = vpop.permute.xlu0 %4862  ;;  %v4838_v24 = vpop.permute.xlu1 %4837 }
 0x7a7   :  { %5022 = vrot.lane.b32.xlu0 %v6224_v34, %s5180_s19  ;;  %4972 = vrot.lane.b32.xlu1 %v4833_v13, %s5179_s4 }
 0x7aa   :  { %v6279_v10 = vpop.permute.xlu0 %4872  ;;  %v4843_v60 = vpop.permute.xlu1 %4842 }
 0x7ab   :  { %4977 = vrot.lane.b32.xlu1 %v4838_v24, %s5179_s4 }
 0x7ae   :  { %v4878_v46 = vpop.permute.xlu0 %4877  ;;  %v4858_v62 = vpop.permute.xlu1 %4857 }
 0x7af   :  { %4982 = vrot.lane.b32.xlu1 %v4843_v60, %s5179_s4  ;;  %v4880_v36 = vunpack.i.h.bf16 %v4878_v46  ;;  %v4879_v16 = vunpack.i.l.bf16 %v4878_v46 }
 0x7b2   :  { %v6285_v21 = vpop.permute.xlu0 %4887  ;;  %v4868_v52 = vpop.permute.xlu1 %4867 }
 0x7b3   :  { %4992 = vrot.lane.b32.xlu1 %v4848_v5, %s5179_s4  ;;  %v4890_v20 = vunpack.i.h.bf16 %v6285_v21 }
 0x7b6   :  { %v6288_v56 = vpop.permute.xlu0 %4892  ;;  %v4883_v59 = vpop.permute.xlu1 %4882 }
 0x7b7   :  { %5002 = vrot.lane.b32.xlu1 %v6204_v22, %s5173_s24  ;;  %v4895_v12 = vunpack.i.h.bf16 %v6288_v56  ;;  %v4894_v47 = vunpack.i.l.bf16 %v6288_v56 }
 0x7ba   :  { %v6291_v17 = vpop.permute.xlu0 %4907  ;;  %v4898_v18 = vpop.permute.xlu1 %4897 }
 0x7bb   :  { %5032 = vrot.lane.b32.xlu0 %v4898_v18, %s5179_s4  ;;  %5007 = vrot.lane.b32.xlu1 %v6246_v40, %s5171_s15  ;;  %v4910_v24 = vunpack.i.h.bf16 %v6291_v17  ;;  %v2863_v18 = vsel %vm2860_vm13, %v2472_v0, %v4894_v47 }
 0x7be   :  { %v6295_v1 = vpop.permute.xlu0 %4912  ;;  %v4903_v41 = vpop.permute.xlu1 %4902 }
 0x7bf   :  { %5037 = vrot.lane.b32.xlu0 %v6261_v58, %s5171_s15  ;;  %5017 = vrot.lane.b32.xlu1 %v6142_v15, %s5181_s20 }
 0x7c2   :  { %v6300_v49 = vpop.permute.xlu0 %4917  ;;  %v4928_v14 = vpop.permute.xlu1 %4927 }
 0x7c3   :  { %5047 = vrot.lane.b32.xlu0 %v6150_v31, %s5181_s20  ;;  %5027 = vrot.lane.b32.xlu1 %v4858_v62, %s5179_s4  ;;  %v2864_v62 = vsel %vm2860_vm13, %v2473_v38, %v4895_v12  ;;  %v4920_v0 = vunpack.i.h.bf16 %v6300_v49 }
 0x7c6   :  { %v6306_v2 = vpop.permute.xlu0 %4922  ;;  %v4938_v50 = vpop.permute.xlu1 %4937 }
 0x7c7   :  { %5057 = vrot.lane.b32.xlu0 %v4868_v52, %s5179_s4  ;;  %5042 = vrot.lane.b32.xlu1 %v4863_v54, %s5179_s4  ;;  %v4915_v52 = vunpack.i.h.bf16 %v6295_v1 }
 0x7c9   :  { %v2866_v63 = vsel %vm2860_vm13, %v2475_v45, %v4915_v52 }
 0x7ca   :  { %v6311_v30 = vpop.permute.xlu0 %4932  ;;  %v4948_v31 = vpop.permute.xlu1 %4947 }
 0x7cb   :  { %5067 = vrot.lane.b32.xlu0 %v4883_v59, %s5179_s4  ;;  %5052 = vrot.lane.b32.xlu1 %v6246_v40, %s5180_s19 }
 0x7ce   :  { %v6321_v15 = vpop.permute.xlu0 %4942 }
 0x7cf   :  { %5077 = vrot.lane.b32.xlu0 %v4903_v41, %s5179_s4  ;;  %5062 = vrot.lane.b32.xlu1 %v6261_v58, %s5180_s19 }
 0x7d2   :  { %v6326_v9 = vpop.permute.xlu0 %4952 }
 0x7d3   :  { %5092 = vrot.lane.b32.xlu0 %v4948_v31, %s5179_s4  ;;  %5072 = vrot.lane.b32.xlu1 %v6182_v44, %s5180_s19  ;;  %v4955_v3 = vunpack.i.h.bf16 %v6326_v9 }
 0x7d6   :  { %v6331_v29 = vpop.permute.xlu0 %4987 }
 0x7d7   :  { %5097 = vrot.lane.b32.xlu0 %v4928_v14, %s5179_s4  ;;  %5082 = vrot.lane.b32.xlu1 %v6204_v22, %s5180_s19  ;;  %v4989_v26 = vunpack.i.l.bf16 %v6331_v29 }
 0x7da   :  { %v4998_v25 = vpop.permute.xlu0 %4997 }
 0x7db   :  { %5107 = vrot.lane.b32.xlu0 %v4938_v50, %s5179_s4  ;;  %5087 = vrot.lane.b32.xlu1 %v6224_v34, %s5181_s20  ;;  %v4875_v34 = vunpack.i.h.bf16 %v6279_v10 }
 0x7df   :  { %5117 = vrot.lane.b32.xlu0 %v4998_v25, %s5179_s4  ;;  %5102 = vrot.lane.b32.xlu1 %v6246_v40, %s5181_s20  ;;  %v2862_v40 = vsel %vm2860_vm13, %v2471_v27, %v4880_v36  ;;  %v4416_v25 = vpack.c.bf16 %v2864_v62, %v2863_v18  ;;  %v4924_v36 = vunpack.i.l.bf16 %v6306_v2 }
 0x7e1   :  { %v2867_v12 = vsel %vm2860_vm13, %v2476_v43, %v4924_v36 }
 0x7e3   :  { %5112 = vrot.lane.b32.xlu1 %v6261_v58, %s5181_s20 }
 0x7e7   :  { %5122 = vrot.lane.b32.xlu1 %v6182_v44, %s5181_s20  ;;  %v2861_v44 = vsel %vm2860_vm13, %v2470_v19, %v4879_v16  ;;  %v4889_v19 = vunpack.i.l.bf16 %v6285_v21  ;;  %v4914_v21 = vunpack.i.l.bf16 %v6295_v1  ;;  %v4919_v1 = vunpack.i.l.bf16 %v6300_v49 }
 0x7e8   :  { %v4412_v54 = vpack.c.bf16 %v2862_v40, %v2861_v44 }
 0x7eb   :  { %5132 = vrot.lane.b32.xlu1 %v6204_v22, %s5181_s20  ;;  %v4874_v22 = vunpack.i.l.bf16 %v6279_v10  ;;  %v4909_v10 = vunpack.i.l.bf16 %v6291_v17 }
 0x809   :  { %v4958_v61 = vpop.permute.xlu1 %4957 }
 0x80a   :  { %v4960_v23 = vunpack.i.h.bf16 %v4958_v61  ;;  %v4959_v13 = vunpack.i.l.bf16 %v4958_v61  ;;  %v2865_v61 = vsel %vm2860_vm13, %v2474_v57, %v4914_v21  ;;  %v4954_v57 = vunpack.i.l.bf16 %v6326_v9 }
 0x80c   :  { %v2881_v41 = vsel %vm2860_vm13, %v4909_v10, %v4959_v13  ;;  %v2882_v17 = vsel %vm2860_vm13, %v4910_v24, %v4960_v23  ;;  %v2869_v11 = vsel %vm2860_vm13, %v2478_v53, %v4954_v57 }
 0x811   :  { %v4963_v33 = vpop.permute.xlu1 %4962 }
 0x812   :  { %v4965_v14 = vunpack.i.h.bf16 %v4963_v33  ;;  %v4964_v50 = vunpack.i.l.bf16 %v4963_v33  ;;  %v4925_v33 = vunpack.i.h.bf16 %v6306_v2  ;;  %v4420_v2 = vpack.c.bf16 %v2866_v63, %v2865_v61 }
 0x814   :  { %v2883_v40 = vsel %vm2860_vm13, %v4919_v1, %v4964_v50  ;;  %v2884_v49 = vsel %vm2860_vm13, %v4920_v0, %v4965_v14 }
 0x815   :  { %v6351_v4 = vpop.permute.xlu1 %4967  ;;  %v6391_v16 = vpop.permute.xlu0 %5012 }
 0x816   :  { %v4970_v39 = vunpack.i.h.bf16 %v6351_v4  ;;  %v4969_v45 = vunpack.i.l.bf16 %v6351_v4  ;;  %v2868_v4 = vsel %vm2860_vm13, %v2477_v35, %v4925_v33  ;;  %v5015_v21 = vunpack.i.h.bf16 %v6391_v16 }
 0x819   :  { %v4973_v58 = vpop.permute.xlu1 %4972  ;;  %v5023_v35 = vpop.permute.xlu0 %5022 }
 0x81a   :  { %v4975_v42 = vunpack.i.h.bf16 %v4973_v58  ;;  %v4974_v5 = vunpack.i.l.bf16 %v4973_v58  ;;  %v4935_v58 = vunpack.i.h.bf16 %v6311_v30  ;;  %v5025_v63 = vunpack.i.h.bf16 %v5023_v35 }
 0x81b   :  { %v5024_v0 = vunpack.i.l.bf16 %v5023_v35 }
 0x81c   :  { %v2877_v27 = vsel %vm2860_vm13, %v4874_v22, %v4974_v5  ;;  %v2878_v6 = vsel %vm2860_vm13, %v4875_v34, %v4975_v42  ;;  %v4418_v34 = vpack.c.bf16 %v2882_v17, %v2881_v41  ;;  %v4934_v22 = vunpack.i.l.bf16 %v6311_v30 }
 0x81d   :  { %v4978_v60 = vpop.permute.xlu1 %4977  ;;  %v4410_v46 = vpack.c.bf16 %v2878_v6, %v2877_v27  ;;  %v4422_v42 = vpack.c.bf16 %v2884_v49, %v2883_v40  ;;  %v2886_v23 = vsel %vm2860_vm13, %v4935_v58, %v4970_v39  ;;  %v2870_v30 = vsel %vm2860_vm13, %v2479_v55, %v4955_v3 }
 0x81e   :  { %v4980_v56 = vunpack.i.h.bf16 %v4978_v60  ;;  %v4979_v59 = vunpack.i.l.bf16 %v4978_v60  ;;  %v2885_v9 = vsel %vm2860_vm13, %v4934_v22, %v4969_v45  ;;  %v4944_v27 = vunpack.i.l.bf16 %v6321_v15 }
 0x81f   :  { %4411 = vmatprep.subr.bf16.mxu0 %v4410_v46  ;;  %v4990_v6 = vunpack.i.h.bf16 %v6331_v29  ;;  %v4428_v55 = vpack.c.bf16 %v2870_v30, %v2869_v11  ;;  %v5014_v41 = vunpack.i.l.bf16 %v6391_v16 }
 0x820   :  { %4413 = vmatpush3.bf16.msra.mxu0 %v4412_v54  ;;  %v2879_v51 = vsel %vm2860_vm13, %v4889_v19, %v4979_v59  ;;  %v2880_v38 = vsel %vm2860_vm13, %v4890_v20, %v4980_v56  ;;  %v4424_v54 = vpack.c.bf16 %v2868_v4, %v2867_v12  ;;  %v4945_v20 = vunpack.i.h.bf16 %v6321_v15  ;;  %v2930_v4 = vld [vmem:[%s6800_s5 + $0x10] sm:$0xff] }
 0x821   :  { %v4983_v8 = vpop.permute.xlu1 %4982  ;;  %v4414_v31 = vpack.c.bf16 %v2880_v38, %v2879_v51  ;;  %v4426_v19 = vpack.c.bf16 %v2886_v23, %v2885_v9  ;;  %v2963_v35 = vunpack.c.h.bf16 %v2930_v4 }
 0x822   :  { %v4985_v5 = vunpack.i.h.bf16 %v4983_v8  ;;  %v4984_v47 = vunpack.i.l.bf16 %v4983_v8 }
 0x823   :  { %4415 = vmatprep.subr.bf16.mxu0 %v4414_v31 }
 0x824   :  { %4417 = vmatpush3.bf16.msra.mxu0 %v4416_v25  ;;  %v2887_v28 = vsel %vm2860_vm13, %v4944_v27, %v4984_v47  ;;  %v2888_v53 = vsel %vm2860_vm13, %v4945_v20, %v4985_v5  ;;  %v2958_v47 = vunpack.c.l.bf16 %v6316_v32  ;;  %v2962_v32 = vunpack.c.l.bf16 %v2930_v4  ;;  %v2940_v4 = vld [vmem:[%s6800_s5 + $0x60] sm:$0xff] }
 0x825   :  { %v4993_v44 = vpop.permute.xlu1 %4992  ;;  %4419 = vmatprep.subr.bf16.mxu0 %v4418_v34  ;;  %v4430_v18 = vpack.c.bf16 %v2888_v53, %v2887_v28 }
 0x826   :  { %v4995_v48 = vunpack.i.h.bf16 %v4993_v44  ;;  %v4994_v13 = vunpack.i.l.bf16 %v4993_v44 }
 0x828   :  { %4421 = vmatpush3.bf16.msra.mxu0 %v4420_v2  ;;  %v2872_v24 = vsel %vm2860_vm13, %v4990_v6, %v4995_v48  ;;  %v2871_v10 = vsel %vm2860_vm13, %v4989_v26, %v4994_v13 }
 0x829   :  { %v5003_v43 = vpop.permute.xlu1 %5002  ;;  %4423 = vmatprep.subr.bf16.mxu0 %v4422_v42  ;;  %v4432_v50 = vpack.c.bf16 %v2872_v24, %v2871_v10  ;;  %v2934_v10 = vld [vmem:[%s6800_s5 + $0x30] sm:$0xff] }
 0x82a   :  { %v5005_v60 = vunpack.i.h.bf16 %v5003_v43  ;;  %v5004_v46 = vunpack.i.l.bf16 %v5003_v43  ;;  %v2932_v43 = vld [vmem:[%s6800_s5 + $0x20] sm:$0xff] }
 0x82b   :  { %v2967_v28 = vunpack.c.h.bf16 %v2932_v43 }
 0x82c   :  { %4425 = vmatpush3.bf16.msra.mxu0 %v4424_v54 }
 0x82d   :  { %v5033_v62 = vpop.permute.xlu0 %5032  ;;  %v5008_v52 = vpop.permute.xlu1 %5007  ;;  %4427 = vmatprep.subr.bf16.mxu0 %v4426_v19 }
 0x82e   :  { %v5035_v15 = vunpack.i.h.bf16 %v5033_v62  ;;  %v5034_v56 = vunpack.i.l.bf16 %v5033_v62  ;;  %v5010_v59 = vunpack.i.h.bf16 %v5008_v52  ;;  %v5009_v29 = vunpack.i.l.bf16 %v5008_v52 }
 0x82f   :  { %v2966_v52 = vunpack.c.l.bf16 %v2932_v43 }
 0x830   :  { %4429 = vmatpush3.bf16.msra.mxu0 %v4428_v55  ;;  %v2889_v17 = vsel %vm2860_vm13, %v5004_v46, %v5034_v56  ;;  %v2890_v14 = vsel %vm2860_vm13, %v5005_v60, %v5035_v15  ;;  %v2874_v8 = vsel %vm2860_vm13, %v5010_v59, %v5015_v21  ;;  %v2873_v31 = vsel %vm2860_vm13, %v5009_v29, %v5014_v41 }
 0x831   :  { %v5038_v51 = vpop.permute.xlu0 %5037  ;;  %v5018_v38 = vpop.permute.xlu1 %5017  ;;  %4431 = vmatprep.subr.bf16.mxu0 %v4430_v18  ;;  %v4434_v25 = vpack.c.bf16 %v2890_v14, %v2889_v17  ;;  %v4436_v1 = vpack.c.bf16 %v2874_v8, %v2873_v31  ;;  %v2971_v18 = vunpack.c.h.bf16 %v2934_v10  ;;  %v2936_v17 = vld [vmem:[%s6800_s5 + $0x40] sm:$0xff] }
 0x832   :  { %5127 = vrot.lane.b32.xlu0 %v5018_v38, %s5179_s4  ;;  %v5040_v3 = vunpack.i.h.bf16 %v5038_v51  ;;  %v5039_v57 = vunpack.i.l.bf16 %v5038_v51  ;;  %v2970_v38 = vunpack.c.l.bf16 %v2934_v10 }
 0x834   :  { %4433 = vmatpush3.bf16.msra.mxu0 %v4432_v50 }
 0x835   :  { %v5048_v61 = vpop.permute.xlu0 %5047  ;;  %v5028_v33 = vpop.permute.xlu1 %5027  ;;  %4435 = vmatprep.subr.bf16.mxu0 %v4434_v25 }
 0x836   :  { %v5030_v36 = vunpack.i.h.bf16 %v5028_v33  ;;  %v5029_v16 = vunpack.i.l.bf16 %v5028_v33  ;;  %5137 = vrot.lane.b32.xlu0 %v5048_v61, %s5179_s4  ;;  %v2938_v33 = vld [vmem:[%s6800_s5 + $0x50] sm:$0xff] }
 0x838   :  { %4437 = vmatpush3.bf16.msra.mxu0 %v4436_v1  ;;  %v2891_v34 = vsel %vm2860_vm13, %v5024_v0, %v5029_v16  ;;  %v2892_v39 = vsel %vm2860_vm13, %v5025_v63, %v5030_v36  ;;  %v2975_v0 = vunpack.c.h.bf16 %v2936_v17 }
 0x839   :  { %v5058_v45 = vpop.permute.xlu0 %5057  ;;  %v5043_v40 = vpop.permute.xlu1 %5042  ;;  %v4438_v49 = vpack.c.bf16 %v2892_v39, %v2891_v34  ;;  %v2974_v39 = vunpack.c.l.bf16 %v2936_v17 }
 0x83a   :  { %v5045_v44 = vunpack.i.h.bf16 %v5043_v40  ;;  %v5044_v2 = vunpack.i.l.bf16 %v5043_v40  ;;  %v5060_v9 = vunpack.i.h.bf16 %v5058_v45  ;;  %v5059_v23 = vunpack.i.l.bf16 %v5058_v45  ;;  %v6466_v45 = vld [vmem:[%s6803_s8] sm:$0xff] }
 0x83b   :  { %4439 = vmatprep.subr.bf16.mxu0 %v4438_v49 }
 0x83c   :  { %v2876_v58 = vsel %vm2860_vm13, %v5040_v3, %v5045_v44  ;;  %v2875_v22 = vsel %vm2860_vm13, %v5039_v57, %v5044_v2  ;;  %v5182_v44 = vmov 0   ;;  %v2979_v2 = vunpack.c.h.bf16 %v2938_v33 }
 0x83d   :  { %v4440_v12 = vpack.c.bf16 %v2876_v58, %v2875_v22  ;;  %v5068_v42 = vpop.permute.xlu0 %5067  ;;  %v5053_v5 = vpop.permute.xlu1 %5052  ;;  %5141 = vset.pattern.permute.xlu1 %v5182_v44  ;;  %5142 = vset.pattern.permute.xlu0 %v5182_v44  ;;  %v2929_v44 = vld [vmem:[%s6800_s5 + $0x8] sm:$0xff] }
 0x83e   :  { %v5055_v30 = vunpack.i.h.bf16 %v5053_v5  ;;  %v5054_v11 = vunpack.i.l.bf16 %v5053_v5  ;;  %v5070_v6 = vunpack.i.h.bf16 %v5068_v42  ;;  %v5069_v26 = vunpack.i.l.bf16 %v5068_v42  ;;  %3020 = vperm.xlu1 %5141, %v6466_v45  }
 0x83f   :  { %4441 = vmatpush3.bf16.msra.mxu0 %v4440_v12  ;;  %v2978_v5 = vunpack.c.l.bf16 %v2938_v33  ;;  %v6553_v33 = vld [vmem:[%s6803_s8 + $0x48] sm:$0xff] }
 0x840   :  { %v2894_v48 = vsel %vm2860_vm13, %v5055_v30, %v5060_v9  ;;  %v2893_v13 = vsel %vm2860_vm13, %v5054_v11, %v5059_v23  ;;  %4442 = vmatprep.subr.bf16.mxu0 %v5172_v7 }
 0x841   :  { %v4443_v54 = vpack.c.bf16 %v2894_v48, %v2893_v13  ;;  %v5078_v20 = vpop.permute.xlu0 %5077  ;;  %v5063_v27 = vpop.permute.xlu1 %5062  ;;  %v2983_v48 = vunpack.c.h.bf16 %v2940_v4 }
 0x842   :  { %v5065_v19 = vunpack.i.h.bf16 %v5063_v27  ;;  %v5064_v55 = vunpack.i.l.bf16 %v5063_v27  ;;  %3204 = vmatmul.mubr.f32.vlgmr.msra.gmra.mrb[98].mxu0 %v2958_v47  ;;  %v5080_v15 = vunpack.i.h.bf16 %v5078_v20  ;;  %v5079_v56 = vunpack.i.l.bf16 %v5078_v20  ;;  %v6478_v47 = vld [vmem:[%s6803_s8 + $0x8] sm:$0xff] }
 0x843   :  { %4444 = vmatpush1.bf16.msra.mxu0 %v4443_v54  ;;  %3208 = vmatprep.mubr.f32.mxu0 %v2963_v35  ;;  %v2942_v54 = vld [vmem:[%s6800_s5 + $0x70] sm:$0xff] }
 0x844   :  { %v2896_v53 = vsel %vm2860_vm13, %v5065_v19, %v5070_v6  ;;  %v2895_v24 = vsel %vm2860_vm13, %v5064_v55, %v5069_v26  ;;  %4445 = vmatprep.subr.bf16.mxu0 %v5172_v7  ;;  %3025 = vperm.xlu0 %5142, %v6478_v47   ;;  %v6490_v6 = vld [vmem:[%s6803_s8 + $0x10] sm:$0xff] }
 0x845   :  { %v4446_v60 = vpack.c.bf16 %v2896_v53, %v2895_v24  ;;  %v5093_v46 = vpop.permute.xlu0 %5092  ;;  %v5073_v62 = vpop.permute.xlu1 %5072  ;;  %3030 = vperm.xlu1 %5141, %v6490_v6   ;;  %v2987_v53 = vunpack.c.h.bf16 %v2942_v54 }
 0x846   :  { %v5075_v59 = vunpack.i.h.bf16 %v5073_v62  ;;  %v5074_v29 = vunpack.i.l.bf16 %v5073_v62  ;;  %3209 = vmatmul.mubr.f32.gmra.mrb[100].mxu0 %v2962_v32  ;;  %v5095_v8 = vunpack.i.h.bf16 %v5093_v46  ;;  %v5094_v31 = vunpack.i.l.bf16 %v5093_v46  ;;  %v6502_v62 = vld [vmem:[%s6803_s8 + $0x18] sm:$0xff] }
 0x847   :  { %4447 = vmatpush1.bf16.msra.mxu0 %v4446_v60  ;;  %3213 = vmatprep.mubr.f32.mxu0 %v2967_v28  ;;  %v2982_v32 = vunpack.c.l.bf16 %v2940_v4  ;;  %v2944_v60 = vld [vmem:[%s6800_s5 + $0x80] sm:$0xff]  ;;  %v2925_v4 = vld [vmem:[%s6803_s8 + $0x70] sm:$0xff] }
 0x848   :  { %v2898_v21 = vsel %vm2860_vm13, %v5075_v59, %v5080_v15  ;;  %v2897_v41 = vsel %vm2860_vm13, %v5074_v29, %v5079_v56  ;;  %4448 = vmatprep.subr.bf16.mxu0 %v5172_v7  ;;  %v2991_v15 = vunpack.c.h.bf16 %v2944_v60  ;;  %v2946_v56 = vld [vmem:[%s6800_s5 + $0x90] sm:$0xff]  ;;  %v6512_v59 = vld [vmem:[%s6803_s8 + $0x20] sm:$0xff]  ;;  %v2990_v29 = vunpack.c.l.bf16 %v2944_v60 }
 0x849   :  { %v4449_v14 = vpack.c.bf16 %v2898_v21, %v2897_v41  ;;  %v5098_v50 = vpop.permute.xlu0 %5097  ;;  %v5083_v51 = vpop.permute.xlu1 %5082  ;;  %3035 = vperm.xlu1 %5141, %v6502_v62   ;;  %3040 = vperm.xlu0 %5142, %v6512_v59   ;;  %v2948_v21 = vld [vmem:[%s6800_s5 + $0xa0] sm:$0xff]  ;;  %v6521_v41 = vld [vmem:[%s6803_s8 + $0x28] sm:$0xff]  ;;  %v2994_v17 = vunpack.c.l.bf16 %v2946_v56 }
 0x84a   :  { %v5085_v25 = vunpack.i.h.bf16 %v5083_v51  ;;  %v5084_v63 = vunpack.i.l.bf16 %v5083_v51  ;;  %3214 = vmatmul.mubr.f32.gmra.mrb[102].mxu0 %v2966_v52  ;;  %v5100_v40 = vunpack.i.h.bf16 %v5098_v50  ;;  %v5099_v49 = vunpack.i.l.bf16 %v5098_v50  ;;  %v2950_v50 = vld [vmem:[%s6800_s5 + $0xb0] sm:$0xff] }
 0x84b   :  { %4450 = vmatpush1.bf16.msra.mxu0 %v4449_v14  ;;  %3218 = vmatprep.mubr.f32.mxu0 %v2971_v18  ;;  %v2986_v52 = vunpack.c.l.bf16 %v2942_v54  ;;  %v2995_v18 = vunpack.c.h.bf16 %v2946_v56  ;;  %v2999_v14 = vunpack.c.h.bf16 %v2948_v21  ;;  %v6530_v51 = vld [vmem:[%s6803_s8 + $0x30] sm:$0xff] }
 0x84c   :  { %v2900_v1 = vsel %vm2860_vm13, %v5085_v25, %v5095_v8  ;;  %v2899_v61 = vsel %vm2860_vm13, %v5084_v63, %v5094_v31  ;;  %4451 = vmatprep.subr.bf16.mxu0 %v5172_v7  ;;  %v3003_v8 = vunpack.c.h.bf16 %v2950_v50  ;;  %v2952_v31 = vld [vmem:[%s6800_s5 + $0xc0] sm:$0xff]  ;;  %v6539_v25 = vld [vmem:[%s6803_s8 + $0x38] sm:$0xff]  ;;  %v3002_v63 = vunpack.c.l.bf16 %v2950_v50 }
 0x84d   :  { %v4452_v36 = vpack.c.bf16 %v2900_v1, %v2899_v61  ;;  %v5108_v16 = vpop.permute.xlu0 %5107  ;;  %v5088_v34 = vpop.permute.xlu1 %5087  ;;  %3045 = vperm.xlu1 %5141, %v6521_v41   ;;  %3050 = vperm.xlu0 %5142, %v6530_v51   ;;  %v2954_v1 = vld [vmem:[%s6800_s5 + $0xd0] sm:$0xff]  ;;  %v6548_v61 = vld [vmem:[%s6803_s8 + $0x40] sm:$0xff] }
 0x84e   :  { %v5090_v3 = vunpack.i.h.bf16 %v5088_v34  ;;  %v5089_v57 = vunpack.i.l.bf16 %v5088_v34  ;;  %3219 = vmatmul.mubr.f32.gmra.mrb[104].mxu0 %v2970_v38  ;;  %v5110_v9 = vunpack.i.h.bf16 %v5108_v16  ;;  %v5109_v23 = vunpack.i.l.bf16 %v5108_v16  ;;  %v2921_v34 = vld [vmem:[%s6803_s8 + $0x50] sm:$0xff] }
 0x84f   :  { %4453 = vmatpush1.bf16.msra.mxu0 %v4452_v36  ;;  %3223 = vmatprep.mubr.f32.mxu0 %v2975_v0  ;;  %v2998_v38 = vunpack.c.l.bf16 %v2948_v21  ;;  %v3007_v0 = vunpack.c.h.bf16 %v2952_v31  ;;  %v3006_v36 = vunpack.c.l.bf16 %v2952_v31  ;;  %v3011_v16 = vunpack.c.h.bf16 %v2954_v1 }
 0x850   :  { %v2902_v58 = vsel %vm2860_vm13, %v5090_v3, %v5100_v40  ;;  %v2901_v22 = vsel %vm2860_vm13, %v5089_v57, %v5099_v49  ;;  %4454 = vmatprep.subr.bf16.mxu0 %v5172_v7  ;;  %v2922_v40 = vld [vmem:[%s6803_s8 + $0x58] sm:$0xff]  ;;  %v3010_v49 = vunpack.c.l.bf16 %v2954_v1  ;;  %v2923_v57 = vld [vmem:[%s6803_s8 + $0x60] sm:$0xff] }
 0x851   :  { %v4455_v12 = vpack.c.bf16 %v2902_v58, %v2901_v22  ;;  %v5103_v42 = vpop.permute.xlu1 %5102  ;;  %v5118_v35 = vpop.permute.xlu0 %5117  ;;  %3055 = vperm.xlu1 %5141, %v6539_v25   ;;  %3060 = vperm.xlu0 %5142, %v6548_v61   ;;  %v2961_v22 = vunpack.c.h.bf16 %v2929_v44 }
 0x852   :  { %v5105_v30 = vunpack.i.h.bf16 %v5103_v42  ;;  %v5104_v11 = vunpack.i.l.bf16 %v5103_v42  ;;  %3224 = vmatmul.mubr.f32.gmra.mrb[106].mxu0 %v2974_v39  ;;  %v5120_v26 = vunpack.i.h.bf16 %v5118_v35  ;;  %v5119_v19 = vunpack.i.l.bf16 %v5118_v35  ;;  %v2956_v39 = vld [vmem:[%s6800_s5 + $0xe0] sm:$0xff] }
 0x853   :  { %4456 = vmatpush1.bf16.msra.mxu0 %v4455_v12  ;;  %3228 = vmatprep.mubr.f32.mxu0 %v2979_v2  ;;  %v3015_v3 = vunpack.c.h.bf16 %v2956_v39  ;;  %v2924_v2 = vld [vmem:[%s6803_s8 + $0x68] sm:$0xff]  ;;  %v3014_v58 = vunpack.c.l.bf16 %v2956_v39  ;;  %v2947_v39 = vld [vmem:[%s6800_s5 + $0x98] sm:$0xff] }
 0x854   :  { %v2904_v13 = vsel %vm2860_vm13, %v5105_v30, %v5110_v9  ;;  %v2903_v43 = vsel %vm2860_vm13, %v5104_v11, %v5109_v23  ;;  %4457 = vmatprep.subr.bf16.mxu0 %v5172_v7 }
 0x855   :  { %v4458_v20 = vpack.c.bf16 %v2904_v13, %v2903_v43  ;;  %v5113_v27 = vpop.permute.xlu1 %5112  ;;  %3065 = vperm.xlu1 %5141, %v6553_v33   ;;  %3070 = vperm.xlu0 %5142, %v2921_v34  }
 0x856   :  { %v5115_v55 = vunpack.i.h.bf16 %v5113_v27  ;;  %v5114_v28 = vunpack.i.l.bf16 %v5113_v27  ;;  %3229 = vmatmul.mubr.f32.gmra.mrb[108].mxu0 %v2978_v5 }
 0x857   :  { %4459 = vmatpush1.bf16.msra.mxu0 %v4458_v20  ;;  %3233 = vmatprep.mubr.f32.mxu0 %v2983_v48 }
 0x858   :  { %v2906_v24 = vsel %vm2860_vm13, %v5115_v55, %v5120_v26  ;;  %v2905_v10 = vsel %vm2860_vm13, %v5114_v28, %v5119_v19  ;;  %4460 = vmatprep.subr.bf16.mxu0 %v5172_v7  ;;  %v2931_v55 = vld [vmem:[%s6800_s5 + $0x18] sm:$0xff] }
 0x859   :  { %v4461_v46 = vpack.c.bf16 %v2906_v24, %v2905_v10  ;;  %3075 = vperm.xlu1 %5141, %v2922_v40   ;;  %3080 = vperm.xlu0 %5142, %v2923_v57   ;;  %v5123_v12 = vpop.permute.xlu1 %5122  ;;  %v2965_v24 = vunpack.c.h.bf16 %v2931_v55  ;;  %v2933_v10 = vld [vmem:[%s6800_s5 + $0x28] sm:$0xff]  ;;  %v2964_v60 = vunpack.c.l.bf16 %v2931_v55  ;;  %v2996_v57 = vunpack.c.l.bf16 %v2947_v39 }
 0x85a   :  { %3234 = vmatmul.mubr.f32.gmra.mrb[110].mxu0 %v2982_v32  ;;  %v5125_v5 = vunpack.i.h.bf16 %v5123_v12  ;;  %v5124_v9 = vunpack.i.l.bf16 %v5123_v12 }
 0x85b   :  { %4462 = vmatpush1.bf16.msra.mxu0 %v4461_v46  ;;  %3238 = vmatprep.mubr.f32.mxu0 %v2987_v53  ;;  %v2960_v53 = vunpack.c.l.bf16 %v2929_v44  ;;  %v2969_v46 = vunpack.c.h.bf16 %v2933_v10 }
 0x85c   :  { %4463 = vmatprep.subr.bf16.mxu0 %v5172_v7 }
 0x85d   :  { %3085 = vperm.xlu1 %5141, %v2924_v2   ;;  %3090 = vperm.xlu0 %5142, %v2925_v4   ;;  %v5133_v11 = vpop.permute.xlu1 %5132  ;;  %v2951_v2 = vld [vmem:[%s6800_s5 + $0xb8] sm:$0xff]  ;;  %v2953_v4 = vld [vmem:[%s6800_s5 + $0xc8] sm:$0xff] }
 0x85e   :  { %3239 = vmatmul.mubr.f32.gmra.mrb[112].mxu0 %v2986_v52  ;;  %v5135_v54 = vunpack.i.h.bf16 %v5133_v11  ;;  %v5134_v20 = vunpack.i.l.bf16 %v5133_v11  ;;  %v2935_v52 = vld [vmem:[%s6800_s5 + $0x38] sm:$0xff]  ;;  %v3004_v12 = vunpack.c.l.bf16 %v2951_v2 }
 0x85f   :  { %3243 = vmatprep.mubr.f32.mxu0 %v2991_v15  ;;  %v2968_v15 = vunpack.c.l.bf16 %v2933_v10  ;;  %v2973_v56 = vunpack.c.h.bf16 %v2935_v52 }
 0x862   :  { %3244 = vmatmul.mubr.f32.gmra.mrb[114].mxu0 %v2990_v29  ;;  %v2937_v29 = vld [vmem:[%s6800_s5 + $0x48] sm:$0xff] }
 0x863   :  { %3248 = vmatprep.mubr.f32.mxu0 %v2995_v18  ;;  %v2972_v18 = vunpack.c.l.bf16 %v2935_v52  ;;  %v2977_v21 = vunpack.c.h.bf16 %v2937_v29 }
 0x866   :  { %3249 = vmatmul.mubr.f32.gmra.mrb[116].mxu0 %v2994_v17  ;;  %v2939_v17 = vld [vmem:[%s6800_s5 + $0x58] sm:$0xff] }
 0x867   :  { %3253 = vmatprep.mubr.f32.mxu0 %v2999_v14  ;;  %v2976_v14 = vunpack.c.l.bf16 %v2937_v29  ;;  %v2981_v50 = vunpack.c.h.bf16 %v2939_v17 }
 0x86a   :  { %3254 = vmatmul.mubr.f32.gmra.mrb[118].mxu0 %v2998_v38  ;;  %v2941_v38 = vld [vmem:[%s6800_s5 + $0x68] sm:$0xff] }
 0x86b   :  { %3258 = vmatprep.mubr.f32.mxu0 %v3003_v8  ;;  %v2980_v8 = vunpack.c.l.bf16 %v2939_v17  ;;  %v2985_v31 = vunpack.c.h.bf16 %v2941_v38 }
 0x86e   :  { %3259 = vmatmul.mubr.f32.gmra.mrb[120].mxu0 %v3002_v63  ;;  %v2943_v63 = vld [vmem:[%s6800_s5 + $0x78] sm:$0xff] }
 0x86f   :  { %3263 = vmatprep.mubr.f32.mxu0 %v3007_v0  ;;  %v2984_v0 = vunpack.c.l.bf16 %v2941_v38  ;;  %v2989_v1 = vunpack.c.h.bf16 %v2943_v63 }
 0x872   :  { %3264 = vmatmul.mubr.f32.gmra.mrb[122].mxu0 %v3006_v36  ;;  %v2945_v36 = vld [vmem:[%s6800_s5 + $0x88] sm:$0xff] }
 0x873   :  { %3268 = vmatprep.mubr.f32.mxu0 %v3011_v16  ;;  %v2988_v16 = vunpack.c.l.bf16 %v2943_v63  ;;  %v2993_v34 = vunpack.c.h.bf16 %v2945_v36  ;;  %v2992_v40 = vunpack.c.l.bf16 %v2945_v36 }
 0x876   :  { %3269 = vmatmul.mubr.f32.gmra.mrb[124].mxu0 %v3010_v49  ;;  %v2997_v49 = vunpack.c.h.bf16 %v2947_v39 }
 0x877   :  { %3273 = vmatprep.mubr.f32.mxu0 %v3015_v3  ;;  %v2949_v3 = vld [vmem:[%s6800_s5 + $0xa8] sm:$0xff] }
 0x878   :  { %v3001_v44 = vunpack.c.h.bf16 %v2949_v3 }
 0x87a   :  { %3274 = vmatmul.mubr.f32.gmra.mrb[126].mxu0 %v3014_v58  ;;  %v3000_v58 = vunpack.c.l.bf16 %v2949_v3 }
 0x87b   :  { %3922 = vmatprep.mubr.msk.f32.mxu0 %vm3093_vm14, %v2961_v22  ;;  %v3005_v22 = vunpack.c.h.bf16 %v2951_v2 }
 0x8a4   :  { %v5128_v42 = vpop.permute.xlu0 %5127 }
 0x8a5   :  { %v5130_v23 = vunpack.i.h.bf16 %v5128_v42  ;;  %v5129_v30 = vunpack.i.l.bf16 %v5128_v42  ;;  %v3009_v42 = vunpack.c.h.bf16 %v2953_v4 }
 0x8a7   :  { %v2908_v35 = vsel %vm2860_vm13, %v5125_v5, %v5130_v23  ;;  %v2907_v48 = vsel %vm2860_vm13, %v5124_v9, %v5129_v30  ;;  %v2955_v5 = vld [vmem:[%s6800_s5 + $0xd8] sm:$0xff]  ;;  %v3008_v9 = vunpack.c.l.bf16 %v2953_v4  ;;  %v2957_v30 = vld [vmem:[%s6800_s5 + $0xe8] sm:$0xff] }
 0x8a8   :  { %v4464_v13 = vpack.c.bf16 %v2908_v35, %v2907_v48  ;;  %v5138_v43 = vpop.permute.xlu0 %5137  ;;  %v3013_v23 = vunpack.c.h.bf16 %v2955_v5  ;;  %v3012_v11 = vunpack.c.l.bf16 %v2955_v5  ;;  %v3017_v35 = vunpack.c.h.bf16 %v2957_v30 }
 0x8a9   :  { %v5140_v27 = vunpack.i.h.bf16 %v5138_v43  ;;  %v5139_v32 = vunpack.i.l.bf16 %v5138_v43  ;;  %v3016_v48 = vunpack.c.l.bf16 %v2957_v30  ;;  %v5184_v5 = vmov 1  }
 0x8aa   :  { %4465 = vmatpush1.bf16.msra.mxu0 %v4464_v13  ;;  %5143 = vset.pattern.permute.xlu1 %v5184_v5 }
 0x8ab   :  { %v2910_v26 = vsel %vm2860_vm13, %v5135_v54, %v5140_v27  ;;  %v2909_v19 = vsel %vm2860_vm13, %v5134_v20, %v5139_v32  ;;  %4466 = vmatprep.subr.bf16.mxu0 %v5172_v7  ;;  %5144 = vset.pattern.permute.xlu0 %v5184_v5 }
 0x8ac   :  { %v4467_v28 = vpack.c.bf16 %v2910_v26, %v2909_v19  ;;  %3446 = vperm.xlu1 %5143, %v6466_v45   ;;  %3450 = vperm.xlu0 %5144, %v6478_v47  }
 0x8ae   :  { %4468 = vmatpush1.bf16.msra.mxu0 %v4467_v28 }
 0x8af   :  { %4469 = vmatprep.subr.bf16.mxu0 %v5172_v7 }
 0x8b0   :  { %3454 = vperm.xlu1 %5143, %v6490_v6   ;;  %3462 = vperm.xlu0 %5144, %v6512_v59  }
 0x8b1   :  { %3344 = vmatmul.mubr.f32.vlgmr.msra.gmra.mrb[128].mxu0 %v2960_v53 }
 0x8b2   :  { %3923 = vmatprep.mubr.msk.f32.mxu0 %vm3093_vm14, %v2965_v24 }
 0x8b4   :  { %3458 = vperm.xlu1 %5143, %v6502_v62   ;;  %3470 = vperm.xlu0 %5144, %v6530_v51  }
 0x8b5   :  { %3349 = vmatmul.mubr.f32.gmra.mrb[130].mxu0 %v2964_v60 }
 0x8b6   :  { %3924 = vmatprep.mubr.msk.f32.mxu0 %vm3093_vm14, %v2969_v46 }
 0x8b8   :  { %3466 = vperm.xlu1 %5143, %v6521_v41   ;;  %3478 = vperm.xlu0 %5144, %v6548_v61  }
 0x8b9   :  { %3354 = vmatmul.mubr.f32.gmra.mrb[132].mxu0 %v2968_v15 }
 0x8ba   :  { %3925 = vmatprep.mubr.msk.f32.mxu0 %vm3093_vm14, %v2973_v56 }
 0x8bc   :  { %3474 = vperm.xlu1 %5143, %v6539_v25  }
 0x8bd   :  { %3359 = vmatmul.mubr.f32.gmra.mrb[134].mxu0 %v2972_v18  ;;  %v3021_v47 = vpop.permute.xlu1 %3020 }
 0x8be   :  { %3926 = vmatprep.mubr.msk.f32.mxu0 %vm3093_vm14, %v2977_v21 }
 0x8c0   :  { %3482 = vperm.xlu1 %5143, %v6553_v33  }
 0x8c1   :  { %3364 = vmatmul.mubr.f32.gmra.mrb[136].mxu0 %v2976_v14 }
 0x8c2   :  { %3927 = vmatprep.mubr.msk.f32.mxu0 %vm3093_vm14, %v2981_v50 }
 0x8c3   :  { %v3026_v59 = vpop.permute.xlu0 %3025 }
 0x8c4   :  { %v3031_v51 = vpop.permute.xlu1 %3030 }
 0x8c5   :  { %3369 = vmatmul.mubr.f32.gmra.mrb[138].mxu0 %v2980_v8 }
 0x8c6   :  { %3928 = vmatprep.mubr.msk.f32.mxu0 %vm3093_vm14, %v2985_v31 }
 0x8c8   :  { %v3036_v25 = vpop.permute.xlu1 %3035 }
 0x8c9   :  { %3374 = vmatmul.mubr.f32.gmra.mrb[140].mxu0 %v2984_v0 }
 0x8ca   :  { %3929 = vmatprep.mubr.msk.f32.mxu0 %vm3093_vm14, %v2989_v1 }
 0x8cd   :  { %3379 = vmatmul.mubr.f32.gmra.mrb[142].mxu0 %v2988_v16 }
 0x8ce   :  { %3930 = vmatprep.mubr.msk.f32.mxu0 %vm3093_vm14, %v2993_v34 }
 0x8d1   :  { %3384 = vmatmul.mubr.f32.gmra.mrb[144].mxu0 %v2992_v40 }
 0x8d2   :  { %3931 = vmatprep.mubr.msk.f32.mxu0 %vm3093_vm14, %v2997_v49 }
 0x8d5   :  { %3389 = vmatmul.mubr.f32.gmra.mrb[146].mxu0 %v2996_v57 }
 0x8d6   :  { %3932 = vmatprep.mubr.msk.f32.mxu0 %vm3093_vm14, %v3001_v44 }
 0x8d9   :  { %3394 = vmatmul.mubr.f32.gmra.mrb[148].mxu0 %v3000_v58 }
 0x8da   :  { %3933 = vmatprep.mubr.msk.f32.mxu0 %vm3093_vm14, %v3005_v22 }
 0x8dd   :  { %3399 = vmatmul.mubr.f32.gmra.mrb[150].mxu0 %v3004_v12 }
 0x8de   :  { %3934 = vmatprep.mubr.msk.f32.mxu0 %vm3093_vm14, %v3009_v42 }
 0x8e1   :  { %3404 = vmatmul.mubr.f32.gmra.mrb[152].mxu0 %v3008_v9  ;;  %v2926_v9 = vld [vmem:[%s6803_s8 + $0x50] sm:$0xf] }
 0x8e2   :  { %3935 = vmatprep.mubr.msk.f32.mxu0 %vm3093_vm14, %v3013_v23  ;;  %3487 = vperm.xlu0 %5144, %v2926_v9  }
 0x8e5   :  { %3409 = vmatmul.mubr.f32.gmra.mrb[154].mxu0 %v3012_v11 }
 0x8e6   :  { %3936 = vmatprep.mubr.msk.f32.mxu0 %vm3093_vm14, %v3017_v35 }
 0x8e9   :  { %3414 = vmatmul.mubr.f32.gmra.mrb[156].mxu0 %v3016_v48 }
 0x8ea   :  { %4215 = vmatprep.mubr.msk.f32.mxu0 %vm5183_vm15, %v5177_v37 }
 0x915   :  { %v4029_v13 = vpop.f32.mrb[98].mxu0 }
 0x916   :  { %v4030_v43 = vpop.f32.mrb[99].mxu0 }
 0x917   :  { %v4031_v54 = vadd.f32 %v4030_v43, %v4029_v13 }
 0x919   :  { %v4032_v20 = vpop.f32.mrb[100].mxu0  ;;  %v3206_v6 = vadd.f32 %v4031_v54, %v3021_v47 }
 0x91a   :  { %v4033_v27 = vpop.f32.mrb[101].mxu0 }
 0x91b   :  { %v6641_v32 = vadd.f32 %v4033_v27, %v4032_v20 }
 0x91d   :  { %v4035_v26 = vpop.f32.mrb[102].mxu0  ;;  %v3211_v41 = vadd.f32 %v6641_v32, %v3026_v59 }
 0x91e   :  { %v4036_v19 = vpop.f32.mrb[103].mxu0 }
 0x91f   :  { %v6643_v55 = vadd.f32 %v4036_v19, %v4035_v26  ;;  %v3041_v19 = vpop.permute.xlu0 %3040 }
 0x921   :  { %v4038_v28 = vpop.f32.mrb[104].mxu0  ;;  %v3216_v48 = vadd.f32 %v6643_v55, %v3031_v51 }
 0x922   :  { %v4039_v53 = vpop.f32.mrb[105].mxu0 }
 0x923   :  { %v6645_v24 = vadd.f32 %v4039_v53, %v4038_v28 }
 0x925   :  { %v4041_v10 = vpop.f32.mrb[106].mxu0  ;;  %v3221_v54 = vadd.f32 %v6645_v24, %v3036_v25  ;;  %v3051_v24 = vpop.permute.xlu0 %3050 }
 0x926   :  { %v4042_v60 = vpop.f32.mrb[107].mxu0 }
 0x927   :  { %v6647_v46 = vadd.f32 %v4042_v60, %v4041_v10 }
 0x929   :  { %v4044_v52 = vpop.f32.mrb[108].mxu0  ;;  %v3226_v10 = vadd.f32 %v6647_v46, %v3041_v19 }
 0x92a   :  { %v4045_v15 = vpop.f32.mrb[109].mxu0 }
 0x92b   :  { %v6649_v56 = vadd.f32 %v4045_v15, %v4044_v52  ;;  %v3046_v52 = vpop.permute.xlu1 %3045 }
 0x92d   :  { %v4047_v29 = vpop.f32.mrb[110].mxu0 }
 0x92e   :  { %v4048_v18 = vpop.f32.mrb[111].mxu0 }
 0x92f   :  { %v6651_v21 = vadd.f32 %v4048_v18, %v4047_v29 }
 0x931   :  { %v4050_v17 = vpop.f32.mrb[112].mxu0 }
 0x932   :  { %v4051_v14 = vpop.f32.mrb[113].mxu0 }
 0x933   :  { %v6653_v50 = vadd.f32 %v4051_v14, %v4050_v17  ;;  %v3231_v14 = vadd.f32 %v6649_v56, %v3046_v52  ;;  %v3061_v56 = vpop.permute.xlu0 %3060 }
 0x935   :  { %v4053_v38 = vpop.f32.mrb[114].mxu0 }
 0x936   :  { %v4054_v8 = vpop.f32.mrb[115].mxu0 }
 0x937   :  { %v6655_v31 = vadd.f32 %v4054_v8, %v4053_v38 }
 0x939   :  { %v4056_v63 = vpop.f32.mrb[116].mxu0  ;;  %v3246_v5 = vadd.f32 %v6655_v31, %v3061_v56  ;;  %v3655_v56 = vld [vmem:[%s6802_s7] sm:$0xff] }
 0x93a   :  { %v4057_v0 = vpop.f32.mrb[117].mxu0  ;;  %4270 = vmatprep.mubr.msk.f32.mxu1 %vm3666_vm1, %v3655_v56 }
 0x93b   :  { %v6657_v1 = vadd.f32 %v4057_v0, %v4056_v63  ;;  %v3236_v0 = vadd.f32 %v6651_v21, %v3051_v24 }
 0x93d   :  { %v4059_v36 = vpop.f32.mrb[118].mxu0 }
 0x93e   :  { %v4060_v16 = vpop.f32.mrb[119].mxu0 }
 0x93f   :  { %v6659_v34 = vadd.f32 %v4060_v16, %v4059_v36  ;;  %v3056_v16 = vpop.permute.xlu1 %3055 }
 0x941   :  { %v4062_v39 = vpop.f32.mrb[120].mxu0 }
 0x942   :  { %v4063_v40 = vpop.f32.mrb[121].mxu0 }
 0x943   :  { %v6661_v49 = vadd.f32 %v4063_v40, %v4062_v39  ;;  %v3066_v47 = vpop.permute.xlu1 %3065 }
 0x945   :  { %v4065_v3 = vpop.f32.mrb[122].mxu0 }
 0x946   :  { %v4066_v57 = vpop.f32.mrb[123].mxu0 }
 0x947   :  { %v6663_v44 = vadd.f32 %v4066_v57, %v4065_v3 }
 0x949   :  { %v4068_v2 = vpop.f32.mrb[124].mxu0 }
 0x94a   :  { %v4069_v58 = vpop.f32.mrb[125].mxu0 }
 0x94b   :  { %v6667_v22 = vadd.f32 %v4069_v58, %v4068_v2  ;;  %v3241_v2 = vadd.f32 %v6653_v50, %v3056_v16  ;;  %v3071_v50 = vpop.permute.xlu0 %3070  ;;  %v3439_v16 = vld [vmem:[%s6801_s6 + $0x28] sm:$0xff] }
 0x94d   :  { %v4071_v4 = vpop.f32.mrb[126].mxu0 }
 0x94e   :  { %v4072_v12 = vpop.f32.mrb[127].mxu0 }
 0x94f   :  { %v6669_v42 = vadd.f32 %v4072_v12, %v4071_v4 }
 0x984   :  { %v3345_v23 = vpop.f32.mrb[128].mxu0 }
 0x985   :  { %v3346_v62 = vadd.f32 %v3345_v23, %v3206_v6  ;;  %v3347_v30 = vpop.f32.mrb[129].mxu0 }
 0x986   :  { %v3251_v30 = vadd.f32 %v6657_v1, %v3066_v47  ;;  %v3081_v1 = vpop.permute.xlu0 %3080 }
 0x987   :  { %v3419_v13 = vmax.f32 %v3346_v62, 0.0  ;;  %v3266_v19 = vadd.f32 %v6663_v44, %v3081_v1 }
 0x988   :  { %v3350_v11 = vpop.f32.mrb[130].mxu0 }
 0x989   :  { %v3351_v61 = vadd.f32 %v3350_v11, %v3211_v41  ;;  %v3352_v35 = vpop.f32.mrb[131].mxu0 }
 0x98b   :  { %v3420_v43 = vmax.f32 %v3351_v61, 0.0  ;;  %v3256_v61 = vadd.f32 %v6659_v34, %v3071_v50 }
 0x98c   :  { %v3355_v20 = vpop.f32.mrb[132].mxu0 }
 0x98d   :  { %v4470_v27 = vpack.c.bf16 %v3420_v43, %v3419_v13  ;;  %v3356_v26 = vadd.f32 %v3355_v20, %v3216_v48  ;;  %v3357_v33 = vpop.f32.mrb[133].mxu0  ;;  %v3076_v48 = vpop.permute.xlu1 %3075 }
 0x98f   :  { %4471 = vmatpush3.bf16.msra.mxu0 %v4470_v27  ;;  %v3421_v60 = vmax.f32 %v3356_v26, 0.0  ;;  %v3261_v27 = vadd.f32 %v6661_v49, %v3076_v48  ;;  %v3091_v49 = vpop.permute.xlu0 %3090 }
 0x990   :  { %v3360_v28 = vpop.f32.mrb[134].mxu0  ;;  %4472 = vmatprep.subr.bf16.mxu0 %v5172_v7 }
 0x991   :  { %v3361_v32 = vadd.f32 %v3360_v28, %v3221_v54  ;;  %v3362_v53 = vpop.f32.mrb[135].mxu0 }
 0x993   :  { %v3422_v55 = vmax.f32 %v3361_v32, 0.0  ;;  %v3086_v32 = vpop.permute.xlu1 %3085 }
 0x994   :  { %v3365_v15 = vpop.f32.mrb[136].mxu0  ;;  %v3271_v52 = vadd.f32 %v6667_v22, %v3086_v32  ;;  %v3434_v22 = vld [vmem:[%s6801_s6] sm:$0xff] }
 0x995   :  { %v4473_v29 = vpack.c.bf16 %v3422_v55, %v3421_v60  ;;  %v3366_v18 = vadd.f32 %v3365_v15, %v3226_v10  ;;  %v3367_v17 = vpop.f32.mrb[137].mxu0 }
 0x996   :  { %v3276_v17 = vadd.f32 %v6669_v42, %v3091_v49  ;;  %v3436_v42 = vld [vmem:[%s6801_s6 + $0x10] sm:$0xff] }
 0x997   :  { %4474 = vmatpush3.bf16.msra.mxu0 %v4473_v29  ;;  %v3423_v36 = vmax.f32 %v3366_v18, 0.0 }
 0x998   :  { %v3370_v38 = vpop.f32.mrb[138].mxu0  ;;  %4475 = vmatprep.subr.bf16.mxu0 %v5172_v7 }
 0x999   :  { %v3371_v8 = vadd.f32 %v3370_v38, %v3231_v14  ;;  %v3372_v63 = vpop.f32.mrb[139].mxu0 }
 0x99b   :  { %v3424_v46 = vmax.f32 %v3371_v8, 0.0 }
 0x99c   :  { %v3375_v39 = vpop.f32.mrb[140].mxu0 }
 0x99d   :  { %v4476_v40 = vpack.c.bf16 %v3424_v46, %v3423_v36  ;;  %v3376_v3 = vadd.f32 %v3375_v39, %v3236_v0  ;;  %v3377_v57 = vpop.f32.mrb[141].mxu0  ;;  %v3437_v36 = vld [vmem:[%s6801_s6 + $0x18] sm:$0xff]  ;;  %v3438_v46 = vld [vmem:[%s6801_s6 + $0x20] sm:$0xff]  ;;  %v3440_v39 = vld [vmem:[%s6801_s6 + $0x30] sm:$0xff] }
 0x99e   :  { %v3443_v57 = vld [vmem:[%s6801_s6 + $0x48] sm:$0xff] }
 0x99f   :  { %4477 = vmatpush3.bf16.msra.mxu0 %v4476_v40  ;;  %v3425_v9 = vmax.f32 %v3376_v3, 0.0  ;;  %v3441_v40 = vld [vmem:[%s6801_s6 + $0x38] sm:$0xff]  ;;  %v3442_v3 = vld [vmem:[%s6801_s6 + $0x40] sm:$0xff] }
 0x9a0   :  { %v3380_v58 = vpop.f32.mrb[142].mxu0  ;;  %4478 = vmatprep.subr.bf16.mxu0 %v5172_v7 }
 0x9a1   :  { %v3381_v4 = vadd.f32 %v3380_v58, %v3241_v2  ;;  %v3382_v12 = vpop.f32.mrb[143].mxu0  ;;  %v3444_v2 = vld [vmem:[%s6801_s6 + $0x50] sm:$0xf]  ;;  %v2927_v58 = vld [vmem:[%s6803_s8 + $0x8] sm:$0x3] }
 0x9a3   :  { %v3426_v21 = vmax.f32 %v3381_v4, 0.0  ;;  %v5185_v4 = vmov 2  }
 0x9a4   :  { %v3385_v6 = vpop.f32.mrb[144].mxu0  ;;  %5145 = vset.pattern.permute.xlu1 %v5185_v4  ;;  %5146 = vset.pattern.permute.xlu0 %v5185_v4 }
 0x9a5   :  { %v4479_v59 = vpack.c.bf16 %v3426_v21, %v3425_v9  ;;  %v3386_v23 = vadd.f32 %v3385_v6, %v3246_v5  ;;  %v3387_v62 = vpop.f32.mrb[145].mxu0  ;;  %3658 = vperm.xlu1 %5145, %v6466_v45   ;;  %3663 = vperm.xlu0 %5146, %v2927_v58   ;;  %v3451_v9 = vpop.permute.xlu0 %3450 }
 0x9a7   :  { %4480 = vmatpush3.bf16.msra.mxu0 %v4479_v59  ;;  %v3427_v35 = vmax.f32 %v3386_v23, 0.0 }
 0x9a8   :  { %v3390_v51 = vpop.f32.mrb[146].mxu0  ;;  %4481 = vmatprep.subr.bf16.mxu0 %v5172_v7 }
 0x9a9   :  { %v3391_v41 = vadd.f32 %v3390_v51, %v3251_v30  ;;  %v3392_v11 = vpop.f32.mrb[147].mxu0 }
 0x9ab   :  { %v3428_v31 = vmax.f32 %v3391_v41, 0.0 }
 0x9ac   :  { %v3395_v13 = vpop.f32.mrb[148].mxu0 }
 0x9ad   :  { %v4482_v43 = vpack.c.bf16 %v3428_v31, %v3427_v35  ;;  %v3396_v25 = vadd.f32 %v3395_v13, %v3256_v61  ;;  %v3397_v20 = vpop.f32.mrb[149].mxu0 }
 0x9af   :  { %4483 = vmatpush3.bf16.msra.mxu0 %v4482_v43  ;;  %v3429_v28 = vmax.f32 %v3396_v25, 0.0 }
 0x9b0   :  { %v3400_v26 = vpop.f32.mrb[150].mxu0  ;;  %4484 = vmatprep.subr.bf16.mxu0 %v5172_v7 }
 0x9b1   :  { %v3401_v33 = vadd.f32 %v3400_v26, %v3261_v27  ;;  %v3402_v54 = vpop.f32.mrb[151].mxu0  ;;  %v3463_v27 = vpop.permute.xlu0 %3462 }
 0x9b3   :  { %v3430_v34 = vmax.f32 %v3401_v33, 0.0 }
 0x9b4   :  { %v3405_v53 = vpop.f32.mrb[152].mxu0 }
 0x9b5   :  { %v4485_v10 = vpack.c.bf16 %v3430_v34, %v3429_v28  ;;  %v3406_v60 = vadd.f32 %v3405_v53, %v3266_v19  ;;  %v3407_v55 = vpop.f32.mrb[153].mxu0 }
 0x9b7   :  { %4486 = vmatpush3.bf16.msra.mxu0 %v4485_v10  ;;  %v3431_v14 = vmax.f32 %v3406_v60, 0.0  ;;  %v3471_v60 = vpop.permute.xlu0 %3470 }
 0x9b8   :  { %v3410_v15 = vpop.f32.mrb[154].mxu0  ;;  %4487 = vmatprep.subr.bf16.mxu0 %v5172_v7  ;;  %v3435_v7 = vld [vmem:[%s6801_s6 + $0x8] sm:$0xff] }
 0x9b9   :  { %v3411_v29 = vadd.f32 %v3410_v15, %v3271_v52  ;;  %v3412_v18 = vpop.f32.mrb[155].mxu0 }
 0x9bb   :  { %v3432_v44 = vmax.f32 %v3411_v29, 0.0 }
 0x9bc   :  { %v3415_v24 = vpop.f32.mrb[156].mxu0 }
 0x9bd   :  { %v4488_v38 = vpack.c.bf16 %v3432_v44, %v3431_v14  ;;  %v3416_v8 = vadd.f32 %v3415_v24, %v3276_v17  ;;  %v3417_v63 = vpop.f32.mrb[157].mxu0 }
 0x9bf   :  { %4489 = vmatpush3.bf16.msra.mxu0 %v4488_v38  ;;  %v3433_v0 = vmax.f32 %v3416_v8, 0.0  ;;  %v3479_v38 = vpop.permute.xlu0 %3478 }
 0x9c0   :  { %4213 = vmatprep.subr.mxu0 %v5177_v37 }
 0x9c3   :  { %4214 = vmatpush3.msra.mxu0 %v3433_v0 }
 0x9c4   :  { %4216 = vmatmul.mubr.msk.f32.vlgmr.msra.gmra.mrb[158].mxu0 %vm3490_vm0, %v3434_v22 }
 0x9c5   :  { %4218 = vmatprep.mubr.msk.f32.mxu0 %vm5183_vm15, %v5177_v37 }
 0x9c8   :  { %4219 = vmatmul.mubr.msk.f32.gmra.mrb[160].mxu0 %vm3490_vm0, %v3435_v7 }
 0x9c9   :  { %4221 = vmatprep.mubr.msk.f32.mxu0 %vm5183_vm15, %v5177_v37 }
 0x9cc   :  { %4222 = vmatmul.mubr.msk.f32.gmra.mrb[162].mxu0 %vm3490_vm0, %v3436_v42 }
 0x9cd   :  { %4224 = vmatprep.mubr.msk.f32.mxu0 %vm5183_vm15, %v5177_v37 }
 0x9d0   :  { %4225 = vmatmul.mubr.msk.f32.gmra.mrb[164].mxu0 %vm3490_vm0, %v3437_v36 }
 0x9d1   :  { %4227 = vmatprep.mubr.msk.f32.mxu0 %vm5183_vm15, %v5177_v37 }
 0x9d4   :  { %4228 = vmatmul.mubr.msk.f32.gmra.mrb[166].mxu0 %vm3490_vm0, %v3438_v46  ;;  %v3488_v46 = vpop.permute.xlu0 %3487 }
 0x9d5   :  { %4230 = vmatprep.mubr.msk.f32.mxu0 %vm5183_vm15, %v5177_v37 }
 0x9d8   :  { %4231 = vmatmul.mubr.msk.f32.gmra.mrb[168].mxu0 %vm3490_vm0, %v3439_v16 }
 0x9d9   :  { %4233 = vmatprep.mubr.msk.f32.mxu0 %vm5183_vm15, %v5177_v37 }
 0x9dc   :  { %4234 = vmatmul.mubr.msk.f32.gmra.mrb[170].mxu0 %vm3490_vm0, %v3440_v39 }
 0x9dd   :  { %4236 = vmatprep.mubr.msk.f32.mxu0 %vm5183_vm15, %v5177_v37 }
 0x9e0   :  { %4237 = vmatmul.mubr.msk.f32.gmra.mrb[172].mxu0 %vm3490_vm0, %v3441_v40 }
 0x9e1   :  { %4239 = vmatprep.mubr.msk.f32.mxu0 %vm5183_vm15, %v5177_v37 }
 0x9e4   :  { %4240 = vmatmul.mubr.msk.f32.gmra.mrb[174].mxu0 %vm3490_vm0, %v3442_v3 }
 0x9e5   :  { %4242 = vmatprep.mubr.msk.f32.mxu0 %vm5183_vm15, %v5177_v37 }
 0x9e8   :  { %4243 = vmatmul.mubr.msk.f32.gmra.mrb[176].mxu0 %vm3490_vm0, %v3443_v57 }
 0x9e9   :  { %4245 = vmatprep.mubr.msk.f32.mxu0 %vm5183_vm15, %v5177_v37  ;;  %v3447_v37 = vpop.permute.xlu1 %3446 }
 0x9ec   :  { %4246 = vmatmul.mubr.msk.f32.gmra.mrb[178].mxu0 %vm3490_vm0, %v3444_v2  ;;  %v3656_v2 = vld [vmem:[%s6802_s7 + $0x8] sm:$0x3] }
 0x9ed   :  { %v3455_v23 = vpop.permute.xlu1 %3454 }
 0x9f1   :  { %v3459_v61 = vpop.permute.xlu1 %3458 }
 0x9f5   :  { %v3467_v26 = vpop.permute.xlu1 %3466 }
 0x9f9   :  { %v3475_v52 = vpop.permute.xlu1 %3474 }
 0x9fd   :  { %v3483_v63 = vpop.permute.xlu1 %3482 }
 0xa24   :  { %v3659_v56 = vpop.permute.xlu1 %3658 }
 0xa97   :  { %v3590_v12 = vpop.f32.mrb[158].mxu0 }
 0xa98   :  { %v4217_v5 = vpop.f32.mrb[159].mxu0  ;;  %v3591_v21 = vadd.f32 %v3590_v12, %v3447_v37  ;;  %v3664_v12 = vpop.permute.xlu0 %3663 }
 0xa9a   :  { %v3644_v62 = vmax.f32 %v3591_v21, 0.0 }
 0xa9b   :  { %v3595_v47 = vpop.f32.mrb[160].mxu0 }
 0xa9c   :  { %v3596_v6 = vadd.f32 %v3595_v47, %v3451_v9  ;;  %v4220_v59 = vpop.f32.mrb[161].mxu0 }
 0xa9e   :  { %v3645_v30 = vmax.f32 %v3596_v6, 0.0 }
 0xa9f   :  { %v3600_v50 = vpop.f32.mrb[162].mxu0 }
 0xaa0   :  { %v4490_v51 = vpack.c.bf16 %v3645_v30, %v3644_v62  ;;  %v4223_v41 = vpop.f32.mrb[163].mxu0  ;;  %v3601_v11 = vadd.f32 %v3600_v50, %v3455_v23 }
 0xaa2   :  { %4491 = vmatprep.subr.bf16.mxu1 %v4490_v51  ;;  %v3646_v48 = vmax.f32 %v3601_v11, 0.0 }
 0xaa3   :  { %v3605_v35 = vpop.f32.mrb[164].mxu0  ;;  %4493 = vmatpush3.bf16.msra.mxu1 %v4490_v51 }
 0xaa4   :  { %v3606_v45 = vadd.f32 %v3605_v35, %v3459_v61  ;;  %v4226_v31 = vpop.f32.mrb[165].mxu0 }
 0xaa6   :  { %v3647_v13 = vmax.f32 %v3606_v45, 0.0 }
 0xaa7   :  { %v3610_v43 = vpop.f32.mrb[166].mxu0 }
 0xaa8   :  { %v4494_v25 = vpack.c.bf16 %v3647_v13, %v3646_v48  ;;  %v4229_v20 = vpop.f32.mrb[167].mxu0  ;;  %v3611_v1 = vadd.f32 %v3610_v43, %v3463_v27 }
 0xaaa   :  { %4495 = vmatprep.subr.bf16.mxu1 %v4494_v25  ;;  %v3648_v28 = vmax.f32 %v3611_v1, 0.0 }
 0xaab   :  { %v3615_v33 = vpop.f32.mrb[168].mxu0  ;;  %4497 = vmatpush3.bf16.msra.mxu1 %v4494_v25 }
 0xaac   :  { %v3616_v54 = vadd.f32 %v3615_v33, %v3467_v26  ;;  %v4232_v19 = vpop.f32.mrb[169].mxu0 }
 0xaae   :  { %v3649_v34 = vmax.f32 %v3616_v54, 0.0 }
 0xaaf   :  { %v3620_v32 = vpop.f32.mrb[170].mxu0 }
 0xab0   :  { %v4498_v53 = vpack.c.bf16 %v3649_v34, %v3648_v28  ;;  %v4235_v10 = vpop.f32.mrb[171].mxu0  ;;  %v3621_v55 = vadd.f32 %v3620_v32, %v3471_v60 }
 0xab2   :  { %4499 = vmatprep.subr.bf16.mxu1 %v4498_v53  ;;  %v3650_v18 = vmax.f32 %v3621_v55, 0.0 }
 0xab3   :  { %v3625_v49 = vpop.f32.mrb[172].mxu0  ;;  %4501 = vmatpush3.bf16.msra.mxu1 %v4498_v53 }
 0xab4   :  { %v3626_v15 = vadd.f32 %v3625_v49, %v3475_v52  ;;  %v4238_v29 = vpop.f32.mrb[173].mxu0 }
 0xab6   :  { %v3651_v17 = vmax.f32 %v3626_v15, 0.0 }
 0xab7   :  { %v3630_v14 = vpop.f32.mrb[174].mxu0 }
 0xab8   :  { %v4502_v44 = vpack.c.bf16 %v3651_v17, %v3650_v18  ;;  %v4241_v24 = vpop.f32.mrb[175].mxu0  ;;  %v3631_v8 = vadd.f32 %v3630_v14, %v3479_v38 }
 0xaba   :  { %4503 = vmatprep.subr.bf16.mxu1 %v4502_v44  ;;  %v3652_v42 = vmax.f32 %v3631_v8, 0.0 }
 0xabb   :  { %v3635_v0 = vpop.f32.mrb[176].mxu0  ;;  %4505 = vmatpush3.bf16.msra.mxu1 %v4502_v44 }
 0xabc   :  { %v3636_v22 = vadd.f32 %v3635_v0, %v3483_v63  ;;  %v4244_v7 = vpop.f32.mrb[177].mxu0 }
 0xabe   :  { %v3653_v36 = vmax.f32 %v3636_v22, 0.0 }
 0xabf   :  { %v3640_v16 = vpop.f32.mrb[178].mxu0 }
 0xac0   :  { %v4506_v39 = vpack.c.bf16 %v3653_v36, %v3652_v42  ;;  %v3641_v40 = vadd.f32 %v3640_v16, %v3488_v46  ;;  %v4247_v3 = vpop.f32.mrb[179].mxu0 }
 0xac2   :  { %v3654_v57 = vmax.f32 %v3641_v40, 0.0  ;;  %4507 = vmatprep.subr.bf16.mxu1 %v4506_v39 }
 0xac3   :  { %4509 = vmatpush3.bf16.msra.mxu1 %v4506_v39 }
 0xac4   :  { %4268 = vmatprep.subr.msk.mxu1 %vm608_vm6, %v3654_v57 }
 0xac7   :  { %4269 = vmatpush3.msk.msra.mxu1 %vm608_vm6, %v3654_v57 }
 0xac8   :  { %4271 = vmatmul.mubr.msk.f32.vlgmr.msra.gmra.mrb[100].mxu1 %vm3666_vm1, %v3656_v2 }
 0xb9b   :  { %v4272_v58 = vpop.f32.mrb[100].mxu1 }
 0xb9c   :  { %v3742_v4 = vpop.f32.mrb[101].mxu1  ;;  %v3748_v5 = vadd.f32 %v4272_v58, %v3664_v12 }
 0xb9d   :  { %v3743_v37 = vadd.f32 %v3742_v4, %v3659_v56 }
 0xb9f   :  { %3751 = vxpose.xlu1.b32.start [1/2] (short) (narrow) %v3743_v37, 8 }
 0xba3   :  { %3752 = vxpose.xlu1.b32.end [2/2] (short) (narrow) %v3748_v5, 8 }
 0xc1f   :  { %v3767_v9 = vpop.trf.xlu1 }
 0xc20   :  { %3784 = vst.msk [vmem:[#allocation2] sm:$0x3] %vm3783_vm2, %v3767_v9 }
 0xc21   :  { %5158 = shalt.err (!%p5155_p4)
}
 0xc22   :  { %s5159_s12 = scalar_lea.hbm %s6804_s9, 32 }
 0xc23   :  { %p5160_p5 = scmp.ne.s32.totalorder %s6804_s9, %s5159_s12  ;;  %p5163_p6 = scmp.lt.u32.totalorder %s5159_s12, %s6804_s9 }
 0xc25   :  { %p5165_p7 = pnand %p5163_p6, %p5160_p5 }
 0xc27   :  { %5168 = shalt.err (!%p5165_p7)
}
 0xc28   :  { %3794 = dma.vmem_to_hbm [thread:$0]  %s3792_s30, 32, %s6804_s9, [#allocation3]  }
 0xc29   :  { %5169 = dma.done.wait [#allocation3], 32  }
 0xc2a   :  { %5170 = vsyncadd [#allocation3], 4294967264 }
 0xc2b   :  { %3798 = vsyncpa [#allocation3], 1 }

</bundles_post_ra>
